<compile_context>
chip_gen: v5e
topology: v5e:2x2
jax: 0.10.0
libtpu: 0.0.40
codegen_flags: <defaults>
</compile_context>

<pallas_src>
import functools

import numpy as np

import jax
import jax.numpy as jnp
from jax.experimental import pallas as pl
from jax.experimental.pallas import tpu as pltpu


def _round_up(x, m):
    return ((x + m - 1) // m) * m


def _vmem_limit_bytes(HW, Cin, N, F, Cenc, S, layers, pad):
    """Rough lane-padded VMEM budget: scratch + double-buffered blocks + weights."""
    def tile(rows, cols, itemsize):
        return _round_up(max(rows, 1), 8) * _round_up(max(cols, 1), 128) * itemsize

    scratch = (tile(HW + 2 * pad, Cin, 4)   # zero-haloed image rows
               + tile(HW, 9 * Cin, 4)       # im2col slab
               + tile(HW, F, 4)             # deformer features
               + tile(N, F, 4))             # gathered node features
    per_step = (tile(HW, Cin, 4) + tile(N, 2, 4) + tile(N, 1, 4)  # x, pt, mask
                + tile(N, 2, 4))                                  # pred out
    shared = (tile(N, N, 2) + tile(9 * Cin, Cenc, 2) + tile(1, Cenc, 4)
              + tile(Cenc, F, 2) + tile(1, F, 4) + tile(F, S, 2) + tile(2, S, 2)
              + tile(1, S, 4) + 2 * layers * tile(S, S, 2) + layers * tile(1, S, 4)
              + tile(S, 2, 2) + tile(1, 2, 4))
    est = scratch + 2 * (per_step + shared) + (4 << 20)   # 2x double-buffer + temps
    # headroom under v7x's 64 MiB physical VMEM (v5e/v6e have 128 MiB)
    return min(max(est, 16 << 20), 48 << 20)


# ----------------------------------------------------------------------------
# Fused kernel: encoder conv (im2col) + NetHead + point gather + DeformGNN.
# One batch element per grid step; everything stays in VMEM.
# ----------------------------------------------------------------------------
def _fused_kernel(idx_ref,                                   # SMEM (B, N) int32 (scalar prefetch)
                  x_ref, pt_ref, mask_ref, adj_ref,
                  w_conv_ref, b_enc_ref, w_head_ref, b_head_ref,
                  w_in_f_ref, w_in_p_ref, b_in_ref,
                  w_self_ref, w_nbr_ref, b_l_ref,
                  w_out_ref, b_out_ref,
                  pred_ref,
                  xext_ref, im2col_ref, feat_ref, nf_ref,
                  *, img_w, pad, layers):
    b = pl.program_id(0)
    HW, Cin = x_ref.shape[1], x_ref.shape[2]
    Cenc = w_conv_ref.shape[1]
    F = w_head_ref.shape[1]
    N = pt_ref.shape[1]

    # ---- stage image rows into a zero-haloed VMEM buffer (halo covers dy) ---
    zero_halo = jnp.zeros((pad, Cin), jnp.float32)
    xext_ref[pl.ds(0, pad), :] = zero_halo
    xext_ref[pl.ds(pad + HW, pad), :] = zero_halo
    xext_ref[pl.ds(pad, HW), :] = x_ref[0]                    # (HW, Cin)

    # ---- column-validity masks for the dx = -1 / +1 taps (in-kernel iota) ---
    col = jax.lax.broadcasted_iota(jnp.int32, (HW, 1), 0) % img_w
    m_left = (col > 0).astype(jnp.float32)                    # source col-1 >= 0
    m_right = (col < img_w - 1).astype(jnp.float32)           # source col+1 <  W

    # ---- encoder 3x3 conv as ONE im2col matmul + ReLU -----------------------
    k = 0
    for dy in (-1, 0, 1):
        for dx in (-1, 0, 1):
            d = dy * img_w + dx                               # static flat shift
            piece = xext_ref[pl.ds(pad + d, HW), :]           # (HW, Cin)
            if dx == -1:
                piece = piece * m_left
            elif dx == 1:
                piece = piece * m_right
            im2col_ref[:, pl.ds(k * Cin, Cin)] = piece
            k += 1
    acc = jnp.dot(im2col_ref[...].astype(jnp.bfloat16), w_conv_ref[...],
                  preferred_element_type=jnp.float32)         # (HW, Cenc) f32
    features = jnp.maximum(acc + b_enc_ref[...], 0.0)

    # ---- NetHead: 1x1 conv + ReLU, kept resident for the gather -------------
    dfeat = jnp.dot(features.astype(jnp.bfloat16), w_head_ref[...],
                    preferred_element_type=jnp.float32) + b_head_ref[...]
    feat_ref[...] = jnp.maximum(dfeat, 0.0)                   # (HW, F) f32

    # ---- nearest-neighbour gather via scalar-prefetched SMEM indices --------
    # (wrapper clips indices to [0, HW); bounded-code-size fori_loop, not unroll)
    def gather_body(n, carry):
        src = idx_ref[b, n]
        nf_ref[pl.ds(n, 1), :] = feat_ref[pl.ds(src, 1), :]
        return carry
    jax.lax.fori_loop(0, N, gather_body, 0)

    # ---- DeformGNN (split matmuls, no scratch concats) -----------------------
    pt = pt_ref[0]                                            # (N, 2) f32
    h = jnp.dot(nf_ref[...].astype(jnp.bfloat16), w_in_f_ref[...],
                preferred_element_type=jnp.float32)
    h = h + jnp.dot(pt.astype(jnp.bfloat16), w_in_p_ref[...],
                    preferred_element_type=jnp.float32)
    h = jnp.maximum(h + b_in_ref[...], 0.0)                   # (N, S)

    adj = adj_ref[...]                                        # (N, N) bf16
    for l in range(layers):
        hb = h.astype(jnp.bfloat16)
        msg = jnp.dot(adj, hb, preferred_element_type=jnp.float32)   # A_norm @ h
        h = (jnp.dot(hb, w_self_ref[l], preferred_element_type=jnp.float32)
             + jnp.dot(msg.astype(jnp.bfloat16), w_nbr_ref[l],
                       preferred_element_type=jnp.float32)
             + b_l_ref[l])
        h = jnp.maximum(h, 0.0)

    offs = jnp.dot(h.astype(jnp.bfloat16), w_out_ref[...],
                   preferred_element_type=jnp.float32) + b_out_ref[...]
    pred_ref[0] = (pt + offs * mask_ref[0]).astype(pred_ref.dtype)


def _deform_grid_pallas(flat_idx, x_flat, base_point, base_point_mask, adj2d,
                        w_conv, b_enc, w_head, b_head,
                        w_in_f, w_in_p, b_in, w_self, w_nbr, b_l,
                        w_out, b_out, *, img_w):
    B, HW, Cin = x_flat.shape
    N = base_point.shape[1]
    Cenc = w_conv.shape[-1]
    F = w_head.shape[-1]
    S = w_in_f.shape[-1]
    layers = w_self.shape[0]

    pad = _round_up(img_w + 1, 8)          # halo >= max |flat shift| = W+1, 8-aligned
    assert pad >= img_w + 1

    kernel = functools.partial(_fused_kernel, img_w=img_w, pad=pad, layers=layers)

    grid_spec = pltpu.PrefetchScalarGridSpec(
        num_scalar_prefetch=1,
        grid=(B,),
        in_specs=[
            pl.BlockSpec((1, HW, Cin), lambda b, idx: (b, 0, 0)),
            pl.BlockSpec((1, N, 2), lambda b, idx: (b, 0, 0)),
            pl.BlockSpec((1, N, 1), lambda b, idx: (b, 0, 0)),
            pl.BlockSpec((N, N), lambda b, idx: (0, 0)),            # shared adjacency
            pl.BlockSpec((9 * Cin, Cenc), lambda b, idx: (0, 0)),
            pl.BlockSpec((1, Cenc), lambda b, idx: (0, 0)),
            pl.BlockSpec((Cenc, F), lambda b, idx: (0, 0)),
            pl.BlockSpec((1, F), lambda b, idx: (0, 0)),
            pl.BlockSpec((F, S), lambda b, idx: (0, 0)),
            pl.BlockSpec((2, S), lambda b, idx: (0, 0)),
            pl.BlockSpec((1, S), lambda b, idx: (0, 0)),
            pl.BlockSpec((layers, S, S), lambda b, idx: (0, 0, 0)),
            pl.BlockSpec((layers, S, S), lambda b, idx: (0, 0, 0)),
            pl.BlockSpec((layers, 1, S), lambda b, idx: (0, 0, 0)),
            pl.BlockSpec((S, 2), lambda b, idx: (0, 0)),
            pl.BlockSpec((1, 2), lambda b, idx: (0, 0)),
        ],
        out_specs=pl.BlockSpec((1, N, 2), lambda b, idx: (b, 0, 0)),
        scratch_shapes=[
            pltpu.VMEM((HW + 2 * pad, Cin), jnp.float32),   # zero-haloed image rows
            pltpu.VMEM((HW, 9 * Cin), jnp.float32),         # im2col slab
            pltpu.VMEM((HW, F), jnp.float32),               # deformer_feature
            pltpu.VMEM((N, F), jnp.float32),                # gathered node features
        ],
    )
    return pl.pallas_call(
        kernel,
        out_shape=jax.ShapeDtypeStruct((B, N, 2), jnp.float32),
        grid_spec=grid_spec,
        compiler_params=pltpu.CompilerParams(
            dimension_semantics=("parallel",),   # batch across v7x's 2 TensorCores
            vmem_limit_bytes=_vmem_limit_bytes(HW, Cin, N, F, Cenc, S, layers, pad),
        ),
    )(flat_idx, x_flat, base_point, base_point_mask, adj2d,
      w_conv, b_enc, w_head, b_head, w_in_f, w_in_p, b_in,
      w_self, w_nbr, b_l, w_out, b_out)


# ----------------------------------------------------------------------------
# Full forward (thin JAX wrapper: layout/packing only, compute in the kernel).
# ----------------------------------------------------------------------------
@jax.jit
def deformable_grid_forward(net_input, base_point, base_normalized_point_adjacent,
                            base_point_mask, params):
    B, Cin, H, W = net_input.shape
    zeros = jnp.zeros((B,), jnp.float32)
    laplacian_loss = zeros
    variance = zeros
    area_variance = zeros
    reconstruct_loss = zeros

    # NCHW -> (B, H*W, Cin); all heavy compute happens inside the fused kernel.
    x_flat = (jnp.transpose(net_input, (0, 2, 3, 1))
              .reshape(B, H * W, Cin).astype(jnp.float32))

    # nearest-neighbour sample indices for the grid points (scalar-prefetched),
    # clipped to [0, HW) so the in-kernel gather never reads out of bounds.
    bp = base_point.astype(jnp.float32)
    ix = jnp.clip(jnp.round(bp[..., 0] * (W - 1)), 0, W - 1).astype(jnp.int32)
    iy = jnp.clip(jnp.round(bp[..., 1] * (H - 1)), 0, H - 1).astype(jnp.int32)
    flat_idx = iy * W + ix                                    # (B, N) int32

    # prepack weights: bf16 MXU operands; conv weight flattened for im2col.
    w_conv = params["w_enc"].reshape(9 * Cin, -1).astype(jnp.bfloat16)   # (9*Cin, C)
    w_head = params["w_head"].astype(jnp.bfloat16)
    w_in_f = params["w_in_f"].astype(jnp.bfloat16)
    w_in_p = params["w_in_p"].astype(jnp.bfloat16)
    w_self = params["w_self"].astype(jnp.bfloat16)
    w_nbr = params["w_nbr"].astype(jnp.bfloat16)
    w_out = params["w_out"].astype(jnp.bfloat16)

    # TODO(synk): the base-grid adjacency is shared across the batch; pass it
    # unbatched with a constant index_map so it is DMA'd once (not per step).
    adj2d = base_normalized_point_adjacent[0].astype(jnp.bfloat16)       # (N, N)

    pred_points = _deform_grid_pallas(
        flat_idx, x_flat, bp, base_point_mask.astype(jnp.float32), adj2d,
        w_conv, params["b_enc"], w_head, params["b_head"],
        w_in_f, w_in_p, params["b_in"], w_self, w_nbr, params["b_l"],
        w_out, params["b_out"], img_w=W)

    condition = None
    return (condition, laplacian_loss, variance, area_variance,
            reconstruct_loss, pred_points)


# ----------------------------------------------------------------------------
# Pure-JAX f32 reference (for validation of the fused kernel).
# ----------------------------------------------------------------------------
def _reference_forward(net_input, base_point, adj, mask, params):
    B, Cin, H, W = net_input.shape
    x = jnp.transpose(net_input, (0, 2, 3, 1)).astype(jnp.float32)
    feat = jax.lax.conv_general_dilated(
        x, params["w_enc"], window_strides=(1, 1), padding="SAME",
        dimension_numbers=("NHWC", "HWIO", "NHWC"))
    feat = jax.nn.relu(feat + params["b_enc"])
    dfeat = jax.nn.relu(jnp.einsum("bhwc,cf->bhwf", feat, params["w_head"])
                        + params["b_head"])
    dfeat = dfeat.reshape(B, H * W, -1)
    ix = jnp.clip(jnp.round(base_point[..., 0] * (W - 1)), 0, W - 1).astype(jnp.int32)
    iy = jnp.clip(jnp.round(base_point[..., 1] * (H - 1)), 0, H - 1).astype(jnp.int32)
    flat_idx = iy * W + ix
    node = jnp.take_along_axis(dfeat, flat_idx[..., None], axis=1)       # (B, N, F)
    h = jax.nn.relu(node @ params["w_in_f"] + base_point @ params["w_in_p"]
                    + params["b_in"])
    for l in range(params["w_self"].shape[0]):
        msg = adj @ h
        h = jax.nn.relu(h @ params["w_self"][l] + msg @ params["w_nbr"][l]
                        + params["b_l"][l])
    offs = h @ params["w_out"] + params["b_out"]
    return base_point + offs * mask


# ----------------------------------------------------------------------------
# Deterministic setup helpers.
# ----------------------------------------------------------------------------
def init_params(key, cin=3, c=32, f=32, s=32, layers=2):
    ks = jax.random.split(key, 12)
    scale = 0.1
    return {
        "w_enc": scale * jax.random.normal(ks[0], (3, 3, cin, c), jnp.float32),
        "b_enc": scale * jax.random.normal(ks[1], (1, c), jnp.float32),
        "w_head": scale * jax.random.normal(ks[2], (c, f), jnp.float32),
        "b_head": scale * jax.random.normal(ks[3], (1, f), jnp.float32),
        "w_in_f": scale * jax.random.normal(ks[4], (f, s), jnp.float32),
        "w_in_p": scale * jax.random.normal(ks[5], (2, s), jnp.float32),
        "b_in": scale * jax.random.normal(ks[6], (1, s), jnp.float32),
        "w_self": scale * jax.random.normal(ks[7], (layers, s, s), jnp.float32),
        "w_nbr": scale * jax.random.normal(ks[8], (layers, s, s), jnp.float32),
        "b_l": scale * jax.random.normal(ks[9], (layers, 1, s), jnp.float32),
        "w_out": scale * jax.random.normal(ks[10], (s, 2), jnp.float32),
        "b_out": scale * jax.random.normal(ks[11], (1, 2), jnp.float32),
    }


def build_grid_graph(gh, gw):
    ys, xs = np.meshgrid(np.arange(gh, dtype=np.float32),
                         np.arange(gw, dtype=np.float32), indexing="ij")
    pts = np.stack([xs.reshape(-1) / (gw - 1), ys.reshape(-1) / (gh - 1)], axis=-1)
    n = gh * gw
    idx = np.arange(n).reshape(gh, gw)
    a = np.zeros((n, n), np.float32)
    for i in range(gh):
        for j in range(gw):
            if j + 1 < gw:
                a[idx[i, j], idx[i, j + 1]] = 1.0
                a[idx[i, j + 1], idx[i, j]] = 1.0
            if i + 1 < gh:
                a[idx[i, j], idx[i + 1, j]] = 1.0
                a[idx[i + 1, j], idx[i, j]] = 1.0
    a = a / np.maximum(a.sum(-1, keepdims=True), 1.0)   # row-normalized adjacency
    return jnp.asarray(pts), jnp.asarray(a)


if __name__ == "__main__":
    B, Cin, H, W = 2, 3, 16, 16
    GH, GW = 4, 4
    N = GH * GW

    key = jax.random.PRNGKey(0)
    net_input = jax.random.normal(key, (B, Cin, H, W), jnp.float32)   # NCHW, like PyTorch

    pts, adj = build_grid_graph(GH, GW)
    base_point = jnp.broadcast_to(pts[None], (B, N, 2)).astype(jnp.float32)
    base_normalized_point_adjacent = jnp.broadcast_to(adj[None], (B, N, N)).astype(jnp.float32)
    base_point_mask = jnp.ones((B, N, 1), jnp.float32)

    params = init_params(jax.random.PRNGKey(42), cin=Cin, c=32, f=32, s=32, layers=2)

    out = deformable_grid_forward(net_input, base_point,
                                  base_normalized_point_adjacent,
                                  base_point_mask, params)
    (condition, laplacian_loss, variance, area_variance,
     reconstruct_loss, pred_points) = out
    jax.block_until_ready(pred_points)

    # validate against a pure-JAX f32 reference (bf16 MXU operands -> loose tol)
    ref = _reference_forward(net_input, base_point,
                             base_normalized_point_adjacent, base_point_mask, params)
    err = float(jnp.max(jnp.abs(pred_points - ref)))

    assert condition is None
    assert laplacian_loss.shape == (B,) and variance.shape == (B,)
    assert area_variance.shape == (B,) and reconstruct_loss.shape == (B,)
    assert pred_points.shape == (B, N, 2)
    assert bool(jnp.all(jnp.isfinite(pred_points)))
    assert err < 5e-2, f"kernel deviates from f32 reference: max|diff|={err}"
    print("KERNEL_OK")
</pallas_src>

<mosaic_0001>
module attributes {stable_mosaic.version = 11 : i64} {
  func.func @_fused_kernel(%arg0: i32, %arg1: memref<2x16xi32, #tpu.memory_space<smem>>, %arg2: memref<1x256x3xf32, #tpu.memory_space<vmem>>, %arg3: memref<1x16x2xf32, #tpu.memory_space<vmem>>, %arg4: memref<1x16x1xf32, #tpu.memory_space<vmem>>, %arg5: memref<16x16xbf16, #tpu.memory_space<vmem>>, %arg6: memref<27x32xbf16, #tpu.memory_space<vmem>>, %arg7: memref<1x32xf32, #tpu.memory_space<vmem>>, %arg8: memref<32x32xbf16, #tpu.memory_space<vmem>>, %arg9: memref<1x32xf32, #tpu.memory_space<vmem>>, %arg10: memref<32x32xbf16, #tpu.memory_space<vmem>>, %arg11: memref<2x32xbf16, #tpu.memory_space<vmem>>, %arg12: memref<1x32xf32, #tpu.memory_space<vmem>>, %arg13: memref<2x32x32xbf16, #tpu.memory_space<vmem>>, %arg14: memref<2x32x32xbf16, #tpu.memory_space<vmem>>, %arg15: memref<2x1x32xf32, #tpu.memory_space<vmem>>, %arg16: memref<32x2xbf16, #tpu.memory_space<vmem>>, %arg17: memref<1x2xf32, #tpu.memory_space<vmem>>, %arg18: memref<1x16x2xf32, #tpu.memory_space<vmem>>, %arg19: memref<304x3xf32, #tpu.memory_space<vmem>>, %arg20: memref<256x27xf32, #tpu.memory_space<vmem>>, %arg21: memref<256x32xf32, #tpu.memory_space<vmem>>, %arg22: memref<16x32xf32, #tpu.memory_space<vmem>>) attributes {dimension_semantics = [#tpu.dimension_semantics<parallel>], iteration_bounds = array<i64: 2>, scalar_prefetch = 1 : i64, scratch_operands = 4 : i64, tpu.core_type = #tpu.core_type<tc>, window_params = [{transform_indices = @transform_0, window_bounds = array<i64: 1, 256, 3>}, {transform_indices = @transform_1, window_bounds = array<i64: 1, 16, 2>}, {transform_indices = @transform_2, window_bounds = array<i64: 1, 16, 1>}, {pipeline_mode = #tpu.pipeline_mode<synchronous>, transform_indices = @transform_3, window_bounds = array<i64: 16, 16>}, {pipeline_mode = #tpu.pipeline_mode<synchronous>, transform_indices = @transform_4, window_bounds = array<i64: 27, 32>}, {pipeline_mode = #tpu.pipeline_mode<synchronous>, transform_indices = @transform_5, window_bounds = array<i64: 1, 32>}, {pipeline_mode = #tpu.pipeline_mode<synchronous>, transform_indices = @transform_6, window_bounds = array<i64: 32, 32>}, {pipeline_mode = #tpu.pipeline_mode<synchronous>, transform_indices = @transform_7, window_bounds = array<i64: 1, 32>}, {pipeline_mode = #tpu.pipeline_mode<synchronous>, transform_indices = @transform_8, window_bounds = array<i64: 32, 32>}, {pipeline_mode = #tpu.pipeline_mode<synchronous>, transform_indices = @transform_9, window_bounds = array<i64: 2, 32>}, {pipeline_mode = #tpu.pipeline_mode<synchronous>, transform_indices = @transform_10, window_bounds = array<i64: 1, 32>}, {pipeline_mode = #tpu.pipeline_mode<synchronous>, transform_indices = @transform_11, window_bounds = array<i64: 2, 32, 32>}, {pipeline_mode = #tpu.pipeline_mode<synchronous>, transform_indices = @transform_12, window_bounds = array<i64: 2, 32, 32>}, {pipeline_mode = #tpu.pipeline_mode<synchronous>, transform_indices = @transform_13, window_bounds = array<i64: 2, 1, 32>}, {pipeline_mode = #tpu.pipeline_mode<synchronous>, transform_indices = @transform_14, window_bounds = array<i64: 32, 2>}, {pipeline_mode = #tpu.pipeline_mode<synchronous>, transform_indices = @transform_15, window_bounds = array<i64: 1, 2>}, {transform_indices = @transform_16, window_bounds = array<i64: 1, 16, 2>}]} {
    %cst = arith.constant 0.000000e+00 : f32
    %0 = vector.broadcast %cst : f32 to vector<24x3xf32>
    %c0 = arith.constant 0 : index
    %c0_0 = arith.constant 0 : index
    %1 = vector.load %arg19[%c0, %c0_0] : memref<304x3xf32, #tpu.memory_space<vmem>>, vector<24x3xf32>
    tpu.vector_store %arg19[%c0, %c0_0], %0 {strides = array<i32>} : memref<304x3xf32, #tpu.memory_space<vmem>>, vector<24x3xf32>,
    %c280 = arith.constant 280 : index
    %c0_1 = arith.constant 0 : index
    %2 = vector.load %arg19[%c280, %c0_1] : memref<304x3xf32, #tpu.memory_space<vmem>>, vector<24x3xf32>
    tpu.vector_store %arg19[%c280, %c0_1], %0 {strides = array<i32>} : memref<304x3xf32, #tpu.memory_space<vmem>>, vector<24x3xf32>,
    %c0_2 = arith.constant 0 : index
    %c0_3 = arith.constant 0 : index
    %c0_4 = arith.constant 0 : index
    %3 = vector.load %arg2[%c0_2, %c0_3, %c0_4] : memref<1x256x3xf32, #tpu.memory_space<vmem>>, vector<1x256x3xf32>
    %4 = vector.shape_cast %3 : vector<1x256x3xf32> to vector<256x3xf32>
    %c24 = arith.constant 24 : index
    %c0_5 = arith.constant 0 : index
    %5 = vector.load %arg19[%c24, %c0_5] : memref<304x3xf32, #tpu.memory_space<vmem>>, vector<256x3xf32>
    tpu.vector_store %arg19[%c24, %c0_5], %4 {strides = array<i32>} : memref<304x3xf32, #tpu.memory_space<vmem>>, vector<256x3xf32>,
    %6 = tpu.iota {dimensions = array<i32: 0>} : vector<256x1xi32>
    %c16_i32 = arith.constant 16 : i32
    %c0_i32 = arith.constant 0 : i32
    %7 = arith.cmpi eq, %c16_i32, %c0_i32 : i32
    %c1_i32 = arith.constant 1 : i32
    %8 = arith.select %7, %c1_i32, %c16_i32 : i32
    %9 = vector.broadcast %8 : i32 to vector<256x1xi32>
    %10 = arith.remsi %6, %9 : vector<256x1xi32>
    %c0_i32_6 = arith.constant 0 : i32
    %11 = vector.broadcast %c0_i32_6 : i32 to vector<256x1xi32>
    %12 = arith.cmpi ne, %10, %11 : vector<256x1xi32>
    %c0_i32_7 = arith.constant 0 : i32
    %13 = vector.broadcast %c0_i32_7 : i32 to vector<256x1xi32>
    %14 = arith.cmpi slt, %10, %13 : vector<256x1xi32>
    %c0_i32_8 = arith.constant 0 : i32
    %15 = arith.cmpi slt, %8, %c0_i32_8 : i32
    %16 = vector.broadcast %15 : i1 to vector<256x1xi1>
    %17 = vector.broadcast %16 : vector<256x1xi1> to vector<256x1xi1>
    %18 = arith.xori %14, %17 : vector<256x1xi1>
    %19 = arith.andi %18, %12 : vector<256x1xi1>
    %20 = vector.broadcast %8 : i32 to vector<256x1xi32>
    %21 = arith.addi %10, %20 : vector<256x1xi32>
    %22 = arith.select %19, %21, %10 : vector<256x1xi1>, vector<256x1xi32>
    %c0_i32_9 = arith.constant 0 : i32
    %23 = vector.broadcast %c0_i32_9 : i32 to vector<256x1xi32>
    %24 = arith.cmpi sgt, %22, %23 : vector<256x1xi32>
    %25 = arith.extui %24 : vector<256x1xi1> to vector<256x1xi32>
    %26 = arith.sitofp %25 : vector<256x1xi32> to vector<256x1xf32>
    %c15_i32 = arith.constant 15 : i32
    %27 = vector.broadcast %c15_i32 : i32 to vector<256x1xi32>
    %28 = arith.cmpi slt, %22, %27 : vector<256x1xi32>
    %29 = arith.extui %28 : vector<256x1xi1> to vector<256x1xi32>
    %30 = arith.sitofp %29 : vector<256x1xi32> to vector<256x1xf32>
    %c7 = arith.constant 7 : index
    %c0_10 = arith.constant 0 : index
    %31 = vector.load %arg19[%c7, %c0_10] : memref<304x3xf32, #tpu.memory_space<vmem>>, vector<256x3xf32>
    %32 = vector.broadcast %26 : vector<256x1xf32> to vector<256x3xf32>
    %33 = arith.mulf %31, %32 : vector<256x3xf32>
    %c0_11 = arith.constant 0 : index
    %c0_12 = arith.constant 0 : index
    %34 = vector.load %arg20[%c0_11, %c0_12] : memref<256x27xf32, #tpu.memory_space<vmem>>, vector<256x3xf32>
    tpu.vector_store %arg20[%c0_11, %c0_12], %33 {strides = array<i32>} : memref<256x27xf32, #tpu.memory_space<vmem>>, vector<256x3xf32>,
    %c8 = arith.constant 8 : index
    %c0_13 = arith.constant 0 : index
    %35 = vector.load %arg19[%c8, %c0_13] : memref<304x3xf32, #tpu.memory_space<vmem>>, vector<256x3xf32>
    %c0_14 = arith.constant 0 : index
    %c3 = arith.constant 3 : index
    %36 = vector.load %arg20[%c0_14, %c3] : memref<256x27xf32, #tpu.memory_space<vmem>>, vector<256x3xf32>
    tpu.vector_store %arg20[%c0_14, %c3], %35 {strides = array<i32>} : memref<256x27xf32, #tpu.memory_space<vmem>>, vector<256x3xf32>,
    %c9 = arith.constant 9 : index
    %c0_15 = arith.constant 0 : index
    %37 = vector.load %arg19[%c9, %c0_15] : memref<304x3xf32, #tpu.memory_space<vmem>>, vector<256x3xf32>
    %38 = vector.broadcast %30 : vector<256x1xf32> to vector<256x3xf32>
    %39 = arith.mulf %37, %38 : vector<256x3xf32>
    %c0_16 = arith.constant 0 : index
    %c6 = arith.constant 6 : index
    %40 = vector.load %arg20[%c0_16, %c6] : memref<256x27xf32, #tpu.memory_space<vmem>>, vector<256x3xf32>
    tpu.vector_store %arg20[%c0_16, %c6], %39 {strides = array<i32>} : memref<256x27xf32, #tpu.memory_space<vmem>>, vector<256x3xf32>,
    %c23 = arith.constant 23 : index
    %c0_17 = arith.constant 0 : index
    %41 = vector.load %arg19[%c23, %c0_17] : memref<304x3xf32, #tpu.memory_space<vmem>>, vector<256x3xf32>
    %42 = vector.broadcast %26 : vector<256x1xf32> to vector<256x3xf32>
    %43 = arith.mulf %41, %42 : vector<256x3xf32>
    %c0_18 = arith.constant 0 : index
    %c9_19 = arith.constant 9 : index
    %44 = vector.load %arg20[%c0_18, %c9_19] : memref<256x27xf32, #tpu.memory_space<vmem>>, vector<256x3xf32>
    tpu.vector_store %arg20[%c0_18, %c9_19], %43 {strides = array<i32>} : memref<256x27xf32, #tpu.memory_space<vmem>>, vector<256x3xf32>,
    %c24_20 = arith.constant 24 : index
    %c0_21 = arith.constant 0 : index
    %45 = vector.load %arg19[%c24_20, %c0_21] : memref<304x3xf32, #tpu.memory_space<vmem>>, vector<256x3xf32>
    %c0_22 = arith.constant 0 : index
    %c12 = arith.constant 12 : index
    %46 = vector.load %arg20[%c0_22, %c12] : memref<256x27xf32, #tpu.memory_space<vmem>>, vector<256x3xf32>
    tpu.vector_store %arg20[%c0_22, %c12], %45 {strides = array<i32>} : memref<256x27xf32, #tpu.memory_space<vmem>>, vector<256x3xf32>,
    %c25 = arith.constant 25 : index
    %c0_23 = arith.constant 0 : index
    %47 = vector.load %arg19[%c25, %c0_23] : memref<304x3xf32, #tpu.memory_space<vmem>>, vector<256x3xf32>
    %48 = vector.broadcast %30 : vector<256x1xf32> to vector<256x3xf32>
    %49 = arith.mulf %47, %48 : vector<256x3xf32>
    %c0_24 = arith.constant 0 : index
    %c15 = arith.constant 15 : index
    %50 = vector.load %arg20[%c0_24, %c15] : memref<256x27xf32, #tpu.memory_space<vmem>>, vector<256x3xf32>
    tpu.vector_store %arg20[%c0_24, %c15], %49 {strides = array<i32>} : memref<256x27xf32, #tpu.memory_space<vmem>>, vector<256x3xf32>,
    %c39 = arith.constant 39 : index
    %c0_25 = arith.constant 0 : index
    %51 = vector.load %arg19[%c39, %c0_25] : memref<304x3xf32, #tpu.memory_space<vmem>>, vector<256x3xf32>
    %52 = vector.broadcast %26 : vector<256x1xf32> to vector<256x3xf32>
    %53 = arith.mulf %51, %52 : vector<256x3xf32>
    %c0_26 = arith.constant 0 : index
    %c18 = arith.constant 18 : index
    %54 = vector.load %arg20[%c0_26, %c18] : memref<256x27xf32, #tpu.memory_space<vmem>>, vector<256x3xf32>
    tpu.vector_store %arg20[%c0_26, %c18], %53 {strides = array<i32>} : memref<256x27xf32, #tpu.memory_space<vmem>>, vector<256x3xf32>,
    %c40 = arith.constant 40 : index
    %c0_27 = arith.constant 0 : index
    %55 = vector.load %arg19[%c40, %c0_27] : memref<304x3xf32, #tpu.memory_space<vmem>>, vector<256x3xf32>
    %c0_28 = arith.constant 0 : index
    %c21 = arith.constant 21 : index
    %56 = vector.load %arg20[%c0_28, %c21] : memref<256x27xf32, #tpu.memory_space<vmem>>, vector<256x3xf32>
    tpu.vector_store %arg20[%c0_28, %c21], %55 {strides = array<i32>} : memref<256x27xf32, #tpu.memory_space<vmem>>, vector<256x3xf32>,
    %c41 = arith.constant 41 : index
    %c0_29 = arith.constant 0 : index
    %57 = vector.load %arg19[%c41, %c0_29] : memref<304x3xf32, #tpu.memory_space<vmem>>, vector<256x3xf32>
    %58 = vector.broadcast %30 : vector<256x1xf32> to vector<256x3xf32>
    %59 = arith.mulf %57, %58 : vector<256x3xf32>
    %c0_30 = arith.constant 0 : index
    %c24_31 = arith.constant 24 : index
    %60 = vector.load %arg20[%c0_30, %c24_31] : memref<256x27xf32, #tpu.memory_space<vmem>>, vector<256x3xf32>
    tpu.vector_store %arg20[%c0_30, %c24_31], %59 {strides = array<i32>} : memref<256x27xf32, #tpu.memory_space<vmem>>, vector<256x3xf32>,
    %c0_32 = arith.constant 0 : index
    %c0_33 = arith.constant 0 : index
    %61 = vector.load %arg20[%c0_32, %c0_33] : memref<256x27xf32, #tpu.memory_space<vmem>>, vector<256x27xf32>
    %62 = arith.truncf %61 : vector<256x27xf32> to vector<256x27xbf16>
    %c0_34 = arith.constant 0 : index
    %c0_35 = arith.constant 0 : index
    %63 = vector.load %arg6[%c0_34, %c0_35] : memref<27x32xbf16, #tpu.memory_space<vmem>>, vector<27x32xbf16>
    %cst_36 = arith.constant dense<0.000000e+00> : vector<256x32xf32>
    %64 = tpu.matmul %62, %63, %cst_36 {dimension_numbers = #tpu.dot_dimension_numbers<[1], [0], [0], [1], [0, 0, 1, 1], [], []>} : vector<256x27xbf16>, vector<27x32xbf16>, vector<256x32xf32> -> vector<256x32xf32>
    %c0_37 = arith.constant 0 : index
    %c0_38 = arith.constant 0 : index
    %65 = vector.load %arg7[%c0_37, %c0_38] : memref<1x32xf32, #tpu.memory_space<vmem>>, vector<1x32xf32>
    %66 = vector.broadcast %65 : vector<1x32xf32> to vector<256x32xf32>
    %67 = arith.addf %64, %66 : vector<256x32xf32>
    %cst_39 = arith.constant 0.000000e+00 : f32
    %68 = vector.broadcast %cst_39 : f32 to vector<256x32xf32>
    %69 = arith.maximumf %67, %68 : vector<256x32xf32>
    %70 = arith.truncf %69 : vector<256x32xf32> to vector<256x32xbf16>
    %c0_40 = arith.constant 0 : index
    %c0_41 = arith.constant 0 : index
    %71 = vector.load %arg8[%c0_40, %c0_41] : memref<32x32xbf16, #tpu.memory_space<vmem>>, vector<32x32xbf16>
    %cst_42 = arith.constant dense<0.000000e+00> : vector<256x32xf32>
    %72 = tpu.matmul %70, %71, %cst_42 {dimension_numbers = #tpu.dot_dimension_numbers<[1], [0], [0], [1], [0, 0, 1, 1], [], []>} : vector<256x32xbf16>, vector<32x32xbf16>, vector<256x32xf32> -> vector<256x32xf32>
    %c0_43 = arith.constant 0 : index
    %c0_44 = arith.constant 0 : index
    %73 = vector.load %arg9[%c0_43, %c0_44] : memref<1x32xf32, #tpu.memory_space<vmem>>, vector<1x32xf32>
    %74 = vector.broadcast %73 : vector<1x32xf32> to vector<256x32xf32>
    %75 = arith.addf %72, %74 : vector<256x32xf32>
    %cst_45 = arith.constant 0.000000e+00 : f32
    %76 = vector.broadcast %cst_45 : f32 to vector<256x32xf32>
    %77 = arith.maximumf %75, %76 : vector<256x32xf32>
    %c0_46 = arith.constant 0 : index
    %c0_47 = arith.constant 0 : index
    %78 = vector.load %arg21[%c0_46, %c0_47] : memref<256x32xf32, #tpu.memory_space<vmem>>, vector<256x32xf32>
    tpu.vector_store %arg21[%c0_46, %c0_47], %77 {strides = array<i32>} : memref<256x32xf32, #tpu.memory_space<vmem>>, vector<256x32xf32>,
    %c0_i32_48 = arith.constant 0 : i32
    %c16_i32_49 = arith.constant 16 : i32
    %79 = arith.addi %c0_i32_48, %c16_i32_49 : i32
    %c1_i32_50 = arith.constant 1 : i32
    scf.for %arg23 = %c0_i32_48 to %79 step %c1_i32_50  : i32 {
      %142 = arith.index_cast %arg0 : i32 to index
      %143 = arith.index_cast %arg23 : i32 to index
      %144 = memref.load %arg1[%142, %143] : memref<2x16xi32, #tpu.memory_space<smem>>
      %145 = arith.index_cast %144 : i32 to index
      %c0_104 = arith.constant 0 : index
      %146 = vector.load %arg21[%145, %c0_104] : memref<256x32xf32, #tpu.memory_space<vmem>>, vector<1x32xf32>
      %147 = arith.index_cast %arg23 : i32 to index
      %c0_105 = arith.constant 0 : index
      %148 = vector.load %arg22[%147, %c0_105] : memref<16x32xf32, #tpu.memory_space<vmem>>, vector<1x32xf32>
      tpu.vector_store %arg22[%147, %c0_105], %146 {strides = array<i32>} : memref<16x32xf32, #tpu.memory_space<vmem>>, vector<1x32xf32>,
    }
    %c16_i32_51 = arith.constant 16 : i32
    %c0_52 = arith.constant 0 : index
    %c0_53 = arith.constant 0 : index
    %c0_54 = arith.constant 0 : index
    %80 = vector.load %arg3[%c0_52, %c0_53, %c0_54] : memref<1x16x2xf32, #tpu.memory_space<vmem>>, vector<1x16x2xf32>
    %81 = vector.shape_cast %80 : vector<1x16x2xf32> to vector<16x2xf32>
    %c0_55 = arith.constant 0 : index
    %c0_56 = arith.constant 0 : index
    %82 = vector.load %arg22[%c0_55, %c0_56] : memref<16x32xf32, #tpu.memory_space<vmem>>, vector<16x32xf32>
    %83 = arith.truncf %82 : vector<16x32xf32> to vector<16x32xbf16>
    %c0_57 = arith.constant 0 : index
    %c0_58 = arith.constant 0 : index
    %84 = vector.load %arg10[%c0_57, %c0_58] : memref<32x32xbf16, #tpu.memory_space<vmem>>, vector<32x32xbf16>
    %cst_59 = arith.constant dense<0.000000e+00> : vector<16x32xf32>
    %85 = tpu.matmul %83, %84, %cst_59 {dimension_numbers = #tpu.dot_dimension_numbers<[1], [0], [0], [1], [0, 0, 1, 1], [], []>} : vector<16x32xbf16>, vector<32x32xbf16>, vector<16x32xf32> -> vector<16x32xf32>
    %86 = arith.truncf %81 : vector<16x2xf32> to vector<16x2xbf16>
    %c0_60 = arith.constant 0 : index
    %c0_61 = arith.constant 0 : index
    %87 = vector.load %arg11[%c0_60, %c0_61] : memref<2x32xbf16, #tpu.memory_space<vmem>>, vector<2x32xbf16>
    %cst_62 = arith.constant dense<0.000000e+00> : vector<16x32xf32>
    %88 = tpu.matmul %86, %87, %cst_62 {dimension_numbers = #tpu.dot_dimension_numbers<[1], [0], [0], [1], [0, 0, 1, 1], [], []>} : vector<16x2xbf16>, vector<2x32xbf16>, vector<16x32xf32> -> vector<16x32xf32>
    %89 = arith.addf %85, %88 : vector<16x32xf32>
    %c0_63 = arith.constant 0 : index
    %c0_64 = arith.constant 0 : index
    %90 = vector.load %arg12[%c0_63, %c0_64] : memref<1x32xf32, #tpu.memory_space<vmem>>, vector<1x32xf32>
    %91 = vector.broadcast %90 : vector<1x32xf32> to vector<16x32xf32>
    %92 = arith.addf %89, %91 : vector<16x32xf32>
    %cst_65 = arith.constant 0.000000e+00 : f32
    %93 = vector.broadcast %cst_65 : f32 to vector<16x32xf32>
    %94 = arith.maximumf %92, %93 : vector<16x32xf32>
    %c0_66 = arith.constant 0 : index
    %c0_67 = arith.constant 0 : index
    %95 = vector.load %arg5[%c0_66, %c0_67] : memref<16x16xbf16, #tpu.memory_space<vmem>>, vector<16x16xbf16>
    %96 = arith.truncf %94 : vector<16x32xf32> to vector<16x32xbf16>
    %cst_68 = arith.constant dense<0.000000e+00> : vector<16x32xf32>
    %97 = tpu.matmul %95, %96, %cst_68 {dimension_numbers = #tpu.dot_dimension_numbers<[1], [0], [0], [1], [0, 0, 1, 1], [], []>} : vector<16x16xbf16>, vector<16x32xbf16>, vector<16x32xf32> -> vector<16x32xf32>
    %c0_69 = arith.constant 0 : index
    %c0_70 = arith.constant 0 : index
    %c0_71 = arith.constant 0 : index
    %98 = vector.load %arg13[%c0_69, %c0_70, %c0_71] : memref<2x32x32xbf16, #tpu.memory_space<vmem>>, vector<1x32x32xbf16>
    %99 = vector.shape_cast %98 : vector<1x32x32xbf16> to vector<32x32xbf16>
    %cst_72 = arith.constant dense<0.000000e+00> : vector<16x32xf32>
    %100 = tpu.matmul %96, %99, %cst_72 {dimension_numbers = #tpu.dot_dimension_numbers<[1], [0], [0], [1], [0, 0, 1, 1], [], []>} : vector<16x32xbf16>, vector<32x32xbf16>, vector<16x32xf32> -> vector<16x32xf32>
    %101 = arith.truncf %97 : vector<16x32xf32> to vector<16x32xbf16>
    %c0_73 = arith.constant 0 : index
    %c0_74 = arith.constant 0 : index
    %c0_75 = arith.constant 0 : index
    %102 = vector.load %arg14[%c0_73, %c0_74, %c0_75] : memref<2x32x32xbf16, #tpu.memory_space<vmem>>, vector<1x32x32xbf16>
    %103 = vector.shape_cast %102 : vector<1x32x32xbf16> to vector<32x32xbf16>
    %cst_76 = arith.constant dense<0.000000e+00> : vector<16x32xf32>
    %104 = tpu.matmul %101, %103, %cst_76 {dimension_numbers = #tpu.dot_dimension_numbers<[1], [0], [0], [1], [0, 0, 1, 1], [], []>} : vector<16x32xbf16>, vector<32x32xbf16>, vector<16x32xf32> -> vector<16x32xf32>
    %105 = arith.addf %100, %104 : vector<16x32xf32>
    %c0_77 = arith.constant 0 : index
    %c0_78 = arith.constant 0 : index
    %c0_79 = arith.constant 0 : index
    %106 = vector.load %arg15[%c0_77, %c0_78, %c0_79] : memref<2x1x32xf32, #tpu.memory_space<vmem>>, vector<1x1x32xf32>
    %107 = vector.shape_cast %106 : vector<1x1x32xf32> to vector<1x32xf32>
    %108 = vector.broadcast %107 : vector<1x32xf32> to vector<16x32xf32>
    %109 = arith.addf %105, %108 : vector<16x32xf32>
    %cst_80 = arith.constant 0.000000e+00 : f32
    %110 = vector.broadcast %cst_80 : f32 to vector<16x32xf32>
    %111 = arith.maximumf %109, %110 : vector<16x32xf32>
    %112 = arith.truncf %111 : vector<16x32xf32> to vector<16x32xbf16>
    %cst_81 = arith.constant dense<0.000000e+00> : vector<16x32xf32>
    %113 = tpu.matmul %95, %112, %cst_81 {dimension_numbers = #tpu.dot_dimension_numbers<[1], [0], [0], [1], [0, 0, 1, 1], [], []>} : vector<16x16xbf16>, vector<16x32xbf16>, vector<16x32xf32> -> vector<16x32xf32>
    %c1 = arith.constant 1 : index
    %c0_82 = arith.constant 0 : index
    %c0_83 = arith.constant 0 : index
    %114 = vector.load %arg13[%c1, %c0_82, %c0_83] : memref<2x32x32xbf16, #tpu.memory_space<vmem>>, vector<1x32x32xbf16>
    %115 = vector.shape_cast %114 : vector<1x32x32xbf16> to vector<32x32xbf16>
    %cst_84 = arith.constant dense<0.000000e+00> : vector<16x32xf32>
    %116 = tpu.matmul %112, %115, %cst_84 {dimension_numbers = #tpu.dot_dimension_numbers<[1], [0], [0], [1], [0, 0, 1, 1], [], []>} : vector<16x32xbf16>, vector<32x32xbf16>, vector<16x32xf32> -> vector<16x32xf32>
    %117 = arith.truncf %113 : vector<16x32xf32> to vector<16x32xbf16>
    %c1_85 = arith.constant 1 : index
    %c0_86 = arith.constant 0 : index
    %c0_87 = arith.constant 0 : index
    %118 = vector.load %arg14[%c1_85, %c0_86, %c0_87] : memref<2x32x32xbf16, #tpu.memory_space<vmem>>, vector<1x32x32xbf16>
    %119 = vector.shape_cast %118 : vector<1x32x32xbf16> to vector<32x32xbf16>
    %cst_88 = arith.constant dense<0.000000e+00> : vector<16x32xf32>
    %120 = tpu.matmul %117, %119, %cst_88 {dimension_numbers = #tpu.dot_dimension_numbers<[1], [0], [0], [1], [0, 0, 1, 1], [], []>} : vector<16x32xbf16>, vector<32x32xbf16>, vector<16x32xf32> -> vector<16x32xf32>
    %121 = arith.addf %116, %120 : vector<16x32xf32>
    %c1_89 = arith.constant 1 : index
    %c0_90 = arith.constant 0 : index
    %c0_91 = arith.constant 0 : index
    %122 = vector.load %arg15[%c1_89, %c0_90, %c0_91] : memref<2x1x32xf32, #tpu.memory_space<vmem>>, vector<1x1x32xf32>
    %123 = vector.shape_cast %122 : vector<1x1x32xf32> to vector<1x32xf32>
    %124 = vector.broadcast %123 : vector<1x32xf32> to vector<16x32xf32>
    %125 = arith.addf %121, %124 : vector<16x32xf32>
    %cst_92 = arith.constant 0.000000e+00 : f32
    %126 = vector.broadcast %cst_92 : f32 to vector<16x32xf32>
    %127 = arith.maximumf %125, %126 : vector<16x32xf32>
    %128 = arith.truncf %127 : vector<16x32xf32> to vector<16x32xbf16>
    %c0_93 = arith.constant 0 : index
    %c0_94 = arith.constant 0 : index
    %129 = vector.load %arg16[%c0_93, %c0_94] : memref<32x2xbf16, #tpu.memory_space<vmem>>, vector<32x2xbf16>
    %cst_95 = arith.constant dense<0.000000e+00> : vector<16x2xf32>
    %130 = tpu.matmul %128, %129, %cst_95 {dimension_numbers = #tpu.dot_dimension_numbers<[1], [0], [0], [1], [0, 0, 1, 1], [], []>} : vector<16x32xbf16>, vector<32x2xbf16>, vector<16x2xf32> -> vector<16x2xf32>
    %c0_96 = arith.constant 0 : index
    %c0_97 = arith.constant 0 : index
    %131 = vector.load %arg17[%c0_96, %c0_97] : memref<1x2xf32, #tpu.memory_space<vmem>>, vector<1x2xf32>
    %132 = vector.broadcast %131 : vector<1x2xf32> to vector<16x2xf32>
    %133 = arith.addf %130, %132 : vector<16x2xf32>
    %c0_98 = arith.constant 0 : index
    %c0_99 = arith.constant 0 : index
    %c0_100 = arith.constant 0 : index
    %134 = vector.load %arg4[%c0_98, %c0_99, %c0_100] : memref<1x16x1xf32, #tpu.memory_space<vmem>>, vector<1x16x1xf32>
    %135 = vector.shape_cast %134 : vector<1x16x1xf32> to vector<16x1xf32>
    %136 = vector.broadcast %135 : vector<16x1xf32> to vector<16x2xf32>
    %137 = arith.mulf %133, %136 : vector<16x2xf32>
    %138 = arith.addf %81, %137 : vector<16x2xf32>
    %c0_101 = arith.constant 0 : index
    %c0_102 = arith.constant 0 : index
    %c0_103 = arith.constant 0 : index
    %139 = vector.load %arg18[%c0_101, %c0_102, %c0_103] : memref<1x16x2xf32, #tpu.memory_space<vmem>>, vector<1x16x2xf32>
    %140 = vector.shape_cast %139 : vector<1x16x2xf32> to vector<16x2xf32>
    %141 = vector.shape_cast %138 : vector<16x2xf32> to vector<1x16x2xf32>
    tpu.vector_store %arg18[%c0_101, %c0_102, %c0_103], %141 {strides = array<i32>} : memref<1x16x2xf32, #tpu.memory_space<vmem>>, vector<1x16x2xf32>,
    return
  }
  func.func @transform_0(%arg0: i32, %arg1: memref<2x16xi32, #tpu.memory_space<smem>>) -> (i32, i32, i32) {
    %c0_i32 = arith.constant 0 : i32
    %c0_i32_0 = arith.constant 0 : i32
    %c0_i32_1 = arith.constant 0 : i32
    return %arg0, %c0_i32, %c0_i32_0 : i32, i32, i32
  }
  func.func @transform_1(%arg0: i32, %arg1: memref<2x16xi32, #tpu.memory_space<smem>>) -> (i32, i32, i32) {
    %c0_i32 = arith.constant 0 : i32
    %c0_i32_0 = arith.constant 0 : i32
    %c0_i32_1 = arith.constant 0 : i32
    return %arg0, %c0_i32, %c0_i32_0 : i32, i32, i32
  }
  func.func @transform_2(%arg0: i32, %arg1: memref<2x16xi32, #tpu.memory_space<smem>>) -> (i32, i32, i32) {
    %c0_i32 = arith.constant 0 : i32
    %c0_i32_0 = arith.constant 0 : i32
    %c0_i32_1 = arith.constant 0 : i32
    return %arg0, %c0_i32, %c0_i32_0 : i32, i32, i32
  }
  func.func @transform_3(%arg0: i32, %arg1: memref<2x16xi32, #tpu.memory_space<smem>>) -> (i32, i32) {
    %c0_i32 = arith.constant 0 : i32
    %c0_i32_0 = arith.constant 0 : i32
    %c0_i32_1 = arith.constant 0 : i32
    return %c0_i32, %c0_i32_0 : i32, i32
  }
  func.func @transform_4(%arg0: i32, %arg1: memref<2x16xi32, #tpu.memory_space<smem>>) -> (i32, i32) {
    %c0_i32 = arith.constant 0 : i32
    %c0_i32_0 = arith.constant 0 : i32
    %c0_i32_1 = arith.constant 0 : i32
    return %c0_i32, %c0_i32_0 : i32, i32
  }
  func.func @transform_5(%arg0: i32, %arg1: memref<2x16xi32, #tpu.memory_space<smem>>) -> (i32, i32) {
    %c0_i32 = arith.constant 0 : i32
    %c0_i32_0 = arith.constant 0 : i32
    %c0_i32_1 = arith.constant 0 : i32
    return %c0_i32, %c0_i32_0 : i32, i32
  }
  func.func @transform_6(%arg0: i32, %arg1: memref<2x16xi32, #tpu.memory_space<smem>>) -> (i32, i32) {
    %c0_i32 = arith.constant 0 : i32
    %c0_i32_0 = arith.constant 0 : i32
    %c0_i32_1 = arith.constant 0 : i32
    return %c0_i32, %c0_i32_0 : i32, i32
  }
  func.func @transform_7(%arg0: i32, %arg1: memref<2x16xi32, #tpu.memory_space<smem>>) -> (i32, i32) {
    %c0_i32 = arith.constant 0 : i32
    %c0_i32_0 = arith.constant 0 : i32
    %c0_i32_1 = arith.constant 0 : i32
    return %c0_i32, %c0_i32_0 : i32, i32
  }
  func.func @transform_8(%arg0: i32, %arg1: memref<2x16xi32, #tpu.memory_space<smem>>) -> (i32, i32) {
    %c0_i32 = arith.constant 0 : i32
    %c0_i32_0 = arith.constant 0 : i32
    %c0_i32_1 = arith.constant 0 : i32
    return %c0_i32, %c0_i32_0 : i32, i32
  }
  func.func @transform_9(%arg0: i32, %arg1: memref<2x16xi32, #tpu.memory_space<smem>>) -> (i32, i32) {
    %c0_i32 = arith.constant 0 : i32
    %c0_i32_0 = arith.constant 0 : i32
    %c0_i32_1 = arith.constant 0 : i32
    return %c0_i32, %c0_i32_0 : i32, i32
  }
  func.func @transform_10(%arg0: i32, %arg1: memref<2x16xi32, #tpu.memory_space<smem>>) -> (i32, i32) {
    %c0_i32 = arith.constant 0 : i32
    %c0_i32_0 = arith.constant 0 : i32
    %c0_i32_1 = arith.constant 0 : i32
    return %c0_i32, %c0_i32_0 : i32, i32
  }
  func.func @transform_11(%arg0: i32, %arg1: memref<2x16xi32, #tpu.memory_space<smem>>) -> (i32, i32, i32) {
    %c0_i32 = arith.constant 0 : i32
    %c0_i32_0 = arith.constant 0 : i32
    %c0_i32_1 = arith.constant 0 : i32
    %c0_i32_2 = arith.constant 0 : i32
    return %c0_i32, %c0_i32_0, %c0_i32_1 : i32, i32, i32
  }
  func.func @transform_12(%arg0: i32, %arg1: memref<2x16xi32, #tpu.memory_space<smem>>) -> (i32, i32, i32) {
    %c0_i32 = arith.constant 0 : i32
    %c0_i32_0 = arith.constant 0 : i32
    %c0_i32_1 = arith.constant 0 : i32
    %c0_i32_2 = arith.constant 0 : i32
    return %c0_i32, %c0_i32_0, %c0_i32_1 : i32, i32, i32
  }
  func.func @transform_13(%arg0: i32, %arg1: memref<2x16xi32, #tpu.memory_space<smem>>) -> (i32, i32, i32) {
    %c0_i32 = arith.constant 0 : i32
    %c0_i32_0 = arith.constant 0 : i32
    %c0_i32_1 = arith.constant 0 : i32
    %c0_i32_2 = arith.constant 0 : i32
    return %c0_i32, %c0_i32_0, %c0_i32_1 : i32, i32, i32
  }
  func.func @transform_14(%arg0: i32, %arg1: memref<2x16xi32, #tpu.memory_space<smem>>) -> (i32, i32) {
    %c0_i32 = arith.constant 0 : i32
    %c0_i32_0 = arith.constant 0 : i32
    %c0_i32_1 = arith.constant 0 : i32
    return %c0_i32, %c0_i32_0 : i32, i32
  }
  func.func @transform_15(%arg0: i32, %arg1: memref<2x16xi32, #tpu.memory_space<smem>>) -> (i32, i32) {
    %c0_i32 = arith.constant 0 : i32
    %c0_i32_0 = arith.constant 0 : i32
    %c0_i32_1 = arith.constant 0 : i32
    return %c0_i32, %c0_i32_0 : i32, i32
  }
  func.func @transform_16(%arg0: i32, %arg1: memref<2x16xi32, #tpu.memory_space<smem>>) -> (i32, i32, i32) {
    %c0_i32 = arith.constant 0 : i32
    %c0_i32_0 = arith.constant 0 : i32
    %c0_i32_1 = arith.constant 0 : i32
    return %arg0, %c0_i32, %c0_i32_0 : i32, i32, i32
  }
}

</mosaic_0001>

<bundles_post_ra>
// kernel: deformable_grid_forward.1
= control target key start
LH: loop header
LB: loop body
LE: loop exit
PB: predicated region body
PF: predicated region fallthrough
CT: control target
= control target key end

     0   :  { %s4216_s27 = smov [#allocation7]   ;;  %s5724_s0 = inlined_call_operand.vmem [shape: s32[2,16], index: 0, kind: input, shape index: {}]   ;;  %s5725_s1 = inlined_call_operand.vmem [shape: f32[2,256,3], index: 1, kind: input, shape index: {}]   ;;  %s5726_s2 = inlined_call_operand.vmem [shape: f32[2,16,2], index: 2, kind: input, shape index: {}]   ;;  %s5727_s3 = inlined_call_operand.vmem [shape: f32[2,16,1], index: 3, kind: input, shape index: {}]   ;;  %s5728_s4 = inlined_call_operand.vmem [shape: bf16[16,16], index: 4, kind: input, shape index: {}]   ;;  %s5729_s5 = inlined_call_operand.vmem [shape: bf16[27,32], index: 5, kind: input, shape index: {}]   ;;  %s5730_s6 = inlined_call_operand.vmem [shape: f32[1,32], index: 6, kind: input, shape index: {}]   ;;  %s5731_s7 = inlined_call_operand.vmem [shape: bf16[32,32], index: 7, kind: input, shape index: {}]   ;;  %s5732_s8 = inlined_call_operand.vmem [shape: f32[1,32], index: 8, kind: input, shape index: {}]   ;;  %s5733_s9 = inlined_call_operand.vmem [shape: bf16[32,32], index: 9, kind: input, shape index: {}]   ;;  %s5734_s10 = inlined_call_operand.vmem [shape: bf16[2,32], index: 10, kind: input, shape index: {}]   ;;  %s5735_s11 = inlined_call_operand.vmem [shape: f32[1,32], index: 11, kind: input, shape index: {}]   ;;  %s5736_s12 = inlined_call_operand.vmem [shape: bf16[2,32,32], index: 12, kind: input, shape index: {}]   ;;  %s5737_s13 = inlined_call_operand.vmem [shape: bf16[2,32,32], index: 13, kind: input, shape index: {}]   ;;  %s5738_s14 = inlined_call_operand.vmem [shape: f32[2,1,32], index: 14, kind: input, shape index: {}]   ;;  %s5739_s15 = inlined_call_operand.vmem [shape: bf16[32,2], index: 15, kind: input, shape index: {}]   ;;  %s5740_s16 = inlined_call_operand.vmem [shape: f32[1,2], index: 16, kind: input, shape index: {}]   ;;  %s5741_s17 = inlined_call_operand.vmem [shape: f32[2,16,2], index: 17, kind: output, shape index: {}]  }
   0x1   :  { %5772 = sst [smem:[#allocation24_spill]] %s5724_s0 }
   0x2   :  { %5773 = sst [smem:[#allocation25_spill]] %s5725_s1 }
   0x3   :  { %5774 = sst [smem:[#allocation26_spill]] %s5728_s4 }
   0x4   :  { %s5775_s26 = sld [smem:[#allocation24_spill]] }
   0xa   :  { %s23_s4 = sshll.u32 %s5775_s26, 4  ;;  %s24_s4 = int_to_ptr.vmem [resolvable:$true] %s23_s4 }
   0xb   :  { %26 = dma.vmem_to_smem %s24_s4, 32, %s4216_s27, [#allocation6] }
   0xc   :  { %4206 = dma.done.wait [#allocation6], 32 }
   0xd   :  { %4207 = vsyncadd [#allocation6], 4294967264 }
   0xe   :  { %29 = sfence }
   0xf   :  { %s4321_s28 = smov 0  }
  0x10 LB: > { %s4327_s29 = sadd.s32 4294967295, %s4210_s28   ;;  %p3963_p0 = scmp.ge.s32.totalorder %s4210_s28, 1  ;;  %s4210_s28 = sphi %s4321_s28, %s35_s28  }
  0x11   : > { %p491_p1 = scmp.lt.s32.totalorder %s4210_s28, 3 }
  0x13   : > { %p492_p2 = pnand %p3963_p0, %p491_p1 }
  0x15   : > { %495 = sbr.rel (%p492_p2) target bundleno = 2023 (0x7e7), region = 84 }
  0x1a   : > { %vm572_vm0 = vcmask 23552   ;;  %p551_p3 = scmp.lt.s32.totalorder %s4327_s29, 1  ;;  %v5750_v0 = vmov 0.0   ;;  %s5776_s1 = sld [smem:[#allocation25_spill]]  ;;  %v643_v55 = vlaneseq  ;;  %vm1508_vm9 = vcmask 48152  }
  0x1b   : > { %574 = vst.msk [vmem:[#allocation2 + $0x8] sm:$0xff] %vm572_vm0, %v5750_v0  ;;  %s4218_s18 = smov 3   ;;  %s4220_s19 = smov 9  }
  0x1c   : > { %573 = vst.msk [vmem:[#allocation2] sm:$0xff] %vm572_vm0, %v5750_v0  ;;  %s552_s4 = scalar_select %p551_p3, %s4327_s29, 1  ;;  %v4449_v57 = vshrl.u32 %v643_v55, 7 }
  0x1d   : > { %575 = vst.msk [vmem:[#allocation2 + $0x10] sm:$0xff] %vm572_vm0, %v5750_v0  ;;  %s4222_s21 = smov 15   ;;  %s4223_s22 = smov 18  }
  0x1e   : > { %576 = vst.msk [vmem:[#allocation2 + $0x118] sm:$0xff] %vm572_vm0, %v5750_v0  ;;  %s4125_s0 = sshll.u32 %s552_s4, 8  ;;  %s4126_s30 = sshll.u32 %s552_s4, 4  ;;  %v645_v60 = vadd.s32 8, %v4449_v57 }
  0x1f   : > { %577 = vst.msk [vmem:[#allocation2 + $0x120] sm:$0xff] %vm572_vm0, %v5750_v0  ;;  %s4351_s23 = scalar_lea.vmem %s5726_s2, %s4126_s30  ;;  %s4358_s26 = scalar_lea.vmem %s5727_s3, %s4126_s30 }
  0x20   : > { %s4346_s20 = scalar_lea.vmem %s5776_s1, %s4125_s0  ;;  %578 = vst.msk [vmem:[#allocation2 + $0x128] sm:$0xff] %vm572_vm0, %v5750_v0  ;;  %s4363_s0 = scalar_lea.vmem %s5741_s17, %s4126_s30  ;;  %v687_v62 = vand.u32 15, %v645_v60 }
  0x21   : > { %v579_v1 = vld [vmem:[%s4346_s20] sm:$0xff]  ;;  %v580_v2 = vld [vmem:[%s4346_s20 + $0x8] sm:$0xff]  ;;  %v586_v6 = vld [vmem:[%s4346_s20 + $0x38] sm:$0xff]  ;;  %s4219_s30 = smov 6   ;;  %s4221_s1 = smov 12  }
  0x22   : > { %v583_v3 = vld [vmem:[%s4346_s20 + $0x20] sm:$0xff]  ;;  %611 = vst.msk [vmem:[#allocation2 + $0x18] sm:$0xff] %vm572_vm0, %v579_v1  ;;  %v584_v4 = vld [vmem:[%s4346_s20 + $0x28] sm:$0xff]  ;;  %v581_v7 = vld [vmem:[%s4346_s20 + $0x10] sm:$0xff]  ;;  %v680_v1 = vand.u32 15, %v4449_v57  ;;  %vm1157_vm1 = vcmp.lt.s32.totalorder %v687_v62, 15 }
  0x23   : > { %v1348_v5 = vld [vmem:[#allocation2 + $0x8] sm:$0xff]  ;;  %612 = vst.msk [vmem:[#allocation2 + $0x20] sm:$0xff] %vm572_vm0, %v580_v2  ;;  %v587_v8 = vld [vmem:[%s4346_s20 + $0x40] sm:$0xff]  ;;  %v589_v9 = vld [vmem:[%s4346_s20 + $0x50] sm:$0xff]  ;;  %v654_v62 = vadd.s32 80, %v4449_v57  ;;  %s4224_s24 = smov 21  }
  0x24   : > { %1412 = vrot.lane.b32.xlu0 %v1348_v5, %s4218_s18  ;;  %615 = vst.msk [vmem:[#allocation2 + $0x38] sm:$0xff] %vm572_vm0, %v583_v3  ;;  %v582_v10 = vld [vmem:[%s4346_s20 + $0x18] sm:$0xff]  ;;  %v1349_v13 = vld [vmem:[#allocation2 + $0x10] sm:$0xff]  ;;  %v592_v14 = vld [vmem:[%s4346_s20 + $0x68] sm:$0xff]  ;;  %vm1060_vm2 = vcmp.gt.s32.totalorder %v680_v1, 0  ;;  %v656_v1 = vadd.s32 96, %v4449_v57 }
  0x25   : > { %616 = vst.msk [vmem:[#allocation2 + $0x40] sm:$0xff] %vm572_vm0, %v584_v4  ;;  %v590_v11 = vld [vmem:[%s4346_s20 + $0x58] sm:$0xff]  ;;  %v585_v15 = vld [vmem:[%s4346_s20 + $0x30] sm:$0xff]  ;;  %v595_v17 = vld [vmem:[%s4346_s20 + $0x80] sm:$0xff]  ;;  %v4459_v3 = vsel %vm1060_vm2, 1.0, %v5750_v0  ;;  %s4225_s25 = smov 24  }
  0x26   : > { %618 = vst.msk [vmem:[#allocation2 + $0x50] sm:$0xff] %vm572_vm0, %v586_v6  ;;  %v593_v16 = vld [vmem:[%s4346_s20 + $0x70] sm:$0xff]  ;;  %v588_v21 = vld [vmem:[%s4346_s20 + $0x48] sm:$0xff]  ;;  %v598_v23 = vld [vmem:[%s4346_s20 + $0x98] sm:$0xff] }
  0x27   : > { %613 = vst.msk [vmem:[#allocation2 + $0x28] sm:$0xff] %vm572_vm0, %v581_v7  ;;  %v596_v22 = vld [vmem:[%s4346_s20 + $0x88] sm:$0xff]  ;;  %v591_v27 = vld [vmem:[%s4346_s20 + $0x60] sm:$0xff]  ;;  %v601_v29 = vld [vmem:[%s4346_s20 + $0xb0] sm:$0xff]  ;;  %v4464_v7 = vsel %vm1157_vm1, 1.0, %v5750_v0 }
  0x28   : > { %619 = vst.msk [vmem:[#allocation2 + $0x58] sm:$0xff] %vm572_vm0, %v587_v8  ;;  %v599_v28 = vld [vmem:[%s4346_s20 + $0xa0] sm:$0xff]  ;;  %v594_v33 = vld [vmem:[%s4346_s20 + $0x78] sm:$0xff]  ;;  %v604_v35 = vld [vmem:[%s4346_s20 + $0xc8] sm:$0xff] }
  0x29   : > { %v1350_v12 = vld [vmem:[#allocation2 + $0x18] sm:$0xff]  ;;  %621 = vst.msk [vmem:[#allocation2 + $0x68] sm:$0xff] %vm572_vm0, %v589_v9  ;;  %v597_v39 = vld [vmem:[%s4346_s20 + $0x90] sm:$0xff]  ;;  %v607_v41 = vld [vmem:[%s4346_s20 + $0xe0] sm:$0xff]  ;;  %v647_v9 = vadd.s32 24, %v4449_v57 }
  0x2a   : > { %1416 = vrot.lane.b32.xlu1 %v1350_v12, %s4218_s18  ;;  %614 = vst.msk [vmem:[#allocation2 + $0x30] sm:$0xff] %vm572_vm0, %v582_v10  ;;  %v1351_v19 = vld [vmem:[#allocation2 + $0x20] sm:$0xff]  ;;  %v602_v34 = vld [vmem:[%s4346_s20 + $0xb8] sm:$0xff]  ;;  %v605_v40 = vld [vmem:[%s4346_s20 + $0xd0] sm:$0xff]  ;;  %v646_v10 = vadd.s32 16, %v4449_v57 }
  0x2b   : > { %622 = vst.msk [vmem:[#allocation2 + $0x70] sm:$0xff] %vm572_vm0, %v590_v11  ;;  %v1354_v20 = vld [vmem:[#allocation2 + $0x38] sm:$0xff]  ;;  %v600_v45 = vld [vmem:[%s4346_s20 + $0xa8] sm:$0xff]  ;;  %v603_v50 = vld [vmem:[%s4346_s20 + $0xc0] sm:$0xff]  ;;  %v648_v11 = vadd.s32 32, %v4449_v57 }
  0x2c   : > { %1414 = vrot.lane.b32.xlu0 %v1349_v13, %s4218_s18  ;;  %624 = vst.msk [vmem:[#allocation2 + $0x80] sm:$0xff] %vm572_vm0, %v592_v14  ;;  %v1355_v25 = vld [vmem:[#allocation2 + $0x40] sm:$0xff]  ;;  %v608_v46 = vld [vmem:[%s4346_s20 + $0xe8] sm:$0xff]  ;;  %v606_v54 = vld [vmem:[%s4346_s20 + $0xd8] sm:$0xff]  ;;  %v694_v13 = vand.u32 15, %v646_v10 }
  0x2d   : > { %617 = vst.msk [vmem:[#allocation2 + $0x48] sm:$0xff] %vm572_vm0, %v585_v15  ;;  %v1357_v26 = vld [vmem:[#allocation2 + $0x50] sm:$0xff]  ;;  %v1252_v4 = vld [vmem:[#allocation2 + $0x7] sm:$0xff]  ;;  %v649_v15 = vadd.s32 40, %v4449_v57  ;;  %v4554_v60 = vld [vmem:[#allocation2 + $0x3f] sm:$0xff] }
  0x2e   : > { %v1352_v18 = vld [vmem:[#allocation2 + $0x28] sm:$0xff]  ;;  %625 = vst.msk [vmem:[#allocation2 + $0x88] sm:$0xff] %vm572_vm0, %v593_v16  ;;  %v1284_v6 = vmul.f32 %v4459_v3, %v1252_v4  ;;  %v1542_v8 = vld [vmem:[#allocation2 + $0x11] sm:$0xff]  ;;  %v708_v16 = vand.u32 15, %v648_v11  ;;  %vm1062_vm3 = vcmp.gt.s32.totalorder %v694_v13, 0  ;;  %v750_v4 = vand.u32 15, %v654_v62 }
  0x2f   : > { %1420 = vrot.lane.b32.xlu2 %v1352_v18, %s4218_s18  ;;  %627 = vst.msk [vmem:[#allocation2 + $0x98] sm:$0xff] %vm572_vm0, %v595_v17  ;;  %v1358_v31 = vld [vmem:[#allocation2 + $0x58] sm:$0xff]  ;;  %v1574_v14 = vmul.f32 %v4464_v7, %v1542_v8  ;;  %v701_v17 = vand.u32 15, %v647_v9  ;;  %v651_v18 = vadd.s32 56, %v4449_v57  ;;  %v764_v8 = vand.u32 15, %v656_v1 }
  0x30   : > { %620 = vst.msk [vmem:[#allocation2 + $0x60] sm:$0xff] %vm572_vm0, %v588_v21  ;;  %v1360_v32 = vld [vmem:[#allocation2 + $0x68] sm:$0xff]  ;;  %vm1064_vm4 = vcmp.gt.s32.totalorder %v708_v16, 0  ;;  %v4480_v21 = vld [vmem:[#allocation2 + $0x17] sm:$0xff]  ;;  %vm1070_vm13 = vcmp.gt.s32.totalorder %v750_v4, 0 }
  0x31   : > { %628 = vst.msk [vmem:[#allocation2 + $0xa0] sm:$0xff] %vm572_vm0, %v596_v22  ;;  %v1353_v24 = vld [vmem:[#allocation2 + $0x30] sm:$0xff]  ;;  %v4483_v22 = vsel %vm1064_vm4, 1.0, %v5750_v0  ;;  %vm1159_vm5 = vcmp.lt.s32.totalorder %v701_v17, 15  ;;  %vm1072_vm15 = vcmp.gt.s32.totalorder %v764_v8, 0 }
  0x32   : > { %1418 = vrot.lane.b32.xlu1 %v1351_v19, %s4218_s18  ;;  %630 = vst.msk [vmem:[#allocation2 + $0xb0] sm:$0xff] %vm572_vm0, %v598_v23  ;;  %v1361_v37 = vld [vmem:[#allocation2 + $0x70] sm:$0xff]  ;;  %v4475_v19 = vld [vmem:[#allocation2 + $0x27] sm:$0xff] }
  0x33   : > { %623 = vst.msk [vmem:[#allocation2 + $0x78] sm:$0xff] %vm572_vm0, %v591_v27  ;;  %v1363_v38 = vld [vmem:[#allocation2 + $0x80] sm:$0xff]  ;;  %v1253_v27 = vld [vmem:[#allocation2 + $0xf] sm:$0xff]  ;;  %v4579_v13 = vld [vmem:[#allocation2 + $0x57] sm:$0xff] }
  0x34   : > { %1424 = vrot.lane.b32.xlu0 %v1354_v20, %s4218_s18  ;;  %631 = vst.msk [vmem:[#allocation2 + $0xb8] sm:$0xff] %vm572_vm0, %v599_v28  ;;  %v1356_v30 = vld [vmem:[#allocation2 + $0x48] sm:$0xff]  ;;  %v4478_v20 = vsel %vm1062_vm3, 1.0, %v5750_v0  ;;  %v729_v28 = vand.u32 15, %v651_v18  ;;  %v4591_v18 = vsel %vm1072_vm15, 1.0, %v5750_v0 }
  0x35   : > { %633 = vst.msk [vmem:[#allocation2 + $0xc8] sm:$0xff] %vm572_vm0, %v601_v29  ;;  %v1364_v43 = vld [vmem:[#allocation2 + $0x88] sm:$0xff]  ;;  %v1286_v23 = vmul.f32 %v4478_v20, %v4480_v21  ;;  %v650_v29 = vadd.s32 48, %v4449_v57 }
  0x36   : > { %626 = vst.msk [vmem:[#allocation2 + $0x90] sm:$0xff] %vm572_vm0, %v594_v33  ;;  %v1366_v44 = vld [vmem:[#allocation2 + $0x98] sm:$0xff]  ;;  %vm1163_vm7 = vcmp.lt.s32.totalorder %v729_v28, 15 }
  0x37   : > { %1422 = vrot.lane.b32.xlu2 %v1353_v24, %s4218_s18  ;;  %634 = vst.msk [vmem:[#allocation2 + $0xd0] sm:$0xff] %vm572_vm0, %v602_v34  ;;  %v1359_v36 = vld [vmem:[#allocation2 + $0x60] sm:$0xff]  ;;  %v715_v24 = vand.u32 15, %v649_v15  ;;  %v722_v33 = vand.u32 15, %v650_v29  ;;  %v4502_v34 = vld [vmem:[#allocation2 + $0x29] sm:$0xff] }
  0x38   : > { %636 = vst.msk [vmem:[#allocation2 + $0xe0] sm:$0xff] %vm572_vm0, %v604_v35  ;;  %v1367_v48 = vld [vmem:[#allocation2 + $0xa0] sm:$0xff]  ;;  %v4506_v35 = vld [vmem:[#allocation2 + $0x2f] sm:$0xff] }
  0x39   : > { %629 = vst.msk [vmem:[#allocation2 + $0xa8] sm:$0xff] %vm572_vm0, %v597_v39  ;;  %v1369_v49 = vld [vmem:[#allocation2 + $0xb0] sm:$0xff]  ;;  %vm1161_vm6 = vcmp.lt.s32.totalorder %v715_v24, 15  ;;  %vm1066_vm8 = vcmp.gt.s32.totalorder %v722_v33, 0  ;;  %v1551_v9 = vld [vmem:[#allocation2 + $0x59] sm:$0xff]  ;;  %v1552_v15 = vld [vmem:[#allocation2 + $0x61] sm:$0xff] }
  0x3a   : > { %1426 = vrot.lane.b32.xlu1 %v1355_v25, %s4218_s18  ;;  %637 = vst.msk [vmem:[#allocation2 + $0xe8] sm:$0xff] %vm572_vm0, %v605_v40  ;;  %v1362_v42 = vld [vmem:[#allocation2 + $0x78] sm:$0xff]  ;;  %v1541_v25 = vld [vmem:[#allocation2 + $0x9] sm:$0xff]  ;;  %v4518_v39 = vsel %vm1066_vm8, 1.0, %v5750_v0  ;;  %v658_v33 = vadd.s32 112, %v4449_v57 }
  0x3b   : > { %639 = vst.msk [vmem:[#allocation2 + $0xf8] sm:$0xff] %vm572_vm0, %v607_v41  ;;  %v1370_v52 = vld [vmem:[#allocation2 + $0xb8] sm:$0xff] }
  0x3c   : > { %1430 = vrot.lane.b32.xlu0 %v1357_v26, %s4218_s18  ;;  %632 = vst.msk [vmem:[#allocation2 + $0xc0] sm:$0xff] %vm572_vm0, %v600_v45  ;;  %v1372_v53 = vld [vmem:[#allocation2 + $0xc8] sm:$0xff]  ;;  %v1288_v26 = vmul.f32 %v4483_v22, %v4475_v19  ;;  %v4520_v40 = vld [vmem:[#allocation2 + $0x37] sm:$0xff]  ;;  %v4524_v41 = vld [vmem:[#allocation2 + $0x1f] sm:$0xff]  ;;  %v653_v45 = vadd.s32 72, %v4449_v57 }
  0x3d   : > { %640 = vst.msk [vmem:[#allocation2 + $0x100] sm:$0xff] %vm572_vm0, %v608_v46  ;;  %v1365_v47 = vld [vmem:[#allocation2 + $0x90] sm:$0xff]  ;;  %v4574_v11 = vld [vmem:[#allocation2 + $0x5f] sm:$0xff] }
  0x3e   : > { %635 = vst.msk [vmem:[#allocation2 + $0xd8] sm:$0xff] %vm572_vm0, %v603_v50  ;;  %v1373_v58 = vld [vmem:[#allocation2 + $0xd0] sm:$0xff]  ;;  %v4626_v1 = vld [vmem:[#allocation2 + $0x7f] sm:$0xff] }
  0x3f   : > { %1428 = vrot.lane.b32.xlu2 %v1356_v30, %s4218_s18  ;;  %638 = vst.msk [vmem:[#allocation2 + $0xf0] sm:$0xff] %vm572_vm0, %v606_v54  ;;  %v1375_v59 = vld [vmem:[#allocation2 + $0xe0] sm:$0xff] }
  0x40   : > { %v1368_v51 = vld [vmem:[#allocation2 + $0xa8] sm:$0xff]  ;;  %1316 = vst.msk [vmem:[#allocation3] sm:$0xff] %vm572_vm0, %v1284_v6  ;;  %v4493_v30 = vld [vmem:[#allocation2 + $0x19] sm:$0xff]  ;;  %v4570_v6 = vld [vmem:[#allocation2 + $0x51] sm:$0xff] }
  0x41   : > { %v1376_v63 = vld [vmem:[#allocation2 + $0xe8] sm:$0xff]  ;;  %1318 = vst.msk [vmem:[#allocation3 + $0x10] sm:$0xff] %vm572_vm0, %v1286_v23  ;;  %v1555_v4 = vld [vmem:[#allocation2 + $0x79] sm:$0xff] }
  0x42   : > { %1432 = vrot.lane.b32.xlu1 %v1358_v31, %s4218_s18  ;;  %v1378_v2 = vld [vmem:[#allocation2 + $0xf8] sm:$0xff]  ;;  %1320 = vst.msk [vmem:[#allocation3 + $0x20] sm:$0xff] %vm572_vm0, %v1288_v26  ;;  %v4498_v31 = vsel %vm1159_vm5, 1.0, %v5750_v0  ;;  %v4544_v54 = vld [vmem:[#allocation2 + $0x47] sm:$0xff] }
  0x43   : > { %v1371_v56 = vld [vmem:[#allocation2 + $0xc0] sm:$0xff]  ;;  %1317 = vst.msk [vmem:[#allocation3 + $0x8] sm:$0xff] %vm572_vm0, %v1253_v27  ;;  %v1554_v26 = vld [vmem:[#allocation2 + $0x71] sm:$0xff]  ;;  %v659_v27 = vadd.s32 120, %v4449_v57 }
  0x44   : > { %1436 = vrot.lane.b32.xlu0 %v1360_v32, %s4218_s18  ;;  %v1379_v12 = vld [vmem:[#allocation2 + $0x100] sm:$0xff]  ;;  %1321 = vst.msk [vmem:[#allocation3 + $0x28] sm:$0xff] %vm572_vm0, %v4506_v35 }
  0x45   : > { %v1374_v61 = vld [vmem:[#allocation2 + $0xd8] sm:$0xff]  ;;  %v4500_v32 = vld [vmem:[#allocation2 + $0x21] sm:$0xff]  ;;  %1319 = vst.msk [vmem:[#allocation3 + $0x18] sm:$0xff] %vm572_vm0, %v4524_v41 }
  0x46   : > { %v1377_v5 = vld [vmem:[#allocation2 + $0xf0] sm:$0xff]  ;;  %1323 = vst.msk [vmem:[#allocation3 + $0x38] sm:$0xff] %vm572_vm0, %v4554_v60  ;;  %v4593_v23 = vld [vmem:[#allocation2 + $0x67] sm:$0xff] }
  0x47   : > { %1434 = vrot.lane.b32.xlu2 %v1359_v36, %s4218_s18  ;;  %v4509_v36 = vsel %vm1161_vm6, 1.0, %v5750_v0  ;;  %5781 = vst [vmem:[#allocation13_spill] sm:$0xff] %v4570_v6  ;;  %v1296_v24 = vmul.f32 %v4591_v18, %v4593_v23 }
  0x48   : > { %5777 = vst [vmem:[#allocation9_spill] sm:$0xff] %v4509_v36 }
  0x49   : > { %1327 = vst.msk [vmem:[#allocation3 + $0x58] sm:$0xff] %vm572_vm0, %v4574_v11 }
  0x4a   : > { %1438 = vrot.lane.b32.xlu1 %v1361_v37, %s4218_s18  ;;  %v4511_v37 = vld [vmem:[#allocation2 + $0x31] sm:$0xff]  ;;  %1328 = vst.msk [vmem:[#allocation3 + $0x60] sm:$0xff] %vm572_vm0, %v1296_v24 }
  0x4b   : > { %v1578_v46 = vmul.f32 %v4509_v36, %v4511_v37  ;;  %1331 = vst.msk [vmem:[#allocation3 + $0x78] sm:$0xff] %vm572_vm0, %v4626_v1 }
  0x4c   : > { %1442 = vrot.lane.b32.xlu0 %v1363_v38, %s4218_s18  ;;  %v1576_v38 = vmul.f32 %v4498_v31, %v4500_v32 }
  0x4f   : > { %1440 = vrot.lane.b32.xlu2 %v1362_v42, %s4218_s18  ;;  %v1290_v42 = vmul.f32 %v4518_v39, %v4520_v40 }
  0x51   : > { %1322 = vst.msk [vmem:[#allocation3 + $0x30] sm:$0xff] %vm572_vm0, %v1290_v42  ;;  %v661_v42 = vadd.s32 136, %v4449_v57 }
  0x52   : > { %1444 = vrot.lane.b32.xlu1 %v1364_v43, %s4218_s18  ;;  %v4529_v43 = vsel %vm1163_vm7, 1.0, %v5750_v0 }
  0x53   : > { %5778 = vst [vmem:[#allocation10_spill] sm:$0xff] %v4529_v43 }
  0x54   : > { %1448 = vrot.lane.b32.xlu0 %v1366_v44, %s4218_s18  ;;  %v1548_v44 = vld [vmem:[#allocation2 + $0x41] sm:$0xff] }
  0x57   : > { %1446 = vrot.lane.b32.xlu2 %v1365_v47, %s4218_s18  ;;  %v652_v47 = vadd.s32 64, %v4449_v57 }
  0x59   : > { %v736_v50 = vand.u32 15, %v652_v47  ;;  %v663_v47 = vadd.s32 152, %v4449_v57 }
  0x5a   : > { %1450 = vrot.lane.b32.xlu1 %v1367_v48, %s4218_s18  ;;  %v1580_v48 = vmul.f32 %v4529_v43, %v1548_v44  ;;  %v778_v44 = vand.u32 15, %v658_v33  ;;  %v4654_v33 = vld [vmem:[#allocation2 + $0x87] sm:$0xff] }
  0x5b   : > { %vm1068_vm10 = vcmp.gt.s32.totalorder %v736_v50, 0 }
  0x5c   : > { %1454 = vrot.lane.b32.xlu0 %v1369_v49, %s4218_s18  ;;  %v655_v49 = vadd.s32 88, %v4449_v57  ;;  %v4547_v55 = vsel %vm1068_vm10, 1.0, %v5750_v0  ;;  %vm1074_vm1 = vcmp.gt.s32.totalorder %v778_v44, 0 }
  0x5f   : > { %1452 = vrot.lane.b32.xlu2 %v1368_v51, %s4218_s18 }
  0x62   : > { %1456 = vrot.lane.b32.xlu1 %v1370_v52, %s4218_s18  ;;  %v743_v52 = vand.u32 15, %v653_v45 }
  0x64   : > { %1460 = vrot.lane.b32.xlu0 %v1372_v53, %s4218_s18  ;;  %v657_v53 = vadd.s32 104, %v4449_v57  ;;  %vm1165_vm11 = vcmp.lt.s32.totalorder %v743_v52, 15  ;;  %v1553_v52 = vld [vmem:[#allocation2 + $0x69] sm:$0xff] }
  0x67   : > { %1458 = vrot.lane.b32.xlu2 %v1371_v56, %s4218_s18  ;;  %v757_v56 = vand.u32 15, %v655_v49  ;;  %v4616_v49 = vsel %vm1074_vm1, 1.0, %v5750_v0 }
  0x69   : > { %vm1167_vm12 = vcmp.lt.s32.totalorder %v757_v56, 15  ;;  %v4622_v56 = vld [vmem:[#allocation2 + $0x6f] sm:$0xff] }
  0x6a   : > { %1462 = vrot.lane.b32.xlu1 %v1373_v58, %s4218_s18  ;;  %v4550_v58 = vld [vmem:[#allocation2 + $0x39] sm:$0xff]  ;;  %1329 = vst.msk [vmem:[#allocation3 + $0x68] sm:$0xff] %vm572_vm0, %v4622_v56 }
  0x6b   : > { %5779 = vst [vmem:[#allocation11_spill] sm:$0xff] %v4550_v58 }
  0x6c   : > { %1466 = vrot.lane.b32.xlu0 %v1375_v59, %s4218_s18  ;;  %v1292_v59 = vmul.f32 %v4547_v55, %v4544_v54 }
  0x6e   : > { %1324 = vst.msk [vmem:[#allocation3 + $0x40] sm:$0xff] %vm572_vm0, %v1292_v59  ;;  %v660_v59 = vadd.s32 128, %v4449_v57 }
  0x6f   : > { %1464 = vrot.lane.b32.xlu2 %v1374_v61, %s4218_s18  ;;  %v4558_v61 = vld [vmem:[#allocation2 + $0x4f] sm:$0xff] }
  0x70   : > { %1325 = vst.msk [vmem:[#allocation3 + $0x48] sm:$0xff] %vm572_vm0, %v4558_v61  ;;  %v792_v8 = vand.u32 15, %v660_v59  ;;  %v665_v59 = vadd.s32 168, %v4449_v57 }
  0x72   : > { %1468 = vrot.lane.b32.xlu1 %v1376_v63, %s4218_s18  ;;  %v771_v63 = vand.u32 15, %v657_v53  ;;  %vm1076_vm4 = vcmp.gt.s32.totalorder %v792_v8, 0  ;;  %v667_v8 = vadd.s32 184, %v4449_v57 }
  0x74   : > { %1472 = vrot.lane.b32.xlu0 %v1378_v2, %s4218_s18  ;;  %v1549_v2 = vld [vmem:[#allocation2 + $0x49] sm:$0xff]  ;;  %vm1169_vm14 = vcmp.lt.s32.totalorder %v771_v63, 15  ;;  %v813_v63 = vand.u32 15, %v663_v47  ;;  %v4669_v47 = vld [vmem:[#allocation2 + $0x97] sm:$0xff] }
  0x76   : > { %vm4644_vm5 = vcmp.lt.s32.totalorder %v813_v63, 15 }
  0x77   : > { %1470 = vrot.lane.b32.xlu2 %v1377_v5, %s4218_s18  ;;  %v4568_v5 = vsel %vm1165_vm11, 1.0, %v5750_v0 }
  0x78   : > { %5780 = vst [vmem:[#allocation12_spill] sm:$0xff] %v4568_v5  ;;  %v1582_v16 = vmul.f32 %v4568_v5, %v4570_v6  ;;  %v4829_v6 = vld [vmem:[#allocation2 + $0xf7] sm:$0xff] }
  0x7a   : > { %1474 = vrot.lane.b32.xlu1 %v1379_v12, %s4218_s18  ;;  %v4577_v12 = vsel %vm1070_vm13, 1.0, %v5750_v0 }
  0x7b   : > { %v1294_v17 = vmul.f32 %v4577_v12, %v4579_v13 }
  0x7c   : > { %1639 = vrot.lane.b32.xlu0 %v1574_v14, %s4219_s30  ;;  %v4582_v14 = vsel %vm1167_vm12, 1.0, %v5750_v0 }
  0x7d   : > { %5782 = vst [vmem:[#allocation14_spill] sm:$0xff] %v4582_v14  ;;  %v1584_v29 = vmul.f32 %v4582_v14, %v1552_v15  ;;  %v1556_v15 = vld [vmem:[#allocation2 + $0x81] sm:$0xff] }
  0x7e   : > { %1326 = vst.msk [vmem:[#allocation3 + $0x50] sm:$0xff] %vm572_vm0, %v1294_v17  ;;  %v1557_v17 = vld [vmem:[#allocation2 + $0x89] sm:$0xff] }
  0x7f   : > { %1637 = vrot.lane.b32.xlu2 %v1541_v25, %s4219_s30  ;;  %v4599_v25 = vsel %vm1169_vm14, 1.0, %v5750_v0 }
  0x80   : > { %5783 = vst [vmem:[#allocation15_spill] sm:$0xff] %v4599_v25 }
  0x82   : > { %1641 = vrot.lane.b32.xlu1 %v4493_v30, %s4219_s30 }
  0x84   : > { %1645 = vrot.lane.b32.xlu0 %v4502_v34, %s4219_s30 }
  0x87   : > { %1643 = vrot.lane.b32.xlu2 %v1576_v38, %s4219_s30  ;;  %v1586_v38 = vmul.f32 %v4599_v25, %v1554_v26  ;;  %v609_v26 = vld [vmem:[%s4346_s20 + $0xf0] sm:$0xff] }
  0x88   : > { %641 = vst.msk [vmem:[#allocation2 + $0x108] sm:$0xff] %vm572_vm0, %v609_v26 }
  0x89   : > { %v1421_v51 = vpop.permute.xlu2 %1420 }
  0x8a   : > { %1647 = vrot.lane.b32.xlu1 %v1578_v46, %s4219_s30  ;;  %1513 = vst.msk [vmem:[#allocation3 + $0x20] sm:$0xff] %vm1508_vm9, %v1421_v51  ;;  %v785_v46 = vand.u32 15, %v659_v27  ;;  %v799_v51 = vand.u32 15, %v661_v42  ;;  %v1558_v42 = vld [vmem:[#allocation2 + $0x91] sm:$0xff] }
  0x8c   : > { %1651 = vrot.lane.b32.xlu0 %v1580_v48, %s4219_s30  ;;  %v4613_v48 = vld [vmem:[#allocation2 + $0x77] sm:$0xff]  ;;  %vm1171_vm2 = vcmp.lt.s32.totalorder %v785_v46, 15  ;;  %vm4631_vm3 = vcmp.lt.s32.totalorder %v799_v51, 15 }
  0x8d   : > { %v1298_v53 = vmul.f32 %v4616_v49, %v4613_v48 }
  0x8f   : > { %1649 = vrot.lane.b32.xlu2 %v4550_v58, %s4219_s30  ;;  %1330 = vst.msk [vmem:[#allocation3 + $0x70] sm:$0xff] %vm572_vm0, %v1298_v53  ;;  %v1560_v53 = vld [vmem:[#allocation2 + $0xa1] sm:$0xff] }
  0x91   : > { %v1423_v10 = vpop.permute.xlu2 %1422 }
  0x92   : > { %1653 = vrot.lane.b32.xlu1 %v1549_v2, %s4219_s30  ;;  %1514 = vst.msk [vmem:[#allocation3 + $0x28] sm:$0xff] %vm1508_vm9, %v1423_v10  ;;  %v662_v2 = vadd.s32 144, %v4449_v57  ;;  %v4636_v10 = vsel %vm1171_vm2, 1.0, %v5750_v0 }
  0x93   : > { %5786 = vst [vmem:[#allocation16_spill] sm:$0xff] %v4636_v10  ;;  %v1588_v44 = vmul.f32 %v4636_v10, %v1556_v15 }
  0x94   : > { %1657 = vrot.lane.b32.xlu0 %v1551_v9, %s4219_s30 }
  0x96   : > { %v1413_v28 = vpop.permute.xlu0 %1412 }
  0x97   : > { %1509 = vst.msk [vmem:[#allocation3] sm:$0xff] %vm1508_vm9, %v1413_v28  ;;  %1655 = vrot.lane.b32.xlu2 %v1582_v16, %s4219_s30  ;;  %v806_v16 = vand.u32 15, %v662_v2  ;;  %v4649_v28 = vld [vmem:[#allocation2 + $0x8f] sm:$0xff]  ;;  %v664_v2 = vadd.s32 160, %v4449_v57 }
  0x98   : > { %1333 = vst.msk [vmem:[#allocation3 + $0x88] sm:$0xff] %vm572_vm0, %v4649_v28 }
  0x99   : > { %v1429_v45 = vpop.permute.xlu2 %1428  ;;  %vm1078_vm6 = vcmp.gt.s32.totalorder %v806_v16, 0  ;;  %v820_v9 = vand.u32 15, %v664_v2  ;;  %v827_v16 = vand.u32 15, %v665_v59  ;;  %v1561_v2 = vld [vmem:[#allocation2 + $0xa9] sm:$0xff] }
  0x9a   : > { %1659 = vrot.lane.b32.xlu1 %v1584_v29, %s4219_s30  ;;  %1517 = vst.msk [vmem:[#allocation3 + $0x40] sm:$0xff] %vm1508_vm9, %v1429_v45  ;;  %v4652_v29 = vsel %vm1076_vm4, 1.0, %v5750_v0  ;;  %v4667_v46 = vsel %vm1078_vm6, 1.0, %v5750_v0  ;;  %vm3168_vm6 = vcmask 1044480  }
  0x9b   : > { %v1300_v45 = vmul.f32 %v4652_v29, %v4654_v33  ;;  %v1302_v51 = vmul.f32 %v4667_v46, %v4669_v47  ;;  %vm1080_vm7 = vcmp.gt.s32.totalorder %v820_v9, 0  ;;  %vm1177_vm8 = vcmp.lt.s32.totalorder %v827_v16, 15 }
  0x9c   : > { %1663 = vrot.lane.b32.xlu0 %v1586_v38, %s4219_s30  ;;  %v1417_v50 = vpop.permute.xlu1 %1416  ;;  %v4659_v38 = vsel %vm4631_vm3, 1.0, %v5750_v0  ;;  %v4696_v26 = vsel %vm1080_vm7, 1.0, %v5750_v0  ;;  %v4716_v9 = vsel %vm1177_vm8, 1.0, %v5750_v0  ;;  %vm3169_vm7 = vcmask 1045504  }
  0x9d   : > { %1511 = vst.msk [vmem:[#allocation3 + $0x10] sm:$0xff] %vm1508_vm9, %v1417_v50  ;;  %v1590_v63 = vmul.f32 %v4659_v38, %v1558_v42  ;;  %v841_v42 = vand.u32 15, %v667_v8  ;;  %vm2151_vm8 = vcmask 121952  }
  0x9e   : > { %v1415_v62 = vpop.permute.xlu0 %1414  ;;  %5789 = vst [vmem:[#allocation17_spill] sm:$0xff] %v4659_v38 }
  0x9f   : > { %1510 = vst.msk [vmem:[#allocation3 + $0x8] sm:$0xff] %vm1508_vm9, %v1415_v62  ;;  %1661 = vrot.lane.b32.xlu2 %v1553_v52, %s4219_s30  ;;  %v4679_v52 = vsel %vm4644_vm5, 1.0, %v5750_v0  ;;  %vm4711_vm10 = vcmp.lt.s32.totalorder %v841_v42, 15  ;;  %v673_v42 = vadd.s32 232, %v4449_v57  ;;  %vm1733_vm5 = vcmask 72752  }
  0xa0   : > { %5790 = vst [vmem:[#allocation18_spill] sm:$0xff] %v4679_v52 }
  0xa1   : > { %v1435_v24 = vpop.permute.xlu2 %1434  ;;  %1332 = vst.msk [vmem:[#allocation3 + $0x80] sm:$0xff] %vm572_vm0, %v1300_v45 }
  0xa2   : > { %1665 = vrot.lane.b32.xlu1 %v1555_v4, %s4219_s30  ;;  %1520 = vst.msk [vmem:[#allocation3 + $0x58] sm:$0xff] %vm1508_vm9, %v1435_v24  ;;  %v1592_v4 = vmul.f32 %v4679_v52, %v1560_v53  ;;  %v4693_v24 = vld [vmem:[#allocation2 + $0xa7] sm:$0xff]  ;;  %v671_v52 = vadd.s32 216, %v4449_v57 }
  0xa3   : > { %1334 = vst.msk [vmem:[#allocation3 + $0x90] sm:$0xff] %vm572_vm0, %v1302_v51  ;;  %v1304_v45 = vmul.f32 %v4696_v26, %v4693_v24  ;;  %v666_v51 = vadd.s32 176, %v4449_v57 }
  0xa4   : > { %1669 = vrot.lane.b32.xlu0 %v1557_v17, %s4219_s30  ;;  %v1419_v50 = vpop.permute.xlu1 %1418  ;;  %v669_v17 = vadd.s32 200, %v4449_v57  ;;  %5793 = vst [vmem:[#allocation19_spill] sm:$0xff] %v4716_v9  ;;  %v869_v14 = vand.u32 15, %v671_v52 }
  0xa5   : > { %1512 = vst.msk [vmem:[#allocation3 + $0x18] sm:$0xff] %vm1508_vm9, %v1419_v50  ;;  %v4702_v50 = vld [vmem:[#allocation2 + $0x9f] sm:$0xff] }
  0xa6   : > { %v1425_v62 = vpop.permute.xlu0 %1424  ;;  %v855_v59 = vand.u32 15, %v669_v17  ;;  %1336 = vst.msk [vmem:[#allocation3 + $0xa0] sm:$0xff] %vm572_vm0, %v1304_v45  ;;  %v1563_v17 = vld [vmem:[#allocation2 + $0xb9] sm:$0xff]  ;;  %vm1183_vm15 = vcmp.lt.s32.totalorder %v869_v14, 15 }
  0xa7   : > { %1515 = vst.msk [vmem:[#allocation3 + $0x30] sm:$0xff] %vm1508_vm9, %v1425_v62  ;;  %1667 = vrot.lane.b32.xlu2 %v1588_v44, %s4219_s30  ;;  %v1559_v44 = vld [vmem:[#allocation2 + $0x99] sm:$0xff]  ;;  %v4706_v62 = vld [vmem:[#allocation2 + $0xaf] sm:$0xff] }
  0xa8   : > { %1335 = vst.msk [vmem:[#allocation3 + $0x98] sm:$0xff] %vm572_vm0, %v4702_v50  ;;  %vm4723_vm12 = vcmp.lt.s32.totalorder %v855_v59, 15 }
  0xa9   : > { %v1441_v15 = vpop.permute.xlu2 %1440  ;;  %1337 = vst.msk [vmem:[#allocation3 + $0xa8] sm:$0xff] %vm572_vm0, %v4706_v62 }
  0xaa   : > { %1671 = vrot.lane.b32.xlu1 %v1590_v63, %s4219_s30  ;;  %1523 = vst.msk [vmem:[#allocation3 + $0x70] sm:$0xff] %vm1508_vm9, %v1441_v15  ;;  %v668_v63 = vadd.s32 192, %v4449_v57  ;;  %v1562_v15 = vld [vmem:[#allocation2 + $0xb1] sm:$0xff] }
  0xab   : > { %v1594_v59 = vmul.f32 %v4716_v9, %v1562_v15  ;;  %v4757_v15 = vsel %vm4723_vm12, 1.0, %v5750_v0  ;;  %v1566_v9 = vld [vmem:[#allocation2 + $0xd1] sm:$0xff]  ;;  %vm2794_vm12 = vcmask 195752  }
  0xac   : > { %1675 = vrot.lane.b32.xlu0 %v1592_v4, %s4219_s30  ;;  %v1427_v27 = vpop.permute.xlu1 %1426  ;;  %v834_v4 = vand.u32 15, %v666_v51  ;;  %v848_v16 = vand.u32 15, %v668_v63  ;;  %v4733_v51 = vld [vmem:[#allocation2 + $0xb7] sm:$0xff]  ;;  %v1564_v63 = vld [vmem:[#allocation2 + $0xc1] sm:$0xff]  ;;  %5797 = vst [vmem:[#allocation21_spill] sm:$0xff] %v4757_v15 }
  0xad   : > { %1516 = vst.msk [vmem:[#allocation3 + $0x38] sm:$0xff] %vm1508_vm9, %v1427_v27 }
  0xae   : > { %v1431_v53 = vpop.permute.xlu0 %1430  ;;  %vm1082_vm11 = vcmp.gt.s32.totalorder %v834_v4, 0  ;;  %vm1084_vm13 = vcmp.gt.s32.totalorder %v848_v16, 0 }
  0xaf   : > { %1518 = vst.msk [vmem:[#allocation3 + $0x48] sm:$0xff] %vm1508_vm9, %v1431_v53  ;;  %1673 = vrot.lane.b32.xlu2 %v1559_v44, %s4219_s30  ;;  %v4728_v44 = vld [vmem:[#allocation2 + $0xbf] sm:$0xff]  ;;  %v4731_v45 = vsel %vm1082_vm11, 1.0, %v5750_v0  ;;  %v4738_v53 = vsel %vm4711_vm10, 1.0, %v5750_v0  ;;  %v4746_v4 = vsel %vm1084_vm13, 1.0, %v5750_v0  ;;  %vm2376_vm10 = vcmask 146552  }
  0xb0   : > { %5796 = vst [vmem:[#allocation20_spill] sm:$0xff] %v4738_v53  ;;  %v1596_v10 = vmul.f32 %v4738_v53, %v1564_v63  ;;  %v675_v63 = vadd.s32 248, %v4449_v57  ;;  %v4784_v53 = vld [vmem:[#allocation2 + $0xdf] sm:$0xff]  ;;  %vm2601_vm11 = vcmask 171152   ;;  %vm3019_vm13 = vcmask 220352  }
  0xb1   : > { %v1447_v27 = vpop.permute.xlu2 %1446  ;;  %1339 = vst.msk [vmem:[#allocation3 + $0xb8] sm:$0xff] %vm572_vm0, %v4728_v44 }
  0xb2   : > { %1677 = vrot.lane.b32.xlu1 %v1561_v2, %s4219_s30  ;;  %1526 = vst.msk [vmem:[#allocation3 + $0x88] sm:$0xff] %vm1508_vm9, %v1447_v27  ;;  %v1306_v2 = vmul.f32 %v4731_v45, %v4733_v51  ;;  %v4748_v27 = vld [vmem:[#allocation2 + $0xc7] sm:$0xff] }
  0xb3   : > { %v1308_v8 = vmul.f32 %v4746_v4, %v4748_v27  ;;  %1343 = vst.msk [vmem:[#allocation3 + $0xd8] sm:$0xff] %vm572_vm0, %v4784_v53 }
  0xb4   : > { %1681 = vrot.lane.b32.xlu0 %v1563_v17, %s4219_s30  ;;  %v1433_v16 = vpop.permute.xlu1 %1432  ;;  %1338 = vst.msk [vmem:[#allocation3 + $0xb0] sm:$0xff] %vm572_vm0, %v1306_v2  ;;  %v670_v17 = vadd.s32 208, %v4449_v57  ;;  %v4771_v2 = vld [vmem:[#allocation2 + $0xd7] sm:$0xff] }
  0xb5   : > { %1519 = vst.msk [vmem:[#allocation3 + $0x50] sm:$0xff] %vm1508_vm9, %v1433_v16  ;;  %v1598_v16 = vmul.f32 %v4757_v15, %v1566_v9  ;;  %v883_v15 = vand.u32 15, %v673_v42  ;;  %v1567_v42 = vld [vmem:[#allocation2 + $0xd9] sm:$0xff] }
  0xb6   : > { %v1437_v38 = vpop.permute.xlu0 %1436  ;;  %1340 = vst.msk [vmem:[#allocation3 + $0xc0] sm:$0xff] %vm572_vm0, %v1308_v8  ;;  %v862_v0 = vand.u32 15, %v670_v17  ;;  %v1565_v8 = vld [vmem:[#allocation2 + $0xc9] sm:$0xff]  ;;  %v897_v17 = vand.u32 15, %v675_v63  ;;  %v4796_v63 = vld [vmem:[#allocation2 + $0xe1] sm:$0xff] }
  0xb7   : > { %1521 = vst.msk [vmem:[#allocation3 + $0x60] sm:$0xff] %vm1508_vm9, %v1437_v38  ;;  %1679 = vrot.lane.b32.xlu2 %v1594_v59, %s4219_s30  ;;  %v5798_v38 = vmov 0.0   ;;  %vm4789_vm1 = vcmp.lt.s32.totalorder %v883_v15, 15  ;;  %v1571_v15 = vld [vmem:[#allocation2 + $0xf9] sm:$0xff] }
  0xb8   : > { %vm1086_vm14 = vcmp.gt.s32.totalorder %v862_v0, 0  ;;  %v672_v0 = vadd.s32 224, %v4449_v57  ;;  %5802 = vst [vmem:[#allocation23_spill] sm:$0xff] %v4796_v63  ;;  %vm4803_vm3 = vcmp.lt.s32.totalorder %v897_v17, 15 }
  0xb9   : > { %v1453_v25 = vpop.permute.xlu2 %1452  ;;  %v4774_v59 = vsel %vm1086_vm14, 1.0, %v5798_v38  ;;  %vm3119_vm14 = vcmask 220160  }
  0xba   : > { %1683 = vrot.lane.b32.xlu1 %v1596_v10, %s4219_s30  ;;  %1529 = vst.msk [vmem:[#allocation3 + $0xa0] sm:$0xff] %vm1508_vm9, %v1453_v25  ;;  %v1310_v52 = vmul.f32 %v4774_v59, %v4771_v2  ;;  %v4780_v25 = vld [vmem:[#allocation2 + $0xcf] sm:$0xff]  ;;  %v876_v5 = vand.u32 15, %v672_v0 }
  0xbb   : > { %1341 = vst.msk [vmem:[#allocation3 + $0xc8] sm:$0xff] %vm572_vm0, %v4780_v25 }
  0xbc   : > { %1687 = vrot.lane.b32.xlu0 %v1598_v16, %s4219_s30  ;;  %v1439_v9 = vpop.permute.xlu1 %1438  ;;  %1342 = vst.msk [vmem:[#allocation3 + $0xd0] sm:$0xff] %vm572_vm0, %v1310_v52  ;;  %v674_v16 = vadd.s32 240, %v4449_v57  ;;  %v1569_v57 = vld [vmem:[#allocation2 + $0xe9] sm:$0xff]  ;;  %vm1088_vm2 = vcmp.gt.s32.totalorder %v876_v5, 0  ;;  %v4818_v5 = vsel %vm4789_vm1, 1.0, %v5798_v38 }
  0xbd   : > { %1522 = vst.msk [vmem:[#allocation3 + $0x68] sm:$0xff] %vm1508_vm9, %v1439_v9  ;;  %v4794_v9 = vsel %vm1183_vm15, 1.0, %v5798_v38  ;;  %v4811_v0 = vsel %vm1088_vm2, 1.0, %v5798_v38  ;;  %vm3332_vm15 = vcmask 261120  }
  0xbe   : > { %v1443_v10 = vpop.permute.xlu0 %1442  ;;  %5801 = vst [vmem:[#allocation22_spill] sm:$0xff] %v4794_v9  ;;  %v890_v52 = vand.u32 15, %v674_v16  ;;  %v1570_v16 = vld [vmem:[#allocation2 + $0xf1] sm:$0xff]  ;;  %v1600_v17 = vmul.f32 %v4794_v9, %v4796_v63  ;;  %v4838_v9 = vsel %vm4803_vm3, 1.0, %v5798_v38  ;;  %v1572_v63 = vld [vmem:[#allocation2 + $0x101] sm:$0xff] }
  0xbf   : > { %1524 = vst.msk [vmem:[#allocation3 + $0x78] sm:$0xff] %vm1508_vm9, %v1443_v10  ;;  %1685 = vrot.lane.b32.xlu2 %v1565_v8, %s4219_s30  ;;  %v4808_v8 = vld [vmem:[#allocation2 + $0xef] sm:$0xff]  ;;  %v4813_v10 = vld [vmem:[#allocation2 + $0xe7] sm:$0xff]  ;;  %v1602_v58 = vmul.f32 %v4818_v5, %v1570_v16  ;;  %v1283_v16 = vld [vmem:[#allocation2 + $0xff] sm:$0xff] }
  0xc0   : > { %vm1090_vm4 = vcmp.gt.s32.totalorder %v890_v52, 0  ;;  %1345 = vst.msk [vmem:[#allocation3 + $0xe8] sm:$0xff] %vm572_vm0, %v4808_v8 }
  0xc1   : > { %v1459_v43 = vpop.permute.xlu2 %1458  ;;  %1347 = vst.msk [vmem:[#allocation3 + $0xf8] sm:$0xff] %vm572_vm0, %v1283_v16 }
  0xc2   : > { %1689 = vrot.lane.b32.xlu1 %v1567_v42, %s4219_s30  ;;  %1532 = vst.msk [vmem:[#allocation3 + $0xb8] sm:$0xff] %vm1508_vm9, %v1459_v43  ;;  %v1312_v43 = vmul.f32 %v4811_v0, %v4813_v10  ;;  %v4827_v42 = vsel %vm1090_vm4, 1.0, %v5798_v38 }
  0xc3   : > { %v1314_v52 = vmul.f32 %v4827_v42, %v4829_v6 }
  0xc4   : > { %1693 = vrot.lane.b32.xlu0 %v1569_v57, %s4219_s30  ;;  %v1445_v14 = vpop.permute.xlu1 %1444  ;;  %1344 = vst.msk [vmem:[#allocation3 + $0xe0] sm:$0xff] %vm572_vm0, %v1312_v43  ;;  %v1604_v57 = vmul.f32 %v4838_v9, %v1572_v63 }
  0xc5   : > { %1525 = vst.msk [vmem:[#allocation3 + $0x80] sm:$0xff] %vm1508_vm9, %v1445_v14 }
  0xc6   : > { %v1449_v36 = vpop.permute.xlu0 %1448  ;;  %1346 = vst.msk [vmem:[#allocation3 + $0xf0] sm:$0xff] %vm572_vm0, %v1314_v52 }
  0xc7   : > { %1527 = vst.msk [vmem:[#allocation3 + $0x90] sm:$0xff] %vm1508_vm9, %v1449_v36  ;;  %1691 = vrot.lane.b32.xlu2 %v1600_v17, %s4219_s30  ;;  %v1798_v36 = vmul.f32 %v4459_v3, %v4480_v21 }
  0xc9   : > { %v1465_v14 = vpop.permute.xlu2 %1464 }
  0xca   : > { %1695 = vrot.lane.b32.xlu1 %v1602_v58, %s4219_s30  ;;  %1535 = vst.msk [vmem:[#allocation3 + $0xd0] sm:$0xff] %vm1508_vm9, %v1465_v14  ;;  %v1800_v58 = vmul.f32 %v4478_v20, %v4475_v19 }
  0xcc   : > { %1699 = vrot.lane.b32.xlu0 %v1604_v57, %s4219_s30  ;;  %v1451_v38 = vpop.permute.xlu1 %1450  ;;  %v1802_v57 = vmul.f32 %v4483_v22, %v4520_v40 }
  0xcd   : > { %1528 = vst.msk [vmem:[#allocation3 + $0x98] sm:$0xff] %vm1508_vm9, %v1451_v38 }
  0xce   : > { %v1455_v43 = vpop.permute.xlu0 %1454 }
  0xcf   : > { %1530 = vst.msk [vmem:[#allocation3 + $0xa8] sm:$0xff] %vm1508_vm9, %v1455_v43  ;;  %1697 = vrot.lane.b32.xlu2 %v1571_v15, %s4219_s30  ;;  %v1806_v15 = vmul.f32 %v4547_v55, %v4579_v13 }
  0xd1   : > { %v1471_v63 = vpop.permute.xlu2 %1470 }
  0xd2   : > { %1862 = vrot.lane.b32.xlu1 %v1798_v36, %s4220_s19  ;;  %1538 = vst.msk [vmem:[#allocation3 + $0xe8] sm:$0xff] %vm1508_vm9, %v1471_v63  ;;  %v1808_v63 = vmul.f32 %v4577_v12, %v4593_v23 }
  0xd4   : > { %1866 = vrot.lane.b32.xlu0 %v1800_v58, %s4220_s19  ;;  %v1457_v17 = vpop.permute.xlu1 %1456 }
  0xd5   : > { %1531 = vst.msk [vmem:[#allocation3 + $0xb0] sm:$0xff] %vm1508_vm9, %v1457_v17 }
  0xd6   : > { %v1461_v21 = vpop.permute.xlu0 %1460 }
  0xd7   : > { %1533 = vst.msk [vmem:[#allocation3 + $0xc0] sm:$0xff] %vm1508_vm9, %v1461_v21  ;;  %1864 = vrot.lane.b32.xlu2 %v4524_v41, %s4220_s19  ;;  %v1804_v41 = vmul.f32 %v4518_v39, %v4544_v54 }
  0xd9   : > { %v1638_v52 = vpop.permute.xlu2 %1637 }
  0xda   : > { %1868 = vrot.lane.b32.xlu1 %v4506_v35, %s4220_s19  ;;  %1734 = vst.msk [vmem:[#allocation3] sm:$0xff] %vm1733_vm5, %v1638_v52  ;;  %v1810_v52 = vmul.f32 %v4591_v18, %v4613_v48 }
  0xdc   : > { %1872 = vrot.lane.b32.xlu0 %v4554_v60, %s4220_s19  ;;  %v1463_v14 = vpop.permute.xlu1 %1462 }
  0xdd   : > { %1534 = vst.msk [vmem:[#allocation3 + $0xc8] sm:$0xff] %vm1508_vm9, %v1463_v14 }
  0xde   : > { %v1467_v38 = vpop.permute.xlu0 %1466 }
  0xdf   : > { %1536 = vst.msk [vmem:[#allocation3 + $0xd8] sm:$0xff] %vm1508_vm9, %v1467_v38  ;;  %1870 = vrot.lane.b32.xlu2 %v1802_v57, %s4220_s19  ;;  %v1812_v57 = vmul.f32 %v4616_v49, %v4654_v33  ;;  %v1814_v33 = vmul.f32 %v4652_v29, %v4669_v47 }
  0xe1   : > { %v1644_v16 = vpop.permute.xlu2 %1643 }
  0xe2   : > { %1874 = vrot.lane.b32.xlu1 %v1804_v41, %s4220_s19  ;;  %1737 = vst.msk [vmem:[#allocation3 + $0x18] sm:$0xff] %vm1733_vm5, %v1644_v16  ;;  %v1816_v16 = vmul.f32 %v4667_v46, %v4693_v24 }
  0xe4   : > { %1878 = vrot.lane.b32.xlu0 %v1806_v15, %s4220_s19  ;;  %v1469_v43 = vpop.permute.xlu1 %1468 }
  0xe5   : > { %1537 = vst.msk [vmem:[#allocation3 + $0xe0] sm:$0xff] %vm1508_vm9, %v1469_v43 }
  0xe6   : > { %v1473_v36 = vpop.permute.xlu0 %1472 }
  0xe7   : > { %1539 = vst.msk [vmem:[#allocation3 + $0xf0] sm:$0xff] %vm1508_vm9, %v1473_v36  ;;  %1876 = vrot.lane.b32.xlu2 %v4558_v61, %s4220_s19 }
  0xe9   : > { %v1650_v58 = vpop.permute.xlu2 %1649 }
  0xea   : > { %1880 = vrot.lane.b32.xlu1 %v4574_v11, %s4220_s19  ;;  %1740 = vst.msk [vmem:[#allocation3 + $0x30] sm:$0xff] %vm1733_vm5, %v1650_v58  ;;  %v1822_v58 = vmul.f32 %v4746_v4, %v4771_v2 }
  0xec   : > { %1884 = vrot.lane.b32.xlu0 %v4622_v56, %s4220_s19  ;;  %v1475_v17 = vpop.permute.xlu1 %1474 }
  0xed   : > { %1540 = vst.msk [vmem:[#allocation3 + $0xf8] sm:$0xff] %vm1508_vm9, %v1475_v17  ;;  %vm1958_vm9 = vcmask 97352  }
  0xee   : > { %v1640_v21 = vpop.permute.xlu0 %1639 }
  0xef   : > { %1735 = vst.msk [vmem:[#allocation3 + $0x8] sm:$0xff] %vm1733_vm5, %v1640_v21  ;;  %1882 = vrot.lane.b32.xlu2 %v1808_v63, %s4220_s19  ;;  %v1991_v63 = vld [vmem:[#allocation2 + $0x18] sm:$0xff]  ;;  %v1826_v21 = vmul.f32 %v4811_v0, %v4829_v6 }
  0xf1   : > { %v1656_v14 = vpop.permute.xlu2 %1655 }
  0xf2   : > { %1886 = vrot.lane.b32.xlu1 %v1810_v52, %s4220_s19  ;;  %1743 = vst.msk [vmem:[#allocation3 + $0x48] sm:$0xff] %vm1733_vm5, %v1656_v14  ;;  %v1992_v14 = vld [vmem:[#allocation2 + $0x20] sm:$0xff] }
  0xf4   : > { %1890 = vrot.lane.b32.xlu0 %v1812_v57, %s4220_s19  ;;  %v1642_v23 = vpop.permute.xlu1 %1641 }
  0xf5   : > { %1736 = vst.msk [vmem:[#allocation3 + $0x10] sm:$0xff] %vm1733_vm5, %v1642_v23 }
  0xf6   : > { %v1646_v38 = vpop.permute.xlu0 %1645 }
  0xf7   : > { %1738 = vst.msk [vmem:[#allocation3 + $0x20] sm:$0xff] %vm1733_vm5, %v1646_v38  ;;  %1888 = vrot.lane.b32.xlu2 %v4626_v1, %s4220_s19  ;;  %v1818_v1 = vmul.f32 %v4696_v26, %v4733_v51  ;;  %v1820_v51 = vmul.f32 %v4731_v45, %v4748_v27 }
  0xf9   : > { %v1662_v48 = vpop.permute.xlu2 %1661 }
  0xfa   : > { %1892 = vrot.lane.b32.xlu1 %v4649_v28, %s4220_s19  ;;  %1746 = vst.msk [vmem:[#allocation3 + $0x60] sm:$0xff] %vm1733_vm5, %v1662_v48  ;;  %v2441_v48 = vmul.f32 %v4459_v3, %v4475_v19  ;;  %v2635_v3 = vld [vmem:[#allocation2 + $0x30] sm:$0xff]  ;;  %v2860_v19 = vmul.f32 %v4464_v7, %v4511_v37 }
  0xfc   : > { %1896 = vrot.lane.b32.xlu0 %v4702_v50, %s4220_s19  ;;  %v1648_v41 = vpop.permute.xlu1 %1647 }
  0xfd   : > { %1739 = vst.msk [vmem:[#allocation3 + $0x28] sm:$0xff] %vm1733_vm5, %v1648_v41 }
  0xfe   : > { %v1652_v15 = vpop.permute.xlu0 %1651 }
  0xff   : > { %1741 = vst.msk [vmem:[#allocation3 + $0x38] sm:$0xff] %vm1733_vm5, %v1652_v15  ;;  %1894 = vrot.lane.b32.xlu2 %v1814_v33, %s4220_s19 }
 0x101   : > { %v1668_v28 = vpop.permute.xlu2 %1667 }
 0x102   : > { %1898 = vrot.lane.b32.xlu1 %v1816_v16, %s4220_s19  ;;  %1749 = vst.msk [vmem:[#allocation3 + $0x78] sm:$0xff] %vm1733_vm5, %v1668_v28 }
 0x104   : > { %1902 = vrot.lane.b32.xlu0 %v1818_v1, %s4220_s19  ;;  %v1654_v47 = vpop.permute.xlu1 %1653  ;;  %v2827_v1 = vld [vmem:[#allocation2 + $0x29] sm:$0xff] }
 0x105   : > { %1742 = vst.msk [vmem:[#allocation3 + $0x40] sm:$0xff] %vm1733_vm5, %v1654_v47 }
 0x106   : > { %v1658_v50 = vpop.permute.xlu0 %1657 }
 0x107   : > { %1744 = vst.msk [vmem:[#allocation3 + $0x50] sm:$0xff] %vm1733_vm5, %v1658_v50  ;;  %1900 = vrot.lane.b32.xlu2 %v4706_v62, %s4220_s19  ;;  %v1824_v62 = vmul.f32 %v4774_v59, %v4813_v10  ;;  %v2219_v50 = vmul.f32 %v4498_v31, %v4511_v37  ;;  %v2636_v37 = vld [vmem:[#allocation2 + $0x38] sm:$0xff] }
 0x109   : > { %v1674_v24 = vpop.permute.xlu2 %1673 }
 0x10a   : > { %1904 = vrot.lane.b32.xlu1 %v4728_v44, %s4220_s19  ;;  %1752 = vst.msk [vmem:[#allocation3 + $0x90] sm:$0xff] %vm1733_vm5, %v1674_v24 }
 0x10c   : > { %1908 = vrot.lane.b32.xlu0 %v4780_v25, %s4220_s19  ;;  %v1660_v43 = vpop.permute.xlu1 %1659 }
 0x10d   : > { %1745 = vst.msk [vmem:[#allocation3 + $0x58] sm:$0xff] %vm1733_vm5, %v1660_v43 }
 0x10e   : > { %v1664_v36 = vpop.permute.xlu0 %1663 }
 0x10f   : > { %1747 = vst.msk [vmem:[#allocation3 + $0x68] sm:$0xff] %vm1733_vm5, %v1664_v36  ;;  %1906 = vrot.lane.b32.xlu2 %v1820_v51, %s4220_s19  ;;  %v2443_v51 = vmul.f32 %v4478_v20, %v4520_v40  ;;  %v5805_v20 = vld [vmem:[#allocation11_spill] sm:$0xff] }
 0x111   : > { %v1680_v44 = vpop.permute.xlu2 %1679 }
 0x112   : > { %1910 = vrot.lane.b32.xlu1 %v1822_v58, %s4220_s19  ;;  %1755 = vst.msk [vmem:[#allocation3 + $0xa8] sm:$0xff] %vm1733_vm5, %v1680_v44  ;;  %v2830_v58 = vld [vmem:[#allocation2 + $0x41] sm:$0xff] }
 0x113   : > { %v1996_v44 = vld [vmem:[#allocation2 + $0x40] sm:$0xff] }
 0x114   : > { %1914 = vrot.lane.b32.xlu0 %v1824_v62, %s4220_s19  ;;  %v1666_v27 = vpop.permute.xlu1 %1665  ;;  %v2862_v62 = vmul.f32 %v4498_v31, %v2830_v58  ;;  %v2445_v31 = vmul.f32 %v4483_v22, %v4544_v54 }
 0x115   : > { %1748 = vst.msk [vmem:[#allocation3 + $0x70] sm:$0xff] %vm1733_vm5, %v1666_v27 }
 0x116   : > { %v1670_v25 = vpop.permute.xlu0 %1669 }
 0x117   : > { %1750 = vst.msk [vmem:[#allocation3 + $0x80] sm:$0xff] %vm1733_vm5, %v1670_v25  ;;  %1912 = vrot.lane.b32.xlu2 %v4784_v53, %s4220_s19 }
 0x119   : > { %v1686_v17 = vpop.permute.xlu2 %1685 }
 0x11a   : > { %1916 = vrot.lane.b32.xlu1 %v4808_v8, %s4220_s19  ;;  %1758 = vst.msk [vmem:[#allocation3 + $0xc0] sm:$0xff] %vm1733_vm5, %v1686_v17  ;;  %v2217_v8 = vmul.f32 %v4464_v7, %v4500_v32  ;;  %v2634_v32 = vld [vmem:[#allocation2 + $0x28] sm:$0xff] }
 0x11c   : > { %2055 = vrot.lane.b32.xlu0 %v1991_v63, %s4221_s1  ;;  %v1672_v52 = vpop.permute.xlu1 %1671 }
 0x11d   : > { %1751 = vst.msk [vmem:[#allocation3 + $0x88] sm:$0xff] %vm1733_vm5, %v1672_v52 }
 0x11e   : > { %v1676_v57 = vpop.permute.xlu0 %1675 }
 0x11f   : > { %1753 = vst.msk [vmem:[#allocation3 + $0x98] sm:$0xff] %vm1733_vm5, %v1676_v57  ;;  %1918 = vrot.lane.b32.xlu2 %v1826_v21, %s4220_s19  ;;  %v5806_v21 = vld [vmem:[#allocation9_spill] sm:$0xff] }
 0x120   : > { %v2221_v52 = vmul.f32 %v5806_v21, %v2830_v58 }
 0x121   : > { %v1692_v23 = vpop.permute.xlu2 %1691 }
 0x122   : > { %2057 = vrot.lane.b32.xlu1 %v1992_v14, %s4221_s1  ;;  %1761 = vst.msk [vmem:[#allocation3 + $0xd8] sm:$0xff] %vm1733_vm5, %v1692_v23 }
 0x124   : > { %2282 = vrot.lane.b32.xlu0 %v2217_v8, %s4222_s21  ;;  %v1678_v6 = vpop.permute.xlu1 %1677  ;;  %v2639_v8 = vld [vmem:[#allocation2 + $0x50] sm:$0xff] }
 0x125   : > { %1754 = vst.msk [vmem:[#allocation3 + $0xa0] sm:$0xff] %vm1733_vm5, %v1678_v6  ;;  %v1997_v6 = vld [vmem:[#allocation2 + $0x48] sm:$0xff] }
 0x126   : > { %v1682_v38 = vpop.permute.xlu0 %1681 }
 0x127   : > { %1756 = vst.msk [vmem:[#allocation3 + $0xb0] sm:$0xff] %vm1733_vm5, %v1682_v38  ;;  %2280 = vrot.lane.b32.xlu2 %v4493_v30, %s4222_s21  ;;  %v2831_v38 = vld [vmem:[#allocation2 + $0x49] sm:$0xff] }
 0x129   : > { %v1698_v33 = vpop.permute.xlu2 %1697 }
 0x12a   : > { %2505 = vrot.lane.b32.xlu1 %v2441_v48, %s4223_s22  ;;  %1764 = vst.msk [vmem:[#allocation3 + $0xf0] sm:$0xff] %vm1733_vm5, %v1698_v33  ;;  %v2832_v48 = vld [vmem:[#allocation2 + $0x51] sm:$0xff] }
 0x12c   : > { %2698 = vrot.lane.b32.xlu0 %v2634_v32, %s4224_s24  ;;  %v1684_v41 = vpop.permute.xlu1 %1683 }
 0x12d   : > { %1757 = vst.msk [vmem:[#allocation3 + $0xb8] sm:$0xff] %vm1733_vm5, %v1684_v41 }
 0x12e   : > { %v1688_v15 = vpop.permute.xlu0 %1687 }
 0x12f   : > { %1759 = vst.msk [vmem:[#allocation3 + $0xc8] sm:$0xff] %vm1733_vm5, %v1688_v15  ;;  %2507 = vrot.lane.b32.xlu2 %v4506_v35, %s4223_s22  ;;  %v5807_v15 = vld [vmem:[#allocation13_spill] sm:$0xff] }
 0x131   : > { %v1865_v30 = vpop.permute.xlu2 %1864 }
 0x132   : > { %2700 = vrot.lane.b32.xlu1 %v2635_v3, %s4224_s24  ;;  %1960 = vst.msk [vmem:[#allocation3 + $0x8] sm:$0xff] %vm1958_vm9, %v1865_v30 }
 0x134   : > { %2925 = vrot.lane.b32.xlu0 %v2860_v19, %s4225_s25  ;;  %v1690_v16 = vpop.permute.xlu1 %1689 }
 0x135   : > { %1760 = vst.msk [vmem:[#allocation3 + $0xd0] sm:$0xff] %vm1733_vm5, %v1690_v16 }
 0x136   : > { %v1694_v28 = vpop.permute.xlu0 %1693 }
 0x137   : > { %1762 = vst.msk [vmem:[#allocation3 + $0xe0] sm:$0xff] %vm1733_vm5, %v1694_v28  ;;  %2923 = vrot.lane.b32.xlu2 %v2827_v1, %s4225_s25  ;;  %v2447_v28 = vmul.f32 %v4518_v39, %v4579_v13  ;;  %v2641_v39 = vld [vmem:[#allocation2 + $0x60] sm:$0xff] }
 0x139   : > { %v1871_v35 = vpop.permute.xlu2 %1870 }
 0x13a   : > { %2059 = vrot.lane.b32.xlu1 %v2634_v32, %s4221_s1  ;;  %1963 = vst.msk [vmem:[#allocation3 + $0x20] sm:$0xff] %vm1958_vm9, %v1871_v35  ;;  %v2640_v35 = vld [vmem:[#allocation2 + $0x58] sm:$0xff] }
 0x13c   : > { %2284 = vrot.lane.b32.xlu0 %v4502_v34, %s4222_s21  ;;  %v1696_v7 = vpop.permute.xlu1 %1695 }
 0x13d   : > { %1763 = vst.msk [vmem:[#allocation3 + $0xe8] sm:$0xff] %vm1733_vm5, %v1696_v7 }
 0x13e   : > { %v1700_v47 = vpop.permute.xlu0 %1699 }
 0x13f   : > { %1765 = vst.msk [vmem:[#allocation3 + $0xf8] sm:$0xff] %vm1733_vm5, %v1700_v47  ;;  %2061 = vrot.lane.b32.xlu2 %v2635_v3, %s4221_s1  ;;  %v5808_v3 = vld [vmem:[#allocation10_spill] sm:$0xff] }
 0x140   : > { %v2223_v19 = vmul.f32 %v5808_v3, %v5807_v15 }
 0x141   : > { %v1877_v24 = vpop.permute.xlu2 %1876 }
 0x142   : > { %2286 = vrot.lane.b32.xlu1 %v2219_v50, %s4222_s21  ;;  %1966 = vst.msk [vmem:[#allocation3 + $0x38] sm:$0xff] %vm1958_vm9, %v1877_v24  ;;  %v2834_v50 = vld [vmem:[#allocation2 + $0x61] sm:$0xff] }
 0x143   : > { %v2866_v13 = vmul.f32 %v5808_v3, %v2834_v50 }
 0x144   : > { %2511 = vrot.lane.b32.xlu0 %v4554_v60, %s4223_s22  ;;  %v1863_v34 = vpop.permute.xlu1 %1862 }
 0x145   : > { %1959 = vst.msk [vmem:[#allocation3] sm:$0xff] %vm1958_vm9, %v1863_v34 }
 0x146   : > { %v1867_v43 = vpop.permute.xlu0 %1866 }
 0x147   : > { %1961 = vst.msk [vmem:[#allocation3 + $0x10] sm:$0xff] %vm1958_vm9, %v1867_v43  ;;  %2509 = vrot.lane.b32.xlu2 %v2443_v51, %s4223_s22  ;;  %v4010_v43 = vld [vmem:[%s5729_s5 + $0x8] sm:$0xf] }
 0x149   : > { %v1883_v36 = vpop.permute.xlu2 %1882 }
 0x14a   : > { %2702 = vrot.lane.b32.xlu1 %v2636_v37, %s4224_s24  ;;  %1969 = vst.msk [vmem:[#allocation3 + $0x50] sm:$0xff] %vm1958_vm9, %v1883_v36  ;;  %v2192_v36 = vld [vmem:[#allocation2 + $0x59] sm:$0xff] }
 0x14c   : > { %2927 = vrot.lane.b32.xlu0 %v5805_v20, %s4225_s25  ;;  %v1869_v40 = vpop.permute.xlu1 %1868 }
 0x14d   : > { %1962 = vst.msk [vmem:[#allocation3 + $0x18] sm:$0xff] %vm1958_vm9, %v1869_v40 }
 0x14e   : > { %v1873_v60 = vpop.permute.xlu0 %1872 }
 0x14f   : > { %1964 = vst.msk [vmem:[#allocation3 + $0x28] sm:$0xff] %vm1958_vm9, %v1873_v60  ;;  %2704 = vrot.lane.b32.xlu2 %v1996_v44, %s4224_s24 }
 0x151   : > { %v1889_v27 = vpop.permute.xlu2 %1888 }
 0x152   : > { %2929 = vrot.lane.b32.xlu1 %v2862_v62, %s4225_s25  ;;  %1972 = vst.msk [vmem:[#allocation3 + $0x68] sm:$0xff] %vm1958_vm9, %v1889_v27 }
 0x154   : > { %2065 = vrot.lane.b32.xlu0 %v1996_v44, %s4221_s1  ;;  %v1875_v25 = vpop.permute.xlu1 %1874 }
 0x155   : > { %1965 = vst.msk [vmem:[#allocation3 + $0x30] sm:$0xff] %vm1958_vm9, %v1875_v25  ;;  %v4129_v25 = vld [vmem:[%s5729_s5] sm:$0xff] }
 0x156   : > { %v1879_v63 = vpop.permute.xlu0 %1878 }
 0x157   : > { %1967 = vst.msk [vmem:[#allocation3 + $0x40] sm:$0xff] %vm1958_vm9, %v1879_v63  ;;  %2063 = vrot.lane.b32.xlu2 %v2636_v37, %s4221_s1  ;;  %v4130_v37 = vld [vmem:[%s5729_s5 + $0x8] sm:$0x30] }
 0x158   : > { %v4011_v58 = vor.u32 %v4130_v37, %v4010_v43  ;;  %v2838_v37 = vld [vmem:[#allocation2 + $0x81] sm:$0xff] }
 0x159   : > { %v1895_v17 = vpop.permute.xlu2 %1894 }
 0x15a   : > { %2288 = vrot.lane.b32.xlu1 %v5805_v20, %s4222_s21  ;;  %1975 = vst.msk [vmem:[#allocation3 + $0x80] sm:$0xff] %vm1958_vm9, %v1895_v17  ;;  %v4226_v20 = vmov 65535  }
 0x15b   : > { %v3170_v40 = vsel %vm3168_vm6, 4294967295, %v4226_v20 }
 0x15c   : > { %2513 = vrot.lane.b32.xlu0 %v2445_v31, %s4223_s22  ;;  %v1881_v57 = vpop.permute.xlu1 %1880  ;;  %v3171_v60 = vsel %vm3169_vm7, %v3170_v40, 0  ;;  %v5809_v31 = vld [vmem:[#allocation12_spill] sm:$0xff] }
 0x15d   : > { %1968 = vst.msk [vmem:[#allocation3 + $0x48] sm:$0xff] %vm1958_vm9, %v1881_v57  ;;  %v3173_v44 = vand.u32 %v4011_v58, %v3171_v60  ;;  %v2225_v17 = vmul.f32 %v5809_v31, %v2834_v50  ;;  %v2207_v58 = vld [vmem:[#allocation2 + $0xd1] sm:$0xff] }
 0x15e   : > { %v1885_v14 = vpop.permute.xlu0 %1884  ;;  %v5811_v60 = vld [vmem:[#allocation20_spill] sm:$0xff] }
 0x15f   : > { %1970 = vst.msk [vmem:[#allocation3 + $0x58] sm:$0xff] %vm1958_vm9, %v1885_v14  ;;  %2290 = vrot.lane.b32.xlu2 %v2221_v52, %s4222_s21  ;;  %3181 = vmatpush.bf16.msra.mxu0 %v3173_v44 }
 0x160   : > { %4146 = vmatpush.bf16.msra.mxu3 %v3173_v44 }
 0x161   : > { %v1901_v22 = vpop.permute.xlu2 %1900 }
 0x162   : > { %2515 = vrot.lane.b32.xlu1 %v4558_v61, %s4223_s22  ;;  %1978 = vst.msk [vmem:[#allocation3 + $0x98] sm:$0xff] %vm1958_vm9, %v1901_v22  ;;  %v2864_v61 = vmul.f32 %v5806_v21, %v2832_v48  ;;  %v2417_v21 = vld [vmem:[#allocation2 + $0x67] sm:$0xff]  ;;  %v2002_v48 = vld [vmem:[#allocation2 + $0x70] sm:$0xff] }
 0x163   : > { %3182 = vmatpush.bf16.msra.mxu0 %v4129_v25  ;;  %v2449_v57 = vmul.f32 %v4547_v55, %v2417_v21  ;;  %v2642_v22 = vld [vmem:[#allocation2 + $0x68] sm:$0xff]  ;;  %v2836_v55 = vld [vmem:[#allocation2 + $0x71] sm:$0xff] }
 0x164   : > { %2708 = vrot.lane.b32.xlu0 %v2639_v8, %s4224_s24  ;;  %v1887_v54 = vpop.permute.xlu1 %1886  ;;  %4147 = vmatpush.bf16.msra.mxu3 %v4129_v25  ;;  %v2206_v25 = vld [vmem:[#allocation2 + $0xc9] sm:$0xff] }
 0x165   : > { %1971 = vst.msk [vmem:[#allocation3 + $0x60] sm:$0xff] %vm1958_vm9, %v1887_v54  ;;  %v2835_v54 = vld [vmem:[#allocation2 + $0x69] sm:$0xff] }
 0x166   : > { %v1891_v23 = vpop.permute.xlu0 %1890 }
 0x167   : > { %1973 = vst.msk [vmem:[#allocation3 + $0x70] sm:$0xff] %vm1958_vm9, %v1891_v23  ;;  %2706 = vrot.lane.b32.xlu2 %v1997_v6, %s4224_s24 }
 0x169   : > { %v1907_v32 = vpop.permute.xlu2 %1906 }
 0x16a   : > { %2931 = vrot.lane.b32.xlu1 %v2831_v38, %s4225_s25  ;;  %1981 = vst.msk [vmem:[#allocation3 + $0xb0] sm:$0xff] %vm1958_vm9, %v1907_v32 }
 0x16c   : > { %2067 = vrot.lane.b32.xlu0 %v1997_v6, %s4221_s1  ;;  %v1893_v33 = vpop.permute.xlu1 %1892 }
 0x16d   : > { %1974 = vst.msk [vmem:[#allocation3 + $0x78] sm:$0xff] %vm1958_vm9, %v1893_v33  ;;  %v2419_v33 = vld [vmem:[#allocation2 + $0x77] sm:$0xff] }
 0x16e   : > { %v1897_v41 = vpop.permute.xlu0 %1896  ;;  %v2451_v15 = vmul.f32 %v4577_v12, %v2419_v33  ;;  %v5108_v12 = vld [vmem:[#allocation2 + $0x80] sm:$0xff] }
 0x16f   : > { %1976 = vst.msk [vmem:[#allocation3 + $0x88] sm:$0xff] %vm1958_vm9, %v1897_v41  ;;  %2933 = vrot.lane.b32.xlu2 %v2864_v61, %s4225_s25  ;;  %v2421_v33 = vld [vmem:[#allocation2 + $0x87] sm:$0xff] }
 0x171   : > { %v1913_v30 = vpop.permute.xlu2 %1912 }
 0x172   : > { %2069 = vrot.lane.b32.xlu1 %v2639_v8, %s4221_s1  ;;  %1984 = vst.msk [vmem:[#allocation3 + $0xc8] sm:$0xff] %vm1958_vm9, %v1913_v30 }
 0x174   : > { %2294 = vrot.lane.b32.xlu0 %v2223_v19, %s4222_s21  ;;  %v1899_v16 = vpop.permute.xlu1 %1898  ;;  %v5810_v19 = vld [vmem:[#allocation14_spill] sm:$0xff] }
 0x175   : > { %1977 = vst.msk [vmem:[#allocation3 + $0x90] sm:$0xff] %vm1958_vm9, %v1899_v16  ;;  %v2227_v30 = vmul.f32 %v5810_v19, %v2836_v55  ;;  %v2870_v40 = vmul.f32 %v5810_v19, %v2838_v37  ;;  %v2453_v19 = vmul.f32 %v4591_v18, %v2421_v33 }
 0x176   : > { %v1903_v1 = vpop.permute.xlu0 %1902 }
 0x177   : > { %1979 = vst.msk [vmem:[#allocation3 + $0xa0] sm:$0xff] %vm1958_vm9, %v1903_v1  ;;  %2292 = vrot.lane.b32.xlu2 %v2831_v38, %s4222_s21  ;;  %v2868_v38 = vmul.f32 %v5809_v31, %v2836_v55  ;;  %v2463_v31 = vmul.f32 %v4731_v45, %v4771_v2  ;;  %v2657_v45 = vld [vmem:[#allocation2 + $0xe0] sm:$0xff]  ;;  %v5812_v2 = vld [vmem:[#allocation23_spill] sm:$0xff] }
 0x179   : > { %v1919_v7 = vpop.permute.xlu2 %1918 }
 0x17a   : > { %2517 = vrot.lane.b32.xlu1 %v2447_v28, %s4223_s22  ;;  %1987 = vst.msk [vmem:[#allocation3 + $0xe0] sm:$0xff] %vm1958_vm9, %v1919_v7 }
 0x17c   : > { %2710 = vrot.lane.b32.xlu0 %v2640_v35, %s4224_s24  ;;  %v1905_v47 = vpop.permute.xlu1 %1904 }
 0x17d   : > { %1980 = vst.msk [vmem:[#allocation3 + $0xa8] sm:$0xff] %vm1958_vm9, %v1905_v47  ;;  %v2420_v47 = vld [vmem:[#allocation2 + $0x7f] sm:$0xff] }
 0x17e   : > { %v1909_v24 = vpop.permute.xlu0 %1908 }
 0x17f   : > { %1982 = vst.msk [vmem:[#allocation3 + $0xb8] sm:$0xff] %vm1958_vm9, %v1909_v24  ;;  %2519 = vrot.lane.b32.xlu2 %v4574_v11, %s4223_s22 }
 0x181   : > { %v2281_v51 = vpop.permute.xlu2 %2280 }
 0x182   : > { %2712 = vrot.lane.b32.xlu1 %v2641_v39, %s4224_s24 }
 0x184   : > { %2937 = vrot.lane.b32.xlu0 %v2866_v13, %s4225_s25  ;;  %v1911_v34 = vpop.permute.xlu1 %1910 }
 0x185   : > { %1983 = vst.msk [vmem:[#allocation3 + $0xc0] sm:$0xff] %vm1958_vm9, %v1911_v34  ;;  %v2837_v34 = vld [vmem:[#allocation2 + $0x79] sm:$0xff] }
 0x186   : > { %v1915_v11 = vpop.permute.xlu0 %1914 }
 0x187   : > { %1985 = vst.msk [vmem:[#allocation3 + $0xd0] sm:$0xff] %vm1958_vm9, %v1915_v11  ;;  %2935 = vrot.lane.b32.xlu2 %v2192_v36, %s4225_s25 }
 0x189   : > { %v2508_v62 = vpop.permute.xlu2 %2507 }
 0x18a   : > { %2071 = vrot.lane.b32.xlu1 %v2640_v35, %s4221_s1 }
 0x18c   : > { %2296 = vrot.lane.b32.xlu0 %v2192_v36, %s4222_s21  ;;  %v1917_v27 = vpop.permute.xlu1 %1916  ;;  %v5120_v36 = vld [vmem:[#allocation2 + $0xd0] sm:$0xff] }
 0x18d   : > { %1986 = vst.msk [vmem:[#allocation3 + $0xd8] sm:$0xff] %vm1958_vm9, %v1917_v27 }
 0x18e   : > { %v2056_v63 = vpop.permute.xlu0 %2055 }
 0x18f   : > { %2152 = vst.msk [vmem:[#allocation3] sm:$0xff] %vm2151_vm8, %v2056_v63  ;;  %2073 = vrot.lane.b32.xlu2 %v2641_v39, %s4221_s1  ;;  %v2644_v39 = vld [vmem:[#allocation2 + $0x78] sm:$0xff] }
 0x190   : > { %2377 = vst.msk [vmem:[#allocation3] sm:$0xff] %vm2376_vm10, %v2281_v51  ;;  %v2013_v51 = vld [vmem:[#allocation2 + $0xc8] sm:$0xff] }
 0x191   : > { %v2924_v52 = vpop.permute.xlu2 %2923 }
 0x192   : > { %2298 = vrot.lane.b32.xlu1 %v2225_v17, %s4222_s21  ;;  %v2656_v17 = vld [vmem:[#allocation2 + $0xd8] sm:$0xff] }
 0x194   : > { %2523 = vrot.lane.b32.xlu0 %v4622_v56, %s4223_s22  ;;  %v2058_v14 = vpop.permute.xlu1 %2057 }
 0x195   : > { %2153 = vst.msk [vmem:[#allocation3 + $0x8] sm:$0xff] %vm2151_vm8, %v2058_v14 }
 0x196   : > { %v2283_v8 = vpop.permute.xlu0 %2282 }
 0x197   : > { %2378 = vst.msk [vmem:[#allocation3 + $0x8] sm:$0xff] %vm2376_vm10, %v2283_v8  ;;  %2521 = vrot.lane.b32.xlu2 %v2449_v57, %s4223_s22 }
 0x198   : > { %2603 = vst.msk [vmem:[#allocation3 + $0x8] sm:$0xff] %vm2601_vm11, %v2508_v62  ;;  %v2239_v62 = vmul.f32 %v5811_v60, %v2207_v58  ;;  %v5814_v58 = vld [vmem:[#allocation21_spill] sm:$0xff] }
 0x199   : > { %v2062_v23 = vpop.permute.xlu2 %2061 }
 0x19a   : > { %2714 = vrot.lane.b32.xlu1 %v2642_v22, %s4224_s24  ;;  %2155 = vst.msk [vmem:[#allocation3 + $0x18] sm:$0xff] %vm2151_vm8, %v2062_v23 }
 0x19c   : > { %2939 = vrot.lane.b32.xlu0 %v2835_v54, %s4225_s25  ;;  %v2506_v56 = vpop.permute.xlu1 %2505 }
 0x19d   : > { %2602 = vst.msk [vmem:[#allocation3] sm:$0xff] %vm2601_vm11, %v2506_v56  ;;  %v2849_v56 = vld [vmem:[#allocation2 + $0xd9] sm:$0xff] }
 0x19e   : > { %v2699_v6 = vpop.permute.xlu0 %2698 }
 0x19f   : > { %2795 = vst.msk [vmem:[#allocation3] sm:$0xff] %vm2794_vm12, %v2699_v6  ;;  %2716 = vrot.lane.b32.xlu2 %v2002_v48, %s4224_s24 }
 0x1a0   : > { %3020 = vst.msk [vmem:[#allocation3] sm:$0xff] %vm3019_vm13, %v2924_v52 }
 0x1a1   : > { %v2510_v32 = vpop.permute.xlu2 %2509 }
 0x1a2   : > { %2941 = vrot.lane.b32.xlu1 %v2868_v38, %s4225_s25 }
 0x1a4   : > { %2077 = vrot.lane.b32.xlu0 %v2002_v48, %s4221_s1  ;;  %v2701_v61 = vpop.permute.xlu1 %2700 }
 0x1a5   : > { %2796 = vst.msk [vmem:[#allocation3 + $0x8] sm:$0xff] %vm2794_vm12, %v2701_v61 }
 0x1a6   : > { %v2926_v41 = vpop.permute.xlu0 %2925 }
 0x1a7   : > { %3021 = vst.msk [vmem:[#allocation3 + $0x8] sm:$0xff] %vm3019_vm13, %v2926_v41  ;;  %2075 = vrot.lane.b32.xlu2 %v2642_v22, %s4221_s1  ;;  %v3052_v1 = vld [vmem:[#allocation3] sm:$0xff] }
 0x1a8   : > { %v2422_v41 = vld [vmem:[#allocation2 + $0x8f] sm:$0xff] }
 0x1a9   : > { %v2705_v3 = vpop.permute.xlu2 %2704 }
 0x1aa   : > { %2300 = vrot.lane.b32.xlu1 %v2835_v54, %s4222_s21  ;;  %v2882_v54 = vmul.f32 %v5811_v60, %v5812_v2 }
 0x1ac   : > { %2525 = vrot.lane.b32.xlu0 %v2451_v15, %s4223_s22  ;;  %v2060_v16 = vpop.permute.xlu1 %2059 }
 0x1ad   : > { %2154 = vst.msk [vmem:[#allocation3 + $0x10] sm:$0xff] %vm2151_vm8, %v2060_v16 }
 0x1ae   : > { %v2285_v28 = vpop.permute.xlu0 %2284  ;;  %v3053_v35 = vld [vmem:[#allocation3 + $0x8] sm:$0xff] }
 0x1af   : > { %2379 = vst.msk [vmem:[#allocation3 + $0x10] sm:$0xff] %vm2376_vm10, %v2285_v28  ;;  %v3084_v7 = vpack.c.bf16 %v3053_v35, %v3052_v1  ;;  %2302 = vrot.lane.b32.xlu2 %v2227_v30, %s4222_s21  ;;  %v2646_v35 = vld [vmem:[#allocation2 + $0x88] sm:$0xff] }
 0x1b0   : > { %2604 = vst.msk [vmem:[#allocation3 + $0x10] sm:$0xff] %vm2601_vm11, %v2510_v32  ;;  %v5813_v32 = vld [vmem:[#allocation15_spill] sm:$0xff] }
 0x1b1   : > { %4012 = vmatmul.msk.bf16.vlgmr.msra.gmra.mxu0 %vm3119_vm14, %v3084_v7  ;;  %v2064_v50 = vpop.permute.xlu2 %2063  ;;  %v2229_v61 = vmul.f32 %v5813_v32, %v2838_v37  ;;  %v2209_v37 = vld [vmem:[#allocation2 + $0xe1] sm:$0xff] }
 0x1b2   : > { %2527 = vrot.lane.b32.xlu1 %v2420_v47, %s4223_s22  ;;  %2156 = vst.msk [vmem:[#allocation3 + $0x20] sm:$0xff] %vm2151_vm8, %v2064_v50  ;;  %v2647_v47 = vld [vmem:[#allocation2 + $0x90] sm:$0xff] }
 0x1b4   : > { %2720 = vrot.lane.b32.xlu0 %v5108_v12, %s4224_s24  ;;  %v2287_v24 = vpop.permute.xlu1 %2286 }
 0x1b5   : > { %2380 = vst.msk [vmem:[#allocation3 + $0x18] sm:$0xff] %vm2376_vm10, %v2287_v24 }
 0x1b6   : > { %v2512_v13 = vpop.permute.xlu0 %2511 }
 0x1b7   : > { %2605 = vst.msk [vmem:[#allocation3 + $0x18] sm:$0xff] %vm2601_vm11, %v2512_v13  ;;  %2718 = vrot.lane.b32.xlu2 %v2644_v39, %s4224_s24 }
 0x1b8   : > { %2798 = vst.msk [vmem:[#allocation3 + $0x18] sm:$0xff] %vm2794_vm12, %v2705_v3 }
 0x1b9   : > { %v2291_v43 = vpop.permute.xlu2 %2290 }
 0x1ba   : > { %2099 = vrot.lane.b32.xlu1 %v2013_v51, %s4221_s1  ;;  %v2839_v51 = vld [vmem:[#allocation2 + $0x89] sm:$0xff] }
 0x1bc   : > { %2943 = vrot.lane.b32.xlu0 %v2837_v34, %s4225_s25  ;;  %v2703_v11 = vpop.permute.xlu1 %2702 }
 0x1bd   : > { %2797 = vst.msk [vmem:[#allocation3 + $0x10] sm:$0xff] %vm2794_vm12, %v2703_v11 }
 0x1be   : > { %v2928_v20 = vpop.permute.xlu0 %2927 }
 0x1bf   : > { %3022 = vst.msk [vmem:[#allocation3 + $0x10] sm:$0xff] %vm3019_vm13, %v2928_v20  ;;  %2101 = vrot.lane.b32.xlu2 %v5120_v36, %s4221_s1  ;;  %v2241_v20 = vmul.f32 %v5814_v58, %v2209_v37 }
 0x1c1   : > { %v2707_v44 = vpop.permute.xlu2 %2706 }
 0x1c2   : > { %2945 = vrot.lane.b32.xlu1 %v2870_v40, %s4225_s25 }
 0x1c4   : > { %2326 = vrot.lane.b32.xlu0 %v2239_v62, %s4222_s21  ;;  %v2930_v27 = vpop.permute.xlu1 %2929 }
 0x1c5   : > { %3023 = vst.msk [vmem:[#allocation3 + $0x18] sm:$0xff] %vm3019_vm13, %v2930_v27 }
 0x1c6   : > { %v2066_v63 = vpop.permute.xlu0 %2065  ;;  %v3054_v57 = vld [vmem:[#allocation3 + $0x10] sm:$0xff] }
 0x1c7   : > { %2157 = vst.msk [vmem:[#allocation3 + $0x28] sm:$0xff] %vm2151_vm8, %v2066_v63  ;;  %2324 = vrot.lane.b32.xlu2 %v2206_v25, %s4222_s21  ;;  %v2434_v25 = vld [vmem:[#allocation2 + $0xef] sm:$0xff] }
 0x1c8   : > { %2382 = vst.msk [vmem:[#allocation3 + $0x28] sm:$0xff] %vm2376_vm10, %v2291_v43  ;;  %v2465_v43 = vmul.f32 %v4746_v4, %v4813_v10  ;;  %v2659_v4 = vld [vmem:[#allocation2 + $0xf0] sm:$0xff] }
 0x1c9   : > { %v2934_v21 = vpop.permute.xlu2 %2933 }
 0x1ca   : > { %2549 = vrot.lane.b32.xlu1 %v2463_v31, %s4223_s22  ;;  %v2658_v31 = vld [vmem:[#allocation2 + $0xe8] sm:$0xff] }
 0x1cc   : > { %2742 = vrot.lane.b32.xlu0 %v2656_v17, %s4224_s24  ;;  %v2289_v52 = vpop.permute.xlu1 %2288  ;;  %v3055_v14 = vld [vmem:[#allocation3 + $0x18] sm:$0xff] }
 0x1cd   : > { %2381 = vst.msk [vmem:[#allocation3 + $0x20] sm:$0xff] %vm2376_vm10, %v2289_v52  ;;  %v3085_v8 = vpack.c.bf16 %v3055_v14, %v3054_v57  ;;  %v5198_v52 = vld [vmem:[#allocation2 + $0xf1] sm:$0xff] }
 0x1ce   : > { %v2514_v22 = vpop.permute.xlu0 %2513  ;;  %v2884_v14 = vmul.f32 %v5814_v58, %v5198_v52 }
 0x1cf   : > { %2606 = vst.msk [vmem:[#allocation3 + $0x20] sm:$0xff] %vm2601_vm11, %v2514_v22  ;;  %4013 = vmatmul.msk.bf16.gmra.mxu0 %vm3119_vm14, %v3085_v8  ;;  %2551 = vrot.lane.b32.xlu2 %v4784_v53, %s4223_s22 }
 0x1d0   : > { %2799 = vst.msk [vmem:[#allocation3 + $0x20] sm:$0xff] %vm2794_vm12, %v2707_v44 }
 0x1d1   : > { %v2293_v23 = vpop.permute.xlu2 %2292 }
 0x1d2   : > { %2744 = vrot.lane.b32.xlu1 %v2657_v45, %s4224_s24 }
 0x1d4   : > { %2969 = vrot.lane.b32.xlu0 %v2882_v54, %s4225_s25  ;;  %v2516_v55 = vpop.permute.xlu1 %2515 }
 0x1d5   : > { %2607 = vst.msk [vmem:[#allocation3 + $0x28] sm:$0xff] %vm2601_vm11, %v2516_v55 }
 0x1d6   : > { %v2709_v6 = vpop.permute.xlu0 %2708 }
 0x1d7   : > { %2800 = vst.msk [vmem:[#allocation3 + $0x28] sm:$0xff] %vm2794_vm12, %v2709_v6  ;;  %2967 = vrot.lane.b32.xlu2 %v2849_v56, %s4225_s25 }
 0x1d8   : > { %3025 = vst.msk [vmem:[#allocation3 + $0x28] sm:$0xff] %vm3019_vm13, %v2934_v21  ;;  %v2851_v21 = vld [vmem:[#allocation2 + $0xe9] sm:$0xff] }
 0x1d9   : > { %v2520_v53 = vpop.permute.xlu2 %2519 }
 0x1da   : > { %2079 = vrot.lane.b32.xlu1 %v2644_v39, %s4221_s1 }
 0x1dc   : > { %2304 = vrot.lane.b32.xlu0 %v2837_v34, %s4222_s21  ;;  %v2932_v38 = vpop.permute.xlu1 %2931 }
 0x1dd   : > { %3024 = vst.msk [vmem:[#allocation3 + $0x20] sm:$0xff] %vm3019_vm13, %v2932_v38  ;;  %v4131_v38 = vld [vmem:[%s5731_s7] sm:$0xff] }
 0x1de   : > { %v2068_v48 = vpop.permute.xlu0 %2067 }
 0x1df   : > { %2158 = vst.msk [vmem:[#allocation3 + $0x30] sm:$0xff] %vm2151_vm8, %v2068_v48  ;;  %2081 = vrot.lane.b32.xlu2 %v5108_v12, %s4221_s1  ;;  %v3057_v3 = vld [vmem:[#allocation3 + $0x28] sm:$0xff] }
 0x1e0   : > { %2383 = vst.msk [vmem:[#allocation3 + $0x30] sm:$0xff] %vm2376_vm10, %v2293_v23  ;;  %v2840_v12 = vld [vmem:[#allocation2 + $0x91] sm:$0xff] }
 0x1e1   : > { %v2936_v15 = vpop.permute.xlu2 %2935  ;;  %v2872_v24 = vmul.f32 %v5813_v32, %v2840_v12  ;;  %v2423_v23 = vld [vmem:[#allocation2 + $0x97] sm:$0xff] }
 0x1e2   : > { %2306 = vrot.lane.b32.xlu1 %v2229_v61, %s4222_s21  ;;  %v5221_v48 = vld [vmem:[#allocation2 + $0x98] sm:$0xff] }
 0x1e4   : > { %2531 = vrot.lane.b32.xlu0 %v2422_v41, %s4223_s22  ;;  %v2070_v30 = vpop.permute.xlu1 %2069  ;;  %v3056_v16 = vld [vmem:[#allocation3 + $0x20] sm:$0xff]  ;;  %v2424_v41 = vld [vmem:[#allocation2 + $0x9f] sm:$0xff] }
 0x1e5   : > { %2159 = vst.msk [vmem:[#allocation3 + $0x38] sm:$0xff] %vm2151_vm8, %v2070_v30  ;;  %v3086_v1 = vpack.c.bf16 %v3057_v3, %v3056_v16 }
 0x1e6   : > { %v2295_v28 = vpop.permute.xlu0 %2294 }
 0x1e7   : > { %2384 = vst.msk [vmem:[#allocation3 + $0x38] sm:$0xff] %vm2376_vm10, %v2295_v28  ;;  %4014 = vmatmul.msk.bf16.gmra.mxu0 %vm3119_vm14, %v3086_v1  ;;  %2529 = vrot.lane.b32.xlu2 %v2453_v19, %s4223_s22  ;;  %v5230_v19 = vld [vmem:[#allocation2 + $0xa0] sm:$0xff] }
 0x1e8   : > { %2609 = vst.msk [vmem:[#allocation3 + $0x38] sm:$0xff] %vm2601_vm11, %v2520_v53  ;;  %v2455_v53 = vmul.f32 %v4616_v49, %v2423_v23  ;;  %v5239_v28 = vld [vmem:[#allocation2 + $0x99] sm:$0xff] }
 0x1e9   : > { %v2074_v7 = vpop.permute.xlu2 %2073 }
 0x1ea   : > { %2722 = vrot.lane.b32.xlu1 %v2646_v35, %s4224_s24  ;;  %2161 = vst.msk [vmem:[#allocation3 + $0x48] sm:$0xff] %vm2151_vm8, %v2074_v7 }
 0x1ec   : > { %2103 = vrot.lane.b32.xlu0 %v2656_v17, %s4221_s1  ;;  %v2518_v18 = vpop.permute.xlu1 %2517 }
 0x1ed   : > { %2608 = vst.msk [vmem:[#allocation3 + $0x30] sm:$0xff] %vm2601_vm11, %v2518_v18 }
 0x1ee   : > { %v2711_v50 = vpop.permute.xlu0 %2710 }
 0x1ef   : > { %2801 = vst.msk [vmem:[#allocation3 + $0x30] sm:$0xff] %vm2794_vm12, %v2711_v50  ;;  %2724 = vrot.lane.b32.xlu2 %v2647_v47, %s4224_s24 }
 0x1f0   : > { %3026 = vst.msk [vmem:[#allocation3 + $0x30] sm:$0xff] %vm3019_vm13, %v2936_v15 }
 0x1f1   : > { %v2522_v39 = vpop.permute.xlu2 %2521 }
 0x1f2   : > { %2105 = vrot.lane.b32.xlu1 %v2657_v45, %s4221_s1  ;;  %v5815_v45 = vld [vmem:[#allocation16_spill] sm:$0xff] }
 0x1f3   : > { %v2231_v2 = vmul.f32 %v5815_v45, %v2840_v12 }
 0x1f4   : > { %2949 = vrot.lane.b32.xlu0 %v2872_v24, %s4225_s25  ;;  %v2713_v13 = vpop.permute.xlu1 %2712  ;;  %v5816_v24 = vld [vmem:[#allocation22_spill] sm:$0xff] }
 0x1f5   : > { %2802 = vst.msk [vmem:[#allocation3 + $0x38] sm:$0xff] %vm2794_vm12, %v2713_v13  ;;  %v2435_v13 = vld [vmem:[#allocation2 + $0xf7] sm:$0xff] }
 0x1f6   : > { %v2938_v34 = vpop.permute.xlu0 %2937  ;;  %v2467_v37 = vmul.f32 %v4774_v59, %v2435_v13 }
 0x1f7   : > { %3027 = vst.msk [vmem:[#allocation3 + $0x38] sm:$0xff] %vm3019_vm13, %v2938_v34  ;;  %2947 = vrot.lane.b32.xlu2 %v2839_v51, %s4225_s25  ;;  %v3058_v60 = vld [vmem:[#allocation3 + $0x30] sm:$0xff] }
 0x1f8   : > { %v5260_v34 = vld [vmem:[#allocation2 + $0xff] sm:$0xff] }
 0x1f9   : > { %v2717_v11 = vpop.permute.xlu2 %2716 }
 0x1fa   : > { %2328 = vrot.lane.b32.xlu1 %v2849_v56, %s4222_s21  ;;  %v4132_v56 = vld [vmem:[%s5731_s7 + $0x8] sm:$0xff] }
 0x1fb   : > { %3387 = vmatpush.bf16.msra.mxu1 %v4132_v56  ;;  %4148 = vmatpush.bf16.msra.mxu2 %v4132_v56  ;;  %v5817_v56 = vld [vmem:[#allocation17_spill] sm:$0xff] }
 0x1fc   : > { %2553 = vrot.lane.b32.xlu0 %v2465_v43, %s4223_s22  ;;  %v2072_v40 = vpop.permute.xlu1 %2071 }
 0x1fd   : > { %2160 = vst.msk [vmem:[#allocation3 + $0x40] sm:$0xff] %vm2151_vm8, %v2072_v40 }
 0x1fe   : > { %v2297_v62 = vpop.permute.xlu0 %2296  ;;  %v3059_v44 = vld [vmem:[#allocation3 + $0x38] sm:$0xff] }
 0x1ff   : > { %2385 = vst.msk [vmem:[#allocation3 + $0x40] sm:$0xff] %vm2376_vm10, %v2297_v62  ;;  %v3087_v27 = vpack.c.bf16 %v3059_v44, %v3058_v60  ;;  %2330 = vrot.lane.b32.xlu2 %v2241_v20, %s4222_s21  ;;  %3388 = vmatpush.bf16.msra.mxu1 %v4131_v38  ;;  %v5270_v62 = vld [vmem:[#allocation2 + $0xf8] sm:$0xff] }
 0x200   : > { %2610 = vst.msk [vmem:[#allocation3 + $0x40] sm:$0xff] %vm2601_vm11, %v2522_v39  ;;  %4149 = vmatpush.bf16.msra.mxu2 %v4131_v38  ;;  %v2243_v39 = vmul.f32 %v5816_v24, %v5198_v52 }
 0x201   : > { %4015 = vmatmul.msk.bf16.gmra.mxu0 %vm3119_vm14, %v3087_v27  ;;  %v2076_v10 = vpop.permute.xlu2 %2075  ;;  %v5274_v27 = vld [vmem:[#allocation2 + $0xf9] sm:$0xff] }
 0x202   : > { %2555 = vrot.lane.b32.xlu1 %v2434_v25, %s4223_s22  ;;  %2162 = vst.msk [vmem:[#allocation3 + $0x50] sm:$0xff] %vm2151_vm8, %v2076_v10  ;;  %v5279_v10 = vld [vmem:[#allocation2 + $0x101] sm:$0xff] }
 0x204   : > { %2748 = vrot.lane.b32.xlu0 %v2659_v4, %s4224_s24  ;;  %v2299_v63 = vpop.permute.xlu1 %2298 }
 0x205   : > { %2386 = vst.msk [vmem:[#allocation3 + $0x48] sm:$0xff] %vm2376_vm10, %v2299_v63 }
 0x206   : > { %v2524_v17 = vpop.permute.xlu0 %2523 }
 0x207   : > { %2611 = vst.msk [vmem:[#allocation3 + $0x48] sm:$0xff] %vm2601_vm11, %v2524_v17  ;;  %2746 = vrot.lane.b32.xlu2 %v2658_v31, %s4224_s24 }
 0x208   : > { %2804 = vst.msk [vmem:[#allocation3 + $0x48] sm:$0xff] %vm2794_vm12, %v2717_v11 }
 0x209   : > { %v2303_v57 = vpop.permute.xlu2 %2302 }
 0x20a   : > { %2971 = vrot.lane.b32.xlu1 %v2851_v21, %s4225_s25 }
 0x20c   : > { %2083 = vrot.lane.b32.xlu0 %v2646_v35, %s4221_s1  ;;  %v2715_v8 = vpop.permute.xlu1 %2714  ;;  %v5242_v35 = vld [vmem:[#allocation2 + $0xa1] sm:$0xff] }
 0x20d   : > { %2803 = vst.msk [vmem:[#allocation3 + $0x40] sm:$0xff] %vm2794_vm12, %v2715_v8  ;;  %v2874_v18 = vmul.f32 %v5815_v45, %v5242_v35 }
 0x20e   : > { %v2940_v22 = vpop.permute.xlu0 %2939 }
 0x20f   : > { %3028 = vst.msk [vmem:[#allocation3 + $0x40] sm:$0xff] %vm3019_vm13, %v2940_v22  ;;  %2973 = vrot.lane.b32.xlu2 %v2884_v14, %s4225_s25  ;;  %v2886_v14 = vmul.f32 %v5816_v24, %v5279_v10  ;;  %v610_v22 = vld [vmem:[%s4346_s20 + $0xf8] sm:$0xff] }
 0x210   : > { %642 = vst.msk [vmem:[#allocation2 + $0x110] sm:$0xff] %vm572_vm0, %v610_v22  ;;  %v5336_v24 = vld [vmem:[#allocation2 + $0xb1] sm:$0xff] }
 0x211   : > { %v2719_v54 = vpop.permute.xlu2 %2718  ;;  %v2876_v13 = vmul.f32 %v5817_v56, %v5336_v24 }
 0x212   : > { %2085 = vrot.lane.b32.xlu1 %v2647_v47, %s4221_s1 }
 0x214   : > { %2310 = vrot.lane.b32.xlu0 %v2231_v2, %s4222_s21  ;;  %v2942_v55 = vpop.permute.xlu1 %2941  ;;  %v2425_v2 = vld [vmem:[#allocation2 + $0xa7] sm:$0xff] }
 0x215   : > { %3029 = vst.msk [vmem:[#allocation3 + $0x48] sm:$0xff] %vm3019_vm13, %v2942_v55  ;;  %v2457_v23 = vmul.f32 %v4652_v29, %v2425_v2  ;;  %v2426_v29 = vld [vmem:[#allocation2 + $0xaf] sm:$0xff] }
 0x216   : > { %v2078_v6 = vpop.permute.xlu0 %2077  ;;  %v3060_v61 = vld [vmem:[#allocation3 + $0x40] sm:$0xff] }
 0x217   : > { %2163 = vst.msk [vmem:[#allocation3 + $0x58] sm:$0xff] %vm2151_vm8, %v2078_v6  ;;  %2308 = vrot.lane.b32.xlu2 %v2839_v51, %s4222_s21  ;;  %v5258_v51 = vld [vmem:[%s5730_s6] ss:$0 sm:$0xff]  ;;  %v2233_v6 = vmul.f32 %v5817_v56, %v5242_v35  ;;  %v5320_v35 = vld [vmem:[#allocation2 + $0xb0] sm:$0xff] }
 0x218   : > { %2388 = vst.msk [vmem:[#allocation3 + $0x58] sm:$0xff] %vm2376_vm10, %v2303_v57  ;;  %v5377_v22 = vld [vmem:[#allocation2 + $0x110] sm:$0xff] }
 0x219   : > { %v2102_v32 = vpop.permute.xlu2 %2101 }
 0x21a   : > { %2533 = vrot.lane.b32.xlu1 %v2455_v53, %s4223_s22  ;;  %2175 = vst.msk [vmem:[#allocation3 + $0xb8] sm:$0xff] %vm2151_vm8, %v2102_v32 }
 0x21c   : > { %2726 = vrot.lane.b32.xlu0 %v5221_v48, %s4224_s24  ;;  %v2301_v49 = vpop.permute.xlu1 %2300  ;;  %v3061_v33 = vld [vmem:[#allocation3 + $0x48] sm:$0xff] }
 0x21d   : > { %2387 = vst.msk [vmem:[#allocation3 + $0x50] sm:$0xff] %vm2376_vm10, %v2301_v49  ;;  %v3088_v15 = vpack.c.bf16 %v3061_v33, %v3060_v61  ;;  %v5311_v33 = vld [vmem:[#allocation2 + $0xa8] sm:$0xff] }
 0x21e   : > { %v2526_v3 = vpop.permute.xlu0 %2525 }
 0x21f   : > { %2612 = vst.msk [vmem:[#allocation3 + $0x50] sm:$0xff] %vm2601_vm11, %v2526_v3  ;;  %4016 = vmatmul.msk.bf16.gmra.mxu0 %vm3119_vm14, %v3088_v15  ;;  %2535 = vrot.lane.b32.xlu2 %v2424_v41, %s4223_s22 }
 0x220   : > { %2805 = vst.msk [vmem:[#allocation3 + $0x50] sm:$0xff] %vm2794_vm12, %v2719_v54 }
 0x221   : > { %v2325_v30 = vpop.permute.xlu2 %2324 }
 0x222   : > { %2728 = vrot.lane.b32.xlu1 %v5230_v19, %s4224_s24 }
 0x224   : > { %2109 = vrot.lane.b32.xlu0 %v2659_v4, %s4221_s1  ;;  %v2528_v16 = vpop.permute.xlu1 %2527 }
 0x225   : > { %2613 = vst.msk [vmem:[#allocation3 + $0x58] sm:$0xff] %vm2601_vm11, %v2528_v16 }
 0x226   : > { %v2721_v1 = vpop.permute.xlu0 %2720 }
 0x227   : > { %2806 = vst.msk [vmem:[#allocation3 + $0x58] sm:$0xff] %vm2794_vm12, %v2721_v1  ;;  %2107 = vrot.lane.b32.xlu2 %v2658_v31, %s4221_s1 }
 0x229   : > { %v2552_v7 = vpop.permute.xlu2 %2551 }
 0x22a   : > { %2951 = vrot.lane.b32.xlu1 %v5239_v28, %s4225_s25 }
 0x22c   : > { %2332 = vrot.lane.b32.xlu0 %v2851_v21, %s4222_s21  ;;  %v2100_v47 = vpop.permute.xlu1 %2099  ;;  %v2661_v21 = vld [vmem:[#allocation2 + $0x100] sm:$0xff] }
 0x22d   : > { %2174 = vst.msk [vmem:[#allocation3 + $0xb0] sm:$0xff] %vm2151_vm8, %v2100_v47 }
 0x22e   : > { %v2944_v12 = vpop.permute.xlu0 %2943  ;;  %v3184_v50 = vpop.f32.mrf.mxu0  ;;  %2399 = vst.msk [vmem:[#allocation3 + $0xb0] sm:$0xff] %vm2376_vm10, %v2325_v30 }
 0x22f   : > { %3030 = vst.msk [vmem:[#allocation3 + $0x50] sm:$0xff] %vm3019_vm13, %v2944_v12  ;;  %2953 = vrot.lane.b32.xlu2 %v2874_v18, %s4225_s25  ;;  %v3185_v58 = vadd.f32 %v5258_v51, %v3184_v50  ;;  %v5332_v50 = vld [vmem:[#allocation2 + $0xa9] sm:$0xff] }
 0x231   : > { %v2968_v43 = vpop.permute.xlu2 %2967  ;;  %v3264_v59 = vmax.f32 %v3185_v58, 0.0  ;;  %v5350_v58 = vld [vmem:[#allocation2 + $0x107] sm:$0xff] }
 0x232   : > { %2334 = vrot.lane.b32.xlu1 %v2243_v39, %s4222_s21 }
 0x234   : > { %2559 = vrot.lane.b32.xlu0 %v5260_v34, %s4223_s22  ;;  %v2946_v11 = vpop.permute.xlu1 %2945 }
 0x235   : > { %3031 = vst.msk [vmem:[#allocation3 + $0x58] sm:$0xff] %vm3019_vm13, %v2946_v11  ;;  %v2245_v11 = vmul.f32 %v4818_v5, %v5279_v10 }
 0x236   : > { %v2327_v20 = vpop.permute.xlu0 %2326  ;;  %v3186_v40 = vpop.f32.mrf.mxu0  ;;  %v3062_v31 = vld [vmem:[#allocation3 + $0x50] sm:$0xff] }
 0x237   : > { %2400 = vst.msk [vmem:[#allocation3 + $0xb8] sm:$0xff] %vm2376_vm10, %v2327_v20  ;;  %v3187_v60 = vadd.f32 %v5258_v51, %v3186_v40  ;;  %2557 = vrot.lane.b32.xlu2 %v2467_v37, %s4223_s22  ;;  %v5352_v20 = vld [vmem:[#allocation2 + $0x10f] sm:$0xff] }
 0x238   : > { %2625 = vst.msk [vmem:[#allocation3 + $0xb8] sm:$0xff] %vm2601_vm11, %v2552_v7 }
 0x239   : > { %v3265_v44 = vmax.f32 %v3187_v60, 0.0  ;;  %v2082_v25 = vpop.permute.xlu2 %2081 }
 0x23a   : > { %2750 = vrot.lane.b32.xlu1 %v5270_v62, %s4224_s24  ;;  %2165 = vst.msk [vmem:[#allocation3 + $0x68] sm:$0xff] %vm2151_vm8, %v2082_v25 }
 0x23b   : > { %v3296_v4 = vpack.c.bf16 %v3265_v44, %v3264_v59 }
 0x23c   : > { %2975 = vrot.lane.b32.xlu0 %v5274_v27, %s4225_s25  ;;  %v2550_v63 = vpop.permute.xlu1 %2549  ;;  %v3063_v17 = vld [vmem:[#allocation3 + $0x58] sm:$0xff] }
 0x23d   : > { %2624 = vst.msk [vmem:[#allocation3 + $0xb0] sm:$0xff] %vm2601_vm11, %v2550_v63  ;;  %4036 = vmatmul.msk.bf16.vlgmr.msra.gmra.mxu1 %vm3332_vm15, %v3296_v4  ;;  %v3089_v52 = vpack.c.bf16 %v3063_v17, %v3062_v31 }
 0x23e   : > { %v2743_v57 = vpop.permute.xlu0 %2742 }
 0x23f   : > { %2817 = vst.msk [vmem:[#allocation3 + $0xb0] sm:$0xff] %vm2794_vm12, %v2743_v57  ;;  %4017 = vmatmul.msk.bf16.gmra.mxu0 %vm3119_vm14, %v3089_v52  ;;  %2752 = vrot.lane.b32.xlu2 %v2661_v21, %s4224_s24  ;;  %v5368_v52 = vld [vmem:[#allocation2 + $0x109] sm:$0xff] }
 0x240   : > { %3042 = vst.msk [vmem:[#allocation3 + $0xb0] sm:$0xff] %vm3019_vm13, %v2968_v43 }
 0x241   : > { %v2530_v8 = vpop.permute.xlu2 %2529 }
 0x242   : > { %2977 = vrot.lane.b32.xlu1 %v2886_v14, %s4225_s25  ;;  %v5373_v14 = vld [vmem:[#allocation2 + $0x111] sm:$0xff] }
 0x243   : > { %v2888_v2 = vmul.f32 %v4818_v5, %v5373_v14 }
 0x244   : > { %2089 = vrot.lane.b32.xlu0 %v5230_v19, %s4221_s1  ;;  %v2745_v45 = vpop.permute.xlu1 %2744 }
 0x245   : > { %2818 = vst.msk [vmem:[#allocation3 + $0xb8] sm:$0xff] %vm2794_vm12, %v2745_v45 }
 0x246   : > { %v2970_v54 = vpop.permute.xlu0 %2969 }
 0x247   : > { %3043 = vst.msk [vmem:[#allocation3 + $0xb8] sm:$0xff] %vm3019_vm13, %v2970_v54  ;;  %2087 = vrot.lane.b32.xlu2 %v5221_v48, %s4221_s1  ;;  %v3074_v32 = vld [vmem:[#allocation3 + $0xb0] sm:$0xff] }
 0x249   : > { %v2725_v55 = vpop.permute.xlu2 %2724 }
 0x24a   : > { %2312 = vrot.lane.b32.xlu1 %v5239_v28, %s4222_s21 }
 0x24c   : > { %2537 = vrot.lane.b32.xlu0 %v2457_v23, %s4223_s22  ;;  %v2080_v53 = vpop.permute.xlu1 %2079  ;;  %v3189_v38 = vpop.f32.mrf.mxu0 }
 0x24d   : > { %2164 = vst.msk [vmem:[#allocation3 + $0x60] sm:$0xff] %vm2151_vm8, %v2080_v53  ;;  %v3190_v15 = vadd.f32 %v5258_v51, %v3189_v38 }
 0x24e   : > { %v2305_v49 = vpop.permute.xlu0 %2304  ;;  %v3075_v61 = vld [vmem:[#allocation3 + $0xb8] sm:$0xff] }
 0x24f   : > { %2389 = vst.msk [vmem:[#allocation3 + $0x60] sm:$0xff] %vm2376_vm10, %v2305_v49  ;;  %v3095_v48 = vpack.c.bf16 %v3075_v61, %v3074_v32  ;;  %2314 = vrot.lane.b32.xlu2 %v2233_v6, %s4222_s21  ;;  %v3266_v1 = vmax.f32 %v3190_v15, 0.0  ;;  %v5818_v32 = vld [vmem:[#allocation18_spill] sm:$0xff] }
 0x250   : > { %2614 = vst.msk [vmem:[#allocation3 + $0x60] sm:$0xff] %vm2601_vm11, %v2530_v8  ;;  %v2235_v49 = vmul.f32 %v5818_v32, %v5336_v24  ;;  %v5426_v24 = vld [vmem:[#allocation2 + $0xc1] sm:$0xff] }
 0x251   : > { %4023 = vmatmul.msk.bf16.vlgmr.msra.gmra.mxu3 %vm3119_vm14, %v3095_v48  ;;  %v2948_v41 = vpop.permute.xlu2 %2947 }
 0x252   : > { %2539 = vrot.lane.b32.xlu1 %v2426_v29, %s4223_s22 }
 0x254   : > { %2730 = vrot.lane.b32.xlu0 %v5311_v33, %s4224_s24  ;;  %v2307_v3 = vpop.permute.xlu1 %2306  ;;  %v3191_v19 = vpop.f32.mrf.mxu0 }
 0x255   : > { %2390 = vst.msk [vmem:[#allocation3 + $0x68] sm:$0xff] %vm2376_vm10, %v2307_v3  ;;  %v3192_v30 = vadd.f32 %v5258_v51, %v3191_v19  ;;  %v2428_v3 = vld [vmem:[#allocation2 + $0xbf] sm:$0xff] }
 0x256   : > { %v2532_v16 = vpop.permute.xlu0 %2531 }
 0x257   : > { %v3267_v28 = vmax.f32 %v3192_v30, 0.0  ;;  %2615 = vst.msk [vmem:[#allocation3 + $0x68] sm:$0xff] %vm2601_vm11, %v2532_v16  ;;  %1920 = vrot.lane.b32.xlu2 %v5260_v34, %s4220_s19 }
 0x258   : > { %2808 = vst.msk [vmem:[#allocation3 + $0x68] sm:$0xff] %vm2794_vm12, %v2725_v55  ;;  %v2427_v55 = vld [vmem:[#allocation2 + $0xb7] sm:$0xff] }
 0x259   : > { %v3297_v7 = vpack.c.bf16 %v3267_v28, %v3266_v1  ;;  %v2331_v18 = vpop.permute.xlu2 %2330  ;;  %v2459_v5 = vmul.f32 %v4667_v46, %v2427_v55  ;;  %v1828_v28 = vmul.f32 %v4827_v42, %v5350_v58 }
 0x25a   : > { %2732 = vrot.lane.b32.xlu1 %v5320_v35, %s4224_s24 }
 0x25b   : > { %4037 = vmatmul.msk.bf16.gmra.mxu1 %vm3332_vm15, %v3297_v7 }
 0x25c   : > { %2113 = vrot.lane.b32.xlu0 %v2661_v21, %s4221_s1  ;;  %v2723_v47 = vpop.permute.xlu1 %2722  ;;  %v5363_v21 = vld [vmem:[#allocation2 + $0x108] sm:$0xff] }
 0x25d   : > { %2807 = vst.msk [vmem:[#allocation3 + $0x60] sm:$0xff] %vm2794_vm12, %v2723_v47 }
 0x25e   : > { %v2104_v12 = vpop.permute.xlu0 %2103  ;;  %3032 = vst.msk [vmem:[#allocation3 + $0x60] sm:$0xff] %vm3019_vm13, %v2948_v41 }
 0x25f   : > { %2176 = vst.msk [vmem:[#allocation3 + $0xc0] sm:$0xff] %vm2151_vm8, %v2104_v12  ;;  %2111 = vrot.lane.b32.xlu2 %v5270_v62, %s4221_s1  ;;  %v2469_v62 = vmul.f32 %v4811_v0, %v5350_v58  ;;  %v2439_v58 = vld [vmem:[#allocation2 + $0x117] sm:$0xff] }
 0x261   : > { %v2747_v39 = vpop.permute.xlu2 %2746 }
 0x262   : > { %2955 = vrot.lane.b32.xlu1 %v5332_v50, %s4225_s25 }
 0x264   : > { %2336 = vrot.lane.b32.xlu0 %v5274_v27, %s4222_s21  ;;  %v2106_v34 = vpop.permute.xlu1 %2105  ;;  %v3194_v43 = vpop.f32.mrf.mxu0 }
 0x265   : > { %2177 = vst.msk [vmem:[#allocation3 + $0xc8] sm:$0xff] %vm2151_vm8, %v2106_v34  ;;  %v3195_v60 = vadd.f32 %v5258_v51, %v3194_v43  ;;  %v3064_v27 = vld [vmem:[#allocation3 + $0x60] sm:$0xff] }
 0x266   : > { %v2950_v37 = vpop.permute.xlu0 %2949  ;;  %2402 = vst.msk [vmem:[#allocation3 + $0xc8] sm:$0xff] %vm2376_vm10, %v2331_v18  ;;  %v5416_v18 = vld [vmem:[#allocation2 + $0xb8] sm:$0xff] }
 0x267   : > { %3033 = vst.msk [vmem:[#allocation3 + $0x68] sm:$0xff] %vm3019_vm13, %v2950_v37  ;;  %2957 = vrot.lane.b32.xlu2 %v2876_v13, %s4225_s25  ;;  %v3268_v63 = vmax.f32 %v3195_v60, 0.0  ;;  %v2878_v13 = vmul.f32 %v5818_v32, %v5426_v24 }
 0x269   : > { %v2974_v40 = vpop.permute.xlu2 %2973 }
 0x26a   : > { %2338 = vrot.lane.b32.xlu1 %v2245_v11, %s4222_s21  ;;  %v5437_v11 = vld [vmem:[#allocation2 + $0xb9] sm:$0xff] }
 0x26c   : > { %2563 = vrot.lane.b32.xlu0 %v5352_v20, %s4223_s22  ;;  %v2329_v59 = vpop.permute.xlu1 %2328  ;;  %v3196_v44 = vpop.f32.mrf.mxu0 }
 0x26d   : > { %2401 = vst.msk [vmem:[#allocation3 + $0xc0] sm:$0xff] %vm2376_vm10, %v2329_v59  ;;  %v3197_v25 = vadd.f32 %v5258_v51, %v3196_v44  ;;  %v2247_v44 = vmul.f32 %v4838_v9, %v5373_v14 }
 0x26e   : > { %v2554_v4 = vpop.permute.xlu0 %2553  ;;  %v3065_v10 = vld [vmem:[#allocation3 + $0x68] sm:$0xff] }
 0x26f   : > { %v3269_v31 = vmax.f32 %v3197_v25, 0.0  ;;  %2626 = vst.msk [vmem:[#allocation3 + $0xc0] sm:$0xff] %vm2601_vm11, %v2554_v4  ;;  %v3090_v17 = vpack.c.bf16 %v3065_v10, %v3064_v27  ;;  %2561 = vrot.lane.b32.xlu2 %v2469_v62, %s4223_s22 }
 0x270   : > { %2819 = vst.msk [vmem:[#allocation3 + $0xc0] sm:$0xff] %vm2794_vm12, %v2747_v39 }
 0x271   : > { %v3298_v0 = vpack.c.bf16 %v3269_v31, %v3268_v63  ;;  %4018 = vmatmul.msk.bf16.gmra.mxu0 %vm3119_vm14, %v3090_v17  ;;  %v2309_v57 = vpop.permute.xlu2 %2308 }
 0x272   : > { %2754 = vrot.lane.b32.xlu1 %v5363_v21, %s4224_s24 }
 0x273   : > { %4038 = vmatmul.msk.bf16.gmra.mxu1 %vm3332_vm15, %v3298_v0 }
 0x274   : > { %2979 = vrot.lane.b32.xlu0 %v5368_v52, %s4225_s25  ;;  %v2556_v8 = vpop.permute.xlu1 %2555 }
 0x275   : > { %2627 = vst.msk [vmem:[#allocation3 + $0xc8] sm:$0xff] %vm2601_vm11, %v2556_v8  ;;  %v2664_v8 = vld [vmem:[#allocation2 + $0x118] sm:$0xff] }
 0x276   : > { %v2749_v45 = vpop.permute.xlu0 %2748 }
 0x277   : > { %2820 = vst.msk [vmem:[#allocation3 + $0xc8] sm:$0xff] %vm2794_vm12, %v2749_v45  ;;  %2756 = vrot.lane.b32.xlu2 %v5377_v22, %s4224_s24  ;;  %v2857_v45 = vld [vmem:[#allocation2 + $0x119] sm:$0xff] }
 0x278   : > { %3045 = vst.msk [vmem:[#allocation3 + $0xc8] sm:$0xff] %vm3019_vm13, %v2974_v40  ;;  %v2471_v40 = vmul.f32 %v4827_v42, %v2439_v58 }
 0x279   : > { %v2536_v54 = vpop.permute.xlu2 %2535 }
 0x27a   : > { %2981 = vrot.lane.b32.xlu1 %v2888_v2, %s4225_s25  ;;  %v2858_v2 = vld [vmem:[#allocation2 + $0x121] sm:$0xff] }
 0x27c   : > { %2093 = vrot.lane.b32.xlu0 %v5320_v35, %s4221_s1  ;;  %v2972_v23 = vpop.permute.xlu1 %2971 }
 0x27d   : > { %3044 = vst.msk [vmem:[#allocation3 + $0xc0] sm:$0xff] %vm3019_vm13, %v2972_v23  ;;  %v2890_v23 = vmul.f32 %v4838_v9, %v2858_v2  ;;  %v5819_v9 = vld [vmem:[#allocation19_spill] sm:$0xff] }
 0x27e   : > { %v2084_v56 = vpop.permute.xlu0 %2083  ;;  %v3199_v6 = vpop.f32.mrf.mxu0 }
 0x27f   : > { %2166 = vst.msk [vmem:[#allocation3 + $0x70] sm:$0xff] %vm2151_vm8, %v2084_v56  ;;  %2091 = vrot.lane.b32.xlu2 %v5311_v33, %s4221_s1  ;;  %v3077_v38 = vld [vmem:[#allocation3 + $0xc8] sm:$0xff]  ;;  %v3200_v29 = vadd.f32 %v5258_v51, %v3199_v6  ;;  %v5474_v6 = vld [vmem:[%s5732_s8] ss:$0 sm:$0xff] }
 0x280   : > { %2391 = vst.msk [vmem:[#allocation3 + $0x70] sm:$0xff] %vm2376_vm10, %v2309_v57 }
 0x281   : > { %v2108_v53 = vpop.permute.xlu2 %2107  ;;  %v3270_v19 = vmax.f32 %v3200_v29, 0.0 }
 0x282   : > { %2316 = vrot.lane.b32.xlu1 %v5332_v50, %s4222_s21  ;;  %2178 = vst.msk [vmem:[#allocation3 + $0xd0] sm:$0xff] %vm2151_vm8, %v2108_v53  ;;  %v5423_v50 = vld [vmem:[#allocation2 + $0xc0] sm:$0xff] }
 0x284   : > { %2541 = vrot.lane.b32.xlu0 %v2459_v5, %s4223_s22  ;;  %v2086_v61 = vpop.permute.xlu1 %2085  ;;  %v3076_v48 = vld [vmem:[#allocation3 + $0xc0] sm:$0xff]  ;;  %v2237_v5 = vmul.f32 %v5819_v9, %v5426_v24 }
 0x285   : > { %2167 = vst.msk [vmem:[#allocation3 + $0x78] sm:$0xff] %vm2151_vm8, %v2086_v61  ;;  %v3096_v33 = vpack.c.bf16 %v3077_v38, %v3076_v48 }
 0x286   : > { %v2311_v46 = vpop.permute.xlu0 %2310  ;;  %v3201_v41 = vpop.f32.mrf.mxu0 }
 0x287   : > { %2392 = vst.msk [vmem:[#allocation3 + $0x78] sm:$0xff] %vm2376_vm10, %v2311_v46  ;;  %v3202_v15 = vadd.f32 %v5258_v51, %v3201_v41  ;;  %4024 = vmatmul.msk.bf16.gmra.mxu3 %vm3119_vm14, %v3096_v33  ;;  %2318 = vrot.lane.b32.xlu2 %v2235_v49, %s4222_s21  ;;  %v2429_v49 = vld [vmem:[#allocation2 + $0xc7] sm:$0xff] }
 0x288   : > { %2617 = vst.msk [vmem:[#allocation3 + $0x78] sm:$0xff] %vm2601_vm11, %v2536_v54 }
 0x289   : > { %v3271_v30 = vmax.f32 %v3202_v15, 0.0  ;;  %v2954_v16 = vpop.permute.xlu2 %2953 }
 0x28a   : > { %2543 = vrot.lane.b32.xlu1 %v2428_v3, %s4223_s22  ;;  %v2461_v3 = vmul.f32 %v4696_v26, %v2429_v49 }
 0x28b   : > { %v3299_v1 = vpack.c.bf16 %v3271_v30, %v3270_v19  ;;  %v2654_v19 = vld [vmem:[#allocation2 + $0xc8] sm:$0xff] }
 0x28c   : > { %1924 = vrot.lane.b32.xlu0 %v5352_v20, %s4220_s19  ;;  %v2534_v35 = vpop.permute.xlu1 %2533 }
 0x28d   : > { %2616 = vst.msk [vmem:[#allocation3 + $0x70] sm:$0xff] %vm2601_vm11, %v2534_v35  ;;  %4039 = vmatmul.msk.bf16.gmra.mxu1 %vm3332_vm15, %v3299_v1 }
 0x28e   : > { %v2727_v7 = vpop.permute.xlu0 %2726 }
 0x28f   : > { %2809 = vst.msk [vmem:[#allocation3 + $0x70] sm:$0xff] %vm2794_vm12, %v2727_v7  ;;  %1922 = vrot.lane.b32.xlu2 %v1828_v28, %s4220_s19  ;;  %v2430_v7 = vld [vmem:[#allocation2 + $0xcf] sm:$0xff] }
 0x291   : > { %v2558_v47 = vpop.permute.xlu2 %2557 }
 0x292   : > { %2734 = vrot.lane.b32.xlu1 %v5416_v18, %s4224_s24 }
 0x294   : > { %2115 = vrot.lane.b32.xlu0 %v5363_v21, %s4221_s1  ;;  %v2729_v12 = vpop.permute.xlu1 %2728  ;;  %v2440_v21 = vld [vmem:[#allocation2 + $0x11f] sm:$0xff] }
 0x295   : > { %2810 = vst.msk [vmem:[#allocation3 + $0x78] sm:$0xff] %vm2794_vm12, %v2729_v12  ;;  %v2848_v12 = vld [vmem:[#allocation2 + $0xd1] sm:$0xff] }
 0x296   : > { %v2110_v39 = vpop.permute.xlu0 %2109  ;;  %3035 = vst.msk [vmem:[#allocation3 + $0x78] sm:$0xff] %vm3019_vm13, %v2954_v16 }
 0x297   : > { %2179 = vst.msk [vmem:[#allocation3 + $0xd8] sm:$0xff] %vm2151_vm8, %v2110_v39  ;;  %2736 = vrot.lane.b32.xlu2 %v5423_v50, %s4224_s24 }
 0x299   : > { %v2753_v34 = vpop.permute.xlu2 %2752 }
 0x29a   : > { %2117 = vrot.lane.b32.xlu1 %v5377_v22, %s4221_s1 }
 0x29c   : > { %2961 = vrot.lane.b32.xlu0 %v2878_v13, %s4225_s25  ;;  %v2952_v43 = vpop.permute.xlu1 %2951  ;;  %v3204_v37 = vpop.f32.mrf.mxu0  ;;  %v2880_v13 = vmul.f32 %v5819_v9, %v2848_v12 }
 0x29d   : > { %3034 = vst.msk [vmem:[#allocation3 + $0x70] sm:$0xff] %vm3019_vm13, %v2952_v43  ;;  %v3067_v62 = vld [vmem:[#allocation3 + $0x78] sm:$0xff]  ;;  %v3205_v59 = vadd.f32 %v5258_v51, %v3204_v37 }
 0x29e   : > { %v2333_v20 = vpop.permute.xlu0 %2332 }
 0x29f   : > { %2403 = vst.msk [vmem:[#allocation3 + $0xd0] sm:$0xff] %vm2376_vm10, %v2333_v20  ;;  %2959 = vrot.lane.b32.xlu2 %v5437_v11, %s4225_s25  ;;  %v3272_v31 = vmax.f32 %v3205_v59, 0.0 }
 0x2a0   : > { %2628 = vst.msk [vmem:[#allocation3 + $0xd0] sm:$0xff] %vm2601_vm11, %v2558_v47 }
 0x2a1   : > { %v2088_v60 = vpop.permute.xlu2 %2087 }
 0x2a2   : > { %2340 = vrot.lane.b32.xlu1 %v5368_v52, %s4222_s21  ;;  %2168 = vst.msk [vmem:[#allocation3 + $0x80] sm:$0xff] %vm2151_vm8, %v2088_v60  ;;  %v2665_v52 = vld [vmem:[#allocation2 + $0x120] sm:$0xff] }
 0x2a4   : > { %2565 = vrot.lane.b32.xlu0 %v2471_v40, %s4223_s22  ;;  %v2335_v27 = vpop.permute.xlu1 %2334  ;;  %v3206_v25 = vpop.f32.mrf.mxu0  ;;  %v3066_v4 = vld [vmem:[#allocation3 + $0x70] sm:$0xff] }
 0x2a5   : > { %2404 = vst.msk [vmem:[#allocation3 + $0xd8] sm:$0xff] %vm2376_vm10, %v2335_v27  ;;  %v3207_v42 = vadd.f32 %v5258_v51, %v3206_v25  ;;  %v3091_v10 = vpack.c.bf16 %v3067_v62, %v3066_v4 }
 0x2a6   : > { %v2560_v63 = vpop.permute.xlu0 %2559 }
 0x2a7   : > { %v3273_v17 = vmax.f32 %v3207_v42, 0.0  ;;  %2629 = vst.msk [vmem:[#allocation3 + $0xd8] sm:$0xff] %vm2601_vm11, %v2560_v63  ;;  %4019 = vmatmul.msk.bf16.gmra.mxu0 %vm3119_vm14, %v3091_v10  ;;  %2342 = vrot.lane.b32.xlu2 %v2247_v44, %s4222_s21 }
 0x2a8   : > { %2822 = vst.msk [vmem:[#allocation3 + $0xd8] sm:$0xff] %vm2794_vm12, %v2753_v34 }
 0x2a9   : > { %v3300_v0 = vpack.c.bf16 %v3273_v17, %v3272_v31  ;;  %v2315_v57 = vpop.permute.xlu2 %2314 }
 0x2aa   : > { %2567 = vrot.lane.b32.xlu1 %v2440_v21, %s4223_s22 }
 0x2ab   : > { %4040 = vmatmul.msk.bf16.gmra.mxu1 %vm3332_vm15, %v3300_v0 }
 0x2ac   : > { %2760 = vrot.lane.b32.xlu0 %v2665_v52, %s4224_s24  ;;  %v2751_v14 = vpop.permute.xlu1 %2750 }
 0x2ad   : > { %2821 = vst.msk [vmem:[#allocation3 + $0xd0] sm:$0xff] %vm2794_vm12, %v2751_v14 }
 0x2ae   : > { %v2976_v22 = vpop.permute.xlu0 %2975 }
 0x2af   : > { %3046 = vst.msk [vmem:[#allocation3 + $0xd0] sm:$0xff] %vm3019_vm13, %v2976_v22  ;;  %2758 = vrot.lane.b32.xlu2 %v2664_v8, %s4224_s24 }
 0x2b1   : > { %v1921_v54 = vpop.permute.xlu2 %1920 }
 0x2b2   : > { %2983 = vrot.lane.b32.xlu1 %v2857_v45, %s4225_s25  ;;  %1988 = vst.msk [vmem:[#allocation3 + $0xe8] sm:$0xff] %vm1958_vm9, %v1921_v54 }
 0x2b4   : > { %2095 = vrot.lane.b32.xlu0 %v5416_v18, %s4221_s1  ;;  %v2978_v55 = vpop.permute.xlu1 %2977 }
 0x2b5   : > { %3047 = vst.msk [vmem:[#allocation3 + $0xd8] sm:$0xff] %vm3019_vm13, %v2978_v55 }
 0x2b6   : > { %v2090_v56 = vpop.permute.xlu0 %2089  ;;  %v3078_v29 = vld [vmem:[#allocation3 + $0xd0] sm:$0xff] }
 0x2b7   : > { %2169 = vst.msk [vmem:[#allocation3 + $0x88] sm:$0xff] %vm2151_vm8, %v2090_v56  ;;  %2985 = vrot.lane.b32.xlu2 %v2890_v23, %s4225_s25 }
 0x2b8   : > { %2394 = vst.msk [vmem:[#allocation3 + $0x88] sm:$0xff] %vm2376_vm10, %v2315_v57 }
 0x2b9   : > { %v2112_v53 = vpop.permute.xlu2 %2111 }
 0x2ba   : > { %v3390_v38 = vpop.f32.mrf.mxu1  ;;  %2097 = vrot.lane.b32.xlu1 %v5423_v50, %s4221_s1  ;;  %2180 = vst.msk [vmem:[#allocation3 + $0xe0] sm:$0xff] %vm2151_vm8, %v2112_v53 }
 0x2bb   : > { %v3391_v32 = vadd.f32 %v5474_v6, %v3390_v38 }
 0x2bc   : > { %2322 = vrot.lane.b32.xlu0 %v2237_v5, %s4222_s21  ;;  %v2313_v61 = vpop.permute.xlu1 %2312  ;;  %v3209_v48 = vpop.f32.mrf.mxu0  ;;  %v3079_v33 = vld [vmem:[#allocation3 + $0xd8] sm:$0xff] }
 0x2bd   : > { %v3470_v46 = vmax.f32 %v3391_v32, 0.0  ;;  %2393 = vst.msk [vmem:[#allocation3 + $0x80] sm:$0xff] %vm2376_vm10, %v2313_v61  ;;  %v3097_v41 = vpack.c.bf16 %v3079_v33, %v3078_v29  ;;  %v3210_v1 = vadd.f32 %v5258_v51, %v3209_v48 }
 0x2be   : > { %v2538_v15 = vpop.permute.xlu0 %2537 }
 0x2bf   : > { %3502 = vst.msk [vmem:[#allocation4] sm:$0xff] %vm3332_vm15, %v3470_v46  ;;  %4025 = vmatmul.msk.bf16.gmra.mxu3 %vm3119_vm14, %v3097_v41  ;;  %2320 = vrot.lane.b32.xlu2 %v5437_v11, %s4222_s21  ;;  %v3274_v24 = vmax.f32 %v3210_v1, 0.0  ;;  %v2847_v11 = vld [vmem:[#allocation2 + $0xc9] sm:$0xff] }
 0x2c0   : > { %2618 = vst.msk [vmem:[#allocation3 + $0x80] sm:$0xff] %vm2601_vm11, %v2538_v15 }
 0x2c1   : > { %v2958_v30 = vpop.permute.xlu2 %2957 }
 0x2c2   : > { %v3392_v16 = vpop.f32.mrf.mxu1  ;;  %2545 = vrot.lane.b32.xlu1 %v2461_v3, %s4223_s22 }
 0x2c3   : > { %v3393_v28 = vadd.f32 %v5474_v6, %v3392_v16 }
 0x2c4   : > { %2738 = vrot.lane.b32.xlu0 %v2654_v19, %s4224_s24  ;;  %v2540_v26 = vpop.permute.xlu1 %2539  ;;  %v3211_v35 = vpop.f32.mrf.mxu0 }
 0x2c5   : > { %v3471_v18 = vmax.f32 %v3393_v28, 0.0  ;;  %2619 = vst.msk [vmem:[#allocation3 + $0x88] sm:$0xff] %vm2601_vm11, %v2540_v26  ;;  %v3212_v47 = vadd.f32 %v5258_v51, %v3211_v35 }
 0x2c6   : > { %v2731_v50 = vpop.permute.xlu0 %2730 }
 0x2c7   : > { %3503 = vst.msk [vmem:[#allocation4 + $0x8] sm:$0xff] %vm3332_vm15, %v3471_v18  ;;  %v3275_v39 = vmax.f32 %v3212_v47, 0.0  ;;  %2547 = vrot.lane.b32.xlu2 %v2430_v7, %s4223_s22  ;;  %s4212_s22 = smov 0  }
 0x2c8   : > { %2811 = vst.msk [vmem:[#allocation3 + $0x80] sm:$0xff] %vm2794_vm12, %v2731_v50 }
 0x2c9   : > { %v3301_v34 = vpack.c.bf16 %v3275_v39, %v3274_v24  ;;  %v2562_v43 = vpop.permute.xlu2 %2561 }
 0x2ca   : > { %2740 = vrot.lane.b32.xlu1 %v5120_v36, %s4224_s24 }
 0x2cb   : > { %4041 = vmatmul.msk.bf16.gmra.mxu1 %vm3332_vm15, %v3301_v34 }
 0x2cc   : > { %2965 = vrot.lane.b32.xlu0 %v2880_v13, %s4225_s25  ;;  %v2733_v37 = vpop.permute.xlu1 %2732 }
 0x2cd   : > { %2812 = vst.msk [vmem:[#allocation3 + $0x88] sm:$0xff] %vm2794_vm12, %v2733_v37 }
 0x2ce   : > { %v2114_v58 = vpop.permute.xlu0 %2113  ;;  %3037 = vst.msk [vmem:[#allocation3 + $0x88] sm:$0xff] %vm3019_vm13, %v2958_v30 }
 0x2cf   : > { %2181 = vst.msk [vmem:[#allocation3 + $0xe8] sm:$0xff] %vm2151_vm8, %v2114_v58  ;;  %2963 = vrot.lane.b32.xlu2 %v2847_v11, %s4225_s25 }
 0x2d1   : > { %v2757_v20 = vpop.permute.xlu2 %2756 }
 0x2d4   : > { %v3239_v40 = vpop.f32.mrf.mxu3  ;;  %v2956_v60 = vpop.permute.xlu1 %2955 }
 0x2d5   : > { %3036 = vst.msk [vmem:[#allocation3 + $0x80] sm:$0xff] %vm3019_vm13, %v2956_v60  ;;  %v3069_v27 = vld [vmem:[#allocation3 + $0x88] sm:$0xff]  ;;  %v3240_v25 = vadd.f32 %v5258_v51, %v3239_v40 }
 0x2d6   : > { %v2337_v36 = vpop.permute.xlu0 %2336 }
 0x2d7   : > { %2405 = vst.msk [vmem:[#allocation3 + $0xe0] sm:$0xff] %vm2376_vm10, %v2337_v36  ;;  %v3286_v0 = vmax.f32 %v3240_v25, 0.0 }
 0x2d8   : > { %v3395_v62 = vpop.f32.mrf.mxu1  ;;  %2630 = vst.msk [vmem:[#allocation3 + $0xe0] sm:$0xff] %vm2601_vm11, %v2562_v43 }
 0x2d9   : > { %v3396_v59 = vadd.f32 %v5474_v6, %v3395_v62  ;;  %v2092_v44 = vpop.permute.xlu2 %2091 }
 0x2da   : > { %2170 = vst.msk [vmem:[#allocation3 + $0x90] sm:$0xff] %vm2151_vm8, %v2092_v44 }
 0x2db   : > { %v3472_v4 = vmax.f32 %v3396_v59, 0.0 }
 0x2dc   : > { %v3241_v42 = vpop.f32.mrf.mxu3  ;;  %v2339_v10 = vpop.permute.xlu1 %2338  ;;  %v3068_v63 = vld [vmem:[#allocation3 + $0x80] sm:$0xff] }
 0x2dd   : > { %3504 = vst.msk [vmem:[#allocation4 + $0x10] sm:$0xff] %vm3332_vm15, %v3472_v4  ;;  %v3242_v31 = vadd.f32 %v5258_v51, %v3241_v42  ;;  %v3092_v17 = vpack.c.bf16 %v3069_v27, %v3068_v63 }
 0x2de   : > { %2406 = vst.msk [vmem:[#allocation3 + $0xe8] sm:$0xff] %vm2376_vm10, %v2339_v10  ;;  %v2564_v21 = vpop.permute.xlu0 %2563 }
 0x2df   : > { %v3287_v52 = vmax.f32 %v3242_v31, 0.0  ;;  %2631 = vst.msk [vmem:[#allocation3 + $0xe8] sm:$0xff] %vm2601_vm11, %v2564_v21  ;;  %4020 = vmatmul.msk.bf16.gmra.mxu0 %vm3119_vm14, %v3092_v17 }
 0x2e0   : > { %v3397_v57 = vpop.f32.mrf.mxu1  ;;  %2824 = vst.msk [vmem:[#allocation3 + $0xe8] sm:$0xff] %vm2794_vm12, %v2757_v20 }
 0x2e1   : > { %v3307_v14 = vpack.c.bf16 %v3287_v52, %v3286_v0  ;;  %v3398_v8 = vadd.f32 %v5474_v6, %v3397_v57  ;;  %v2319_v22 = vpop.permute.xlu2 %2318 }
 0x2e3   : > { %v3473_v45 = vmax.f32 %v3398_v8, 0.0  ;;  %4047 = vmatmul.msk.bf16.vlgmr.msra.gmra.mxu2 %vm3332_vm15, %v3307_v14 }
 0x2e4   : > { %v2755_v2 = vpop.permute.xlu1 %2754 }
 0x2e5   : > { %3505 = vst.msk [vmem:[#allocation4 + $0x18] sm:$0xff] %vm3332_vm15, %v3473_v45 }
 0x2e6   : > { %2823 = vst.msk [vmem:[#allocation3 + $0xe0] sm:$0xff] %vm2794_vm12, %v2755_v2  ;;  %v2980_v54 = vpop.permute.xlu0 %2979 }
 0x2e7   : > { %3048 = vst.msk [vmem:[#allocation3 + $0xe0] sm:$0xff] %vm3019_vm13, %v2980_v54 }
 0x2e9   : > { %v1923_v23 = vpop.permute.xlu2 %1922 }
 0x2ea   : > { %1989 = vst.msk [vmem:[#allocation3 + $0xf0] sm:$0xff] %vm1958_vm9, %v1923_v23 }
 0x2ec   : > { %v2982_v55 = vpop.permute.xlu1 %2981 }
 0x2ed   : > { %3049 = vst.msk [vmem:[#allocation3 + $0xe8] sm:$0xff] %vm3019_vm13, %v2982_v55 }
 0x2ee   : > { %v2094_v56 = vpop.permute.xlu0 %2093  ;;  %v3214_v9 = vpop.f32.mrf.mxu0  ;;  %v3080_v61 = vld [vmem:[#allocation3 + $0xe0] sm:$0xff] }
 0x2ef   : > { %2171 = vst.msk [vmem:[#allocation3 + $0x98] sm:$0xff] %vm2151_vm8, %v2094_v56  ;;  %v3215_v29 = vadd.f32 %v5258_v51, %v3214_v9 }
 0x2f0   : > { %v3400_v5 = vpop.f32.mrf.mxu1  ;;  %2396 = vst.msk [vmem:[#allocation3 + $0x98] sm:$0xff] %vm2376_vm10, %v2319_v22 }
 0x2f1   : > { %v3401_v53 = vadd.f32 %v5474_v6, %v3400_v5  ;;  %v2737_v38 = vpop.permute.xlu2 %2736  ;;  %v3276_v19 = vmax.f32 %v3215_v29, 0.0 }
 0x2f3   : > { %v3474_v32 = vmax.f32 %v3401_v53, 0.0 }
 0x2f4   : > { %v2317_v49 = vpop.permute.xlu1 %2316  ;;  %v3081_v48 = vld [vmem:[#allocation3 + $0xe8] sm:$0xff] }
 0x2f5   : > { %3506 = vst.msk [vmem:[#allocation4 + $0x20] sm:$0xff] %vm3332_vm15, %v3474_v32  ;;  %v3098_v33 = vpack.c.bf16 %v3081_v48, %v3080_v61 }
 0x2f6   : > { %2395 = vst.msk [vmem:[#allocation3 + $0x90] sm:$0xff] %vm2376_vm10, %v2317_v49  ;;  %v2542_v46 = vpop.permute.xlu0 %2541  ;;  %v3216_v41 = vpop.f32.mrf.mxu0 }
 0x2f7   : > { %2620 = vst.msk [vmem:[#allocation3 + $0x90] sm:$0xff] %vm2601_vm11, %v2542_v46  ;;  %v3217_v15 = vadd.f32 %v5258_v51, %v3216_v41  ;;  %4026 = vmatmul.msk.bf16.gmra.mxu3 %vm3119_vm14, %v3098_v33 }
 0x2f8   : > { %v3402_v3 = vpop.f32.mrf.mxu1 }
 0x2f9   : > { %v3277_v30 = vmax.f32 %v3217_v15, 0.0  ;;  %v3403_v16 = vadd.f32 %v5474_v6, %v3402_v3  ;;  %v2960_v26 = vpop.permute.xlu2 %2959 }
 0x2fb   : > { %v3302_v1 = vpack.c.bf16 %v3277_v30, %v3276_v19  ;;  %v3475_v28 = vmax.f32 %v3403_v16, 0.0 }
 0x2fc   : > { %v2544_v35 = vpop.permute.xlu1 %2543 }
 0x2fd   : > { %3507 = vst.msk [vmem:[#allocation4 + $0x28] sm:$0xff] %vm3332_vm15, %v3475_v28  ;;  %4042 = vmatmul.msk.bf16.gmra.mxu1 %vm3332_vm15, %v3302_v1 }
 0x2fe   : > { %2621 = vst.msk [vmem:[#allocation3 + $0x98] sm:$0xff] %vm2601_vm11, %v2544_v35  ;;  %v1925_v7 = vpop.permute.xlu0 %1924 }
 0x2ff   : > { %1990 = vst.msk [vmem:[#allocation3 + $0xf8] sm:$0xff] %vm1958_vm9, %v1925_v7 }
 0x300   : > { %2814 = vst.msk [vmem:[#allocation3 + $0x98] sm:$0xff] %vm2794_vm12, %v2737_v38 }
 0x301   : > { %v2343_v47 = vpop.permute.xlu2 %2342 }
 0x304   : > { %v2735_v18 = vpop.permute.xlu1 %2734 }
 0x305   : > { %2813 = vst.msk [vmem:[#allocation3 + $0x90] sm:$0xff] %vm2794_vm12, %v2735_v18 }
 0x306   : > { %v2116_v12 = vpop.permute.xlu0 %2115  ;;  %3038 = vst.msk [vmem:[#allocation3 + $0x90] sm:$0xff] %vm3019_vm13, %v2960_v26 }
 0x307   : > { %2182 = vst.msk [vmem:[#allocation3 + $0xf0] sm:$0xff] %vm2151_vm8, %v2116_v12 }
 0x309   : > { %v2759_v37 = vpop.permute.xlu2 %2758 }
 0x30a   : > { %v3244_v50 = vpop.f32.mrf.mxu3  ;;  %v3405_v24 = vpop.f32.mrf.mxu1 }
 0x30b   : > { %v3406_v39 = vadd.f32 %v5474_v6, %v3405_v24  ;;  %v3245_v11 = vadd.f32 %v5258_v51, %v3244_v50 }
 0x30c   : > { %v2118_v13 = vpop.permute.xlu1 %2117 }
 0x30d   : > { %v3476_v34 = vmax.f32 %v3406_v39, 0.0  ;;  %2183 = vst.msk [vmem:[#allocation3 + $0xf8] sm:$0xff] %vm2151_vm8, %v2118_v13  ;;  %v3288_v62 = vmax.f32 %v3245_v11, 0.0  ;;  %v3070_v27 = vld [vmem:[#allocation3 + $0x90] sm:$0xff] }
 0x30e   : > { %v2962_v43 = vpop.permute.xlu0 %2961  ;;  %2408 = vst.msk [vmem:[#allocation3 + $0xf8] sm:$0xff] %vm2376_vm10, %v2343_v47 }
 0x30f   : > { %3508 = vst.msk [vmem:[#allocation4 + $0x30] sm:$0xff] %vm3332_vm15, %v3476_v34 }
 0x310   : > { %3039 = vst.msk [vmem:[#allocation3 + $0x98] sm:$0xff] %vm3019_vm13, %v2962_v43 }
 0x311   : > { %v2986_v63 = vpop.permute.xlu2 %2985 }
 0x312   : > { %v3246_v58 = vpop.f32.mrf.mxu3  ;;  %v3407_v20 = vpop.f32.mrf.mxu1 }
 0x313   : > { %v3247_v40 = vadd.f32 %v5258_v51, %v3246_v58  ;;  %v3408_v60 = vadd.f32 %v5474_v6, %v3407_v20 }
 0x314   : > { %v2341_v36 = vpop.permute.xlu1 %2340 }
 0x315   : > { %v3289_v59 = vmax.f32 %v3247_v40, 0.0  ;;  %v3477_v44 = vmax.f32 %v3408_v60, 0.0  ;;  %2407 = vst.msk [vmem:[#allocation3 + $0xf0] sm:$0xff] %vm2376_vm10, %v2341_v36 }
 0x316   : > { %v2566_v25 = vpop.permute.xlu0 %2565 }
 0x317   : > { %v3308_v4 = vpack.c.bf16 %v3289_v59, %v3288_v62  ;;  %3509 = vst.msk [vmem:[#allocation4 + $0x38] sm:$0xff] %vm3332_vm15, %v3477_v44  ;;  %v3071_v42 = vld [vmem:[#allocation3 + $0x98] sm:$0xff] }
 0x318   : > { %2632 = vst.msk [vmem:[#allocation3 + $0xf0] sm:$0xff] %vm2601_vm11, %v2566_v25  ;;  %v3093_v10 = vpack.c.bf16 %v3071_v42, %v3070_v27 }
 0x319   : > { %4048 = vmatmul.msk.bf16.gmra.mxu2 %vm3332_vm15, %v3308_v4  ;;  %2825 = vst.msk [vmem:[#allocation3 + $0xf0] sm:$0xff] %vm2794_vm12, %v2759_v37  ;;  %v2321_v21 = vpop.permute.xlu2 %2320 }
 0x31a   : > { %4021 = vmatmul.msk.bf16.gmra.mxu0 %vm3119_vm14, %v3093_v10 }
 0x31c   : > { %v2568_v31 = vpop.permute.xlu1 %2567 }
 0x31d   : > { %2633 = vst.msk [vmem:[#allocation3 + $0xf8] sm:$0xff] %vm2601_vm11, %v2568_v31 }
 0x31e   : > { %v2761_v17 = vpop.permute.xlu0 %2760 }
 0x31f   : > { %2826 = vst.msk [vmem:[#allocation3 + $0xf8] sm:$0xff] %vm2794_vm12, %v2761_v17 }
 0x320   : > { %3051 = vst.msk [vmem:[#allocation3 + $0xf8] sm:$0xff] %vm3019_vm13, %v2986_v63  ;;  %v4180_v63 = vld [vmem:[%s5730_s6] ss:$0 sm:$0xff] }
 0x321   : > { %v2548_v54 = vpop.permute.xlu2 %2547 }
 0x324   : > { %v2984_v0 = vpop.permute.xlu1 %2983  ;;  %v3219_v52 = vpop.f32.mrf.mxu0 }
 0x325   : > { %3050 = vst.msk [vmem:[#allocation3 + $0xf0] sm:$0xff] %vm3019_vm13, %v2984_v0  ;;  %v3220_v45 = vadd.f32 %v5258_v51, %v3219_v52 }
 0x326   : > { %v2096_v57 = vpop.permute.xlu0 %2095 }
 0x327   : > { %2172 = vst.msk [vmem:[#allocation3 + $0xa0] sm:$0xff] %vm2151_vm8, %v2096_v57  ;;  %v3083_v22 = vld [vmem:[#allocation3 + $0xf8] sm:$0xff]  ;;  %v3278_v38 = vmax.f32 %v3220_v45, 0.0 }
 0x328   : > { %v3410_v14 = vpop.f32.mrf.mxu1  ;;  %2397 = vst.msk [vmem:[#allocation3 + $0xa0] sm:$0xff] %vm2376_vm10, %v2321_v21 }
 0x329   : > { %v3411_v8 = vadd.f32 %v5474_v6, %v3410_v14  ;;  %v2964_v46 = vpop.permute.xlu2 %2963 }
 0x32b   : > { %v3478_v2 = vmax.f32 %v3411_v8, 0.0 }
 0x32c   : > { %v3221_v23 = vpop.f32.mrf.mxu0  ;;  %v2098_v55 = vpop.permute.xlu1 %2097  ;;  %v3082_v56 = vld [vmem:[#allocation3 + $0xf0] sm:$0xff] }
 0x32d   : > { %3510 = vst.msk [vmem:[#allocation4 + $0x40] sm:$0xff] %vm3332_vm15, %v3478_v2  ;;  %v3222_v9 = vadd.f32 %v5258_v51, %v3221_v23  ;;  %v3099_v5 = vpack.c.bf16 %v3083_v22, %v3082_v56 }
 0x32e   : > { %2173 = vst.msk [vmem:[#allocation3 + $0xa8] sm:$0xff] %vm2151_vm8, %v2098_v55  ;;  %v2323_v53 = vpop.permute.xlu0 %2322 }
 0x32f   : > { %v3279_v32 = vmax.f32 %v3222_v9, 0.0  ;;  %2398 = vst.msk [vmem:[#allocation3 + $0xa8] sm:$0xff] %vm2376_vm10, %v2323_v53  ;;  %4027 = vmatmul.msk.bf16.gmra.mxu3 %vm3119_vm14, %v3099_v5 }
 0x330   : > { %v3412_v49 = vpop.f32.mrf.mxu1  ;;  %2623 = vst.msk [vmem:[#allocation3 + $0xa8] sm:$0xff] %vm2601_vm11, %v2548_v54 }
 0x331   : > { %v3303_v61 = vpack.c.bf16 %v3279_v32, %v3278_v38  ;;  %v3413_v48 = vadd.f32 %v5474_v6, %v3412_v49 }
 0x333   : > { %v3479_v29 = vmax.f32 %v3413_v48, 0.0  ;;  %4043 = vmatmul.msk.bf16.gmra.mxu1 %vm3332_vm15, %v3303_v61 }
 0x334   : > { %v2546_v33 = vpop.permute.xlu1 %2545 }
 0x335   : > { %3511 = vst.msk [vmem:[#allocation4 + $0x48] sm:$0xff] %vm3332_vm15, %v3479_v29 }
 0x336   : > { %2622 = vst.msk [vmem:[#allocation3 + $0xa0] sm:$0xff] %vm2601_vm11, %v2546_v33  ;;  %v2739_v41 = vpop.permute.xlu0 %2738 }
 0x337   : > { %2815 = vst.msk [vmem:[#allocation3 + $0xa0] sm:$0xff] %vm2794_vm12, %v2739_v41 }
 0x338   : > { %3040 = vst.msk [vmem:[#allocation3 + $0xa0] sm:$0xff] %vm3019_vm13, %v2964_v46 }
 0x33c   : > { %v2741_v15 = vpop.permute.xlu1 %2740 }
 0x33d   : > { %2816 = vst.msk [vmem:[#allocation3 + $0xa8] sm:$0xff] %vm2794_vm12, %v2741_v15 }
 0x33e   : > { %v2966_v3 = vpop.permute.xlu0 %2965 }
 0x33f   : > { %3041 = vst.msk [vmem:[#allocation3 + $0xa8] sm:$0xff] %vm3019_vm13, %v2966_v3  ;;  %v3072_v30 = vld [vmem:[#allocation3 + $0xa0] sm:$0xff] }
 0x342   : > { %v3249_v19 = vpop.f32.mrf.mxu3 }
 0x343   : > { %v3250_v26 = vadd.f32 %v5258_v51, %v3249_v19 }
 0x345   : > { %v3290_v12 = vmax.f32 %v3250_v26, 0.0 }
 0x346   : > { %v3073_v16 = vld [vmem:[#allocation3 + $0xa8] sm:$0xff] }
 0x347   : > { %v3094_v1 = vpack.c.bf16 %v3073_v16, %v3072_v30 }
 0x348   : > { %v3415_v28 = vpop.f32.mrf.mxu1 }
 0x349   : > { %v3416_v35 = vadd.f32 %v5474_v6, %v3415_v28  ;;  %4022 = vmatmul.msk.bf16.gmra.mxu0 %vm3119_vm14, %v3094_v1 }
 0x34a   : > { %v3251_v7 = vpop.f32.mrf.mxu3 }
 0x34b   : > { %v3480_v18 = vmax.f32 %v3416_v35, 0.0  ;;  %v3252_v47 = vadd.f32 %v5258_v51, %v3251_v7 }
 0x34d   : > { %3512 = vst.msk [vmem:[#allocation4 + $0x50] sm:$0xff] %vm3332_vm15, %v3480_v18  ;;  %v3291_v50 = vmax.f32 %v3252_v47, 0.0 }
 0x34f   : > { %v3309_v24 = vpack.c.bf16 %v3291_v50, %v3290_v12 }
 0x350   : > { %v3417_v39 = vpop.f32.mrf.mxu1 }
 0x351   : > { %v3418_v13 = vadd.f32 %v5474_v6, %v3417_v39  ;;  %4049 = vmatmul.msk.bf16.gmra.mxu2 %vm3332_vm15, %v3309_v24 }
 0x353   : > { %v3481_v34 = vmax.f32 %v3418_v13, 0.0 }
 0x355   : > { %3513 = vst.msk [vmem:[#allocation4 + $0x58] sm:$0xff] %vm3332_vm15, %v3481_v34 }
 0x35c   : > { %v3224_v43 = vpop.f32.mrf.mxu0 }
 0x35d   : > { %v3225_v37 = vadd.f32 %v5258_v51, %v3224_v43 }
 0x35f   : > { %v3280_v40 = vmax.f32 %v3225_v37, 0.0 }
 0x364   : > { %v3226_v11 = vpop.f32.mrf.mxu0 }
 0x365   : > { %v3227_v58 = vadd.f32 %v5258_v51, %v3226_v11 }
 0x366   : > { %v3445_v20 = vpop.f32.mrf.mxu2 }
 0x367   : > { %v3281_v60 = vmax.f32 %v3227_v58, 0.0  ;;  %v3446_v36 = vadd.f32 %v5474_v6, %v3445_v20 }
 0x369   : > { %v3304_v62 = vpack.c.bf16 %v3281_v60, %v3280_v40  ;;  %v3492_v59 = vmax.f32 %v3446_v36, 0.0 }
 0x36b   : > { %3524 = vst.msk [vmem:[#allocation4 + $0xb0] sm:$0xff] %vm3332_vm15, %v3492_v59  ;;  %4044 = vmatmul.msk.bf16.gmra.mxu1 %vm3332_vm15, %v3304_v62 }
 0x36e   : > { %v3447_v44 = vpop.f32.mrf.mxu2 }
 0x36f   : > { %v3448_v27 = vadd.f32 %v5474_v6, %v3447_v44 }
 0x371   : > { %v3493_v25 = vmax.f32 %v3448_v27, 0.0 }
 0x373   : > { %3525 = vst.msk [vmem:[#allocation4 + $0xb8] sm:$0xff] %vm3332_vm15, %v3493_v25 }
 0x37a   : > { %v3254_v4 = vpop.f32.mrf.mxu3  ;;  %v3420_v42 = vpop.f32.mrf.mxu1 }
 0x37b   : > { %v3421_v51 = vadd.f32 %v5474_v6, %v3420_v42  ;;  %v3255_v31 = vadd.f32 %v4180_v63, %v3254_v4 }
 0x37d   : > { %v3482_v10 = vmax.f32 %v3421_v51, 0.0  ;;  %v3292_v57 = vmax.f32 %v3255_v31, 0.0 }
 0x37f   : > { %3514 = vst.msk [vmem:[#allocation4 + $0x60] sm:$0xff] %vm3332_vm15, %v3482_v10 }
 0x382   : > { %v3256_v17 = vpop.f32.mrf.mxu3  ;;  %v3422_v21 = vpop.f32.mrf.mxu1 }
 0x383   : > { %v3257_v0 = vadd.f32 %v4180_v63, %v3256_v17  ;;  %v3423_v52 = vadd.f32 %v5474_v6, %v3422_v21 }
 0x385   : > { %v3293_v14 = vmax.f32 %v3257_v0, 0.0  ;;  %v3483_v8 = vmax.f32 %v3423_v52, 0.0 }
 0x387   : > { %v3310_v22 = vpack.c.bf16 %v3293_v14, %v3292_v57  ;;  %3515 = vst.msk [vmem:[#allocation4 + $0x68] sm:$0xff] %vm3332_vm15, %v3483_v8 }
 0x389   : > { %4050 = vmatmul.msk.bf16.gmra.mxu2 %vm3332_vm15, %v3310_v22 }
 0x397   : > { %v3229_v45 = vpop.f32.mrf.mxu0 }
 0x398   : > { %v3230_v23 = vadd.f32 %v4180_v63, %v3229_v45 }
 0x39a   : > { %v3282_v5 = vmax.f32 %v3230_v23, 0.0 }
 0x39c   : > { %v3450_v2 = vpop.f32.mrf.mxu2 }
 0x39d   : > { %v3451_v54 = vadd.f32 %v5474_v6, %v3450_v2 }
 0x39f   : > { %v3494_v55 = vmax.f32 %v3451_v54, 0.0  ;;  %v3231_v56 = vpop.f32.mrf.mxu0 }
 0x3a0   : > { %v3232_v9 = vadd.f32 %v4180_v63, %v3231_v56 }
 0x3a1   : > { %3526 = vst.msk [vmem:[#allocation4 + $0xc0] sm:$0xff] %vm3332_vm15, %v3494_v55 }
 0x3a2   : > { %v3283_v53 = vmax.f32 %v3232_v9, 0.0 }
 0x3a4   : > { %v3305_v38 = vpack.c.bf16 %v3283_v53, %v3282_v5  ;;  %v3452_v32 = vpop.f32.mrf.mxu2 }
 0x3a5   : > { %v3453_v49 = vadd.f32 %v5474_v6, %v3452_v32 }
 0x3a6   : > { %4045 = vmatmul.msk.bf16.gmra.mxu1 %vm3332_vm15, %v3305_v38 }
 0x3a7   : > { %v3495_v61 = vmax.f32 %v3453_v49, 0.0 }
 0x3a9   : > { %3527 = vst.msk [vmem:[#allocation4 + $0xc8] sm:$0xff] %vm3332_vm15, %v3495_v61 }
 0x3b0   : > { %v3425_v48 = vpop.f32.mrf.mxu1 }
 0x3b1   : > { %v3426_v29 = vadd.f32 %v5474_v6, %v3425_v48 }
 0x3b2   : > { %v3259_v33 = vpop.f32.mrf.mxu3 }
 0x3b3   : > { %v3484_v46 = vmax.f32 %v3426_v29, 0.0  ;;  %v3260_v15 = vadd.f32 %v4180_v63, %v3259_v33 }
 0x3b5   : > { %3516 = vst.msk [vmem:[#allocation4 + $0x70] sm:$0xff] %vm3332_vm15, %v3484_v46  ;;  %v3294_v1 = vmax.f32 %v3260_v15, 0.0 }
 0x3b8   : > { %v3427_v41 = vpop.f32.mrf.mxu1 }
 0x3b9   : > { %v3428_v3 = vadd.f32 %v5474_v6, %v3427_v41 }
 0x3ba   : > { %v3261_v19 = vpop.f32.mrf.mxu3 }
 0x3bb   : > { %v3485_v30 = vmax.f32 %v3428_v3, 0.0  ;;  %v3262_v16 = vadd.f32 %v4180_v63, %v3261_v19 }
 0x3bd   : > { %3517 = vst.msk [vmem:[#allocation4 + $0x78] sm:$0xff] %vm3332_vm15, %v3485_v30  ;;  %v3295_v28 = vmax.f32 %v3262_v16, 0.0 }
 0x3bf   : > { %v3311_v26 = vpack.c.bf16 %v3295_v28, %v3294_v1 }
 0x3c1   : > { %4051 = vmatmul.msk.bf16.gmra.mxu2 %vm3332_vm15, %v3311_v26 }
 0x3c6   : > { %v3234_v35 = vpop.f32.mrf.mxu0 }
 0x3c7   : > { %v3235_v7 = vadd.f32 %v4180_v63, %v3234_v35 }
 0x3c9   : > { %v3284_v12 = vmax.f32 %v3235_v7, 0.0 }
 0x3ce   : > { %v3236_v18 = vpop.f32.mrf.mxu0 }
 0x3cf   : > { %v3237_v47 = vadd.f32 %v4180_v63, %v3236_v18 }
 0x3d1   : > { %v3285_v50 = vmax.f32 %v3237_v47, 0.0 }
 0x3d3   : > { %v3306_v24 = vpack.c.bf16 %v3285_v50, %v3284_v12 }
 0x3d4   : > { %v3455_v39 = vpop.f32.mrf.mxu2 }
 0x3d5   : > { %v3456_v13 = vadd.f32 %v5474_v6, %v3455_v39  ;;  %4046 = vmatmul.msk.bf16.gmra.mxu1 %vm3332_vm15, %v3306_v24 }
 0x3d7   : > { %v3496_v34 = vmax.f32 %v3456_v13, 0.0 }
 0x3d9   : > { %3528 = vst.msk [vmem:[#allocation4 + $0xd0] sm:$0xff] %vm3332_vm15, %v3496_v34 }
 0x3dc   : > { %v3457_v43 = vpop.f32.mrf.mxu2 }
 0x3dd   : > { %v3458_v37 = vadd.f32 %v5474_v6, %v3457_v43 }
 0x3df   : > { %v3497_v11 = vmax.f32 %v3458_v37, 0.0 }
 0x3e1   : > { %3529 = vst.msk [vmem:[#allocation4 + $0xd8] sm:$0xff] %vm3332_vm15, %v3497_v11 }
 0x3e8   : > { %v3430_v58 = vpop.f32.mrf.mxu1 }
 0x3e9   : > { %v3431_v20 = vadd.f32 %v5474_v6, %v3430_v58 }
 0x3eb   : > { %v3486_v40 = vmax.f32 %v3431_v20, 0.0 }
 0x3ed   : > { %3518 = vst.msk [vmem:[#allocation4 + $0x80] sm:$0xff] %vm3332_vm15, %v3486_v40 }
 0x3f0   : > { %v3432_v60 = vpop.f32.mrf.mxu1 }
 0x3f1   : > { %v3433_v36 = vadd.f32 %v5474_v6, %v3432_v60 }
 0x3f3   : > { %v3487_v62 = vmax.f32 %v3433_v36, 0.0 }
 0x3f5   : > { %3519 = vst.msk [vmem:[#allocation4 + $0x88] sm:$0xff] %vm3332_vm15, %v3487_v62 }
 0x40c   : > { %v3460_v59 = vpop.f32.mrf.mxu2 }
 0x40d   : > { %v3461_v44 = vadd.f32 %v5474_v6, %v3460_v59 }
 0x40f   : > { %v3498_v27 = vmax.f32 %v3461_v44, 0.0 }
 0x411   : > { %3530 = vst.msk [vmem:[#allocation4 + $0xe0] sm:$0xff] %vm3332_vm15, %v3498_v27 }
 0x414   : > { %v3462_v25 = vpop.f32.mrf.mxu2 }
 0x415   : > { %v3463_v4 = vadd.f32 %v5474_v6, %v3462_v25 }
 0x417   : > { %v3499_v42 = vmax.f32 %v3463_v4, 0.0 }
 0x419   : > { %3531 = vst.msk [vmem:[#allocation4 + $0xe8] sm:$0xff] %vm3332_vm15, %v3499_v42 }
 0x423   : > { %v3435_v51 = vpop.f32.mrf.mxu1 }
 0x424   : > { %v3436_v10 = vadd.f32 %v5474_v6, %v3435_v51 }
 0x426   : > { %v3488_v63 = vmax.f32 %v3436_v10, 0.0 }
 0x428   : > { %3520 = vst.msk [vmem:[#allocation4 + $0x90] sm:$0xff] %vm3332_vm15, %v3488_v63 }
 0x42b   : > { %v3437_v31 = vpop.f32.mrf.mxu1 }
 0x42c   : > { %v3438_v17 = vadd.f32 %v5474_v6, %v3437_v31 }
 0x42e   : > { %v3489_v21 = vmax.f32 %v3438_v17, 0.0 }
 0x430   : > { %3521 = vst.msk [vmem:[#allocation4 + $0x98] sm:$0xff] %vm3332_vm15, %v3489_v21 }
 0x444   : > { %v3465_v0 = vpop.f32.mrf.mxu2 }
 0x445   : > { %v3466_v52 = vadd.f32 %v5474_v6, %v3465_v0 }
 0x447   : > { %v3500_v57 = vmax.f32 %v3466_v52, 0.0 }
 0x449   : > { %3532 = vst.msk [vmem:[#allocation4 + $0xf0] sm:$0xff] %vm3332_vm15, %v3500_v57 }
 0x44c   : > { %v3467_v14 = vpop.f32.mrf.mxu2 }
 0x44d   : > { %v3468_v8 = vadd.f32 %v5474_v6, %v3467_v14 }
 0x44f   : > { %v3501_v22 = vmax.f32 %v3468_v8, 0.0 }
 0x451   : > { %3533 = vst.msk [vmem:[#allocation4 + $0xf8] sm:$0xff] %vm3332_vm15, %v3501_v22 }
 0x452   : > { %v3440_v45 = vpop.f32.mrf.mxu1 }
 0x453   : > { %v3441_v2 = vadd.f32 %v5474_v6, %v3440_v45 }
 0x455   : > { %v3490_v54 = vmax.f32 %v3441_v2, 0.0 }
 0x457   : > { %3522 = vst.msk [vmem:[#allocation4 + $0xa0] sm:$0xff] %vm3332_vm15, %v3490_v54 }
 0x45a   : > { %v3442_v23 = vpop.f32.mrf.mxu1 }
 0x45b   : > { %v3443_v55 = vadd.f32 %v5474_v6, %v3442_v23 }
 0x45d   : > { %v3491_v56 = vmax.f32 %v3443_v55, 0.0 }
 0x45f   : > { %3523 = vst.msk [vmem:[#allocation4 + $0xa8] sm:$0xff] %vm3332_vm15, %v3491_v56 }
 0x460 LB: >> { %s3540_s24 = sshra.s32 %s4214_s22, 7  ;;  %s3545_s25 = sand.u32 127, %s4214_s22  ;;  %vm3551_vm0 = vcmask 253952   ;;  %s4214_s22 = sphi %s4212_s22, %s3539_s22  }
 0x461   : >> { %s3542_s27 = sadd.s32 %s4327_s29, %s3540_s24  ;;  %s3550_s19 = scalar_lea.vmem [#allocation5], %s4214_s22 }
 0x462   : >> { %s4052_s4 = sshll.u32 %s3542_s27, 7  ;;  %s3539_s22 = sadd.s32 1, %s4214_s22  }
 0x463   : >> { %s3546_s18 = sadd.s32 %s4052_s4, %s3545_s25  ;;  %p3536_p4 = scmp.ge.s32.totalorder %s3539_s22, 16  }
 0x464   : >> { %s3547_s30 = sld [smem:[#allocation7 + %s3546_s18]]  ;;  %v3563_v6 = vld [vmem:[%s5734_s10] sm:$0x1] (%p3536_p4)  ;;  %vm3568_vm1 = vcmask (%p3536_p4), 1040384   ;;  %v4134_v5 = vld [vmem:[%s5733_s9 + $0x8] sm:$0xff] (%p3536_p4)  ;;  %vm3564_vm2 = vcmask (%p3536_p4), 15360  }
 0x465   : > { %v5649_v53 = vld [vmem:[%s4351_s23] sm:$0xff] (%p3536_p4)  ;;  %v3570_v38 = vsel (%p3536_p4), %vm3568_vm1, %v3563_v6, 0  ;;  %v5652_v32 = vld [vmem:[%s4351_s23 + $0x8] sm:$0xff] (%p3536_p4)  ;;  %3607 = vmatpush.bf16.msrb.mxu3 (%p3536_p4), %v4134_v5  ;;  %vm3631_vm3 = vcmask (%p3536_p4), 130048   ;;  %v4141_v27 = vld [vmem:[%s5736_s12 + $0x18] sm:$0xff] (%p3536_p4)  ;;  %v4227_v52 = vmov (%p3536_p4), 0  }
 0x466   : > { %v4133_v49 = vld [vmem:[%s5733_s9] sm:$0xff] (%p3536_p4)  ;;  %3579 = vmatpush.bf16.msrb.mxu2 (%p3536_p4), %v3570_v38  ;;  %v3562_v48 = vpack.c.bf16 (%p3536_p4), %v5652_v32, %v5649_v53  ;;  %v4137_v7 = vld [vmem:[%s5736_s12 + $0x8] sm:$0xff] (%p3536_p4)  ;;  %v4140_v4 = vld [vmem:[%s5736_s12 + $0x10] sm:$0xff] (%p3536_p4)  ;;  %4181 = vset.pattern.permute.xlu0 (%p3536_p4), %v4227_v52 }
 0x467   : > { %v4182_v3 = vld [vmem:[%s5735_s11] ss:$0 sm:$0xff] (%p3536_p4)  ;;  %v4139_v50 = vld [vmem:[%s5737_s13 + $0x8] sm:$0xff] (%p3536_p4)  ;;  %v4143_v42 = vld [vmem:[%s5737_s13 + $0x18] sm:$0xff] (%p3536_p4) }
 0x468   : > { %3538 = sbr.rel (!%p3536_p4) target bundleno = 1120 (0x460), region = 132  ;;  %v4136_v12 = vld [vmem:[%s5736_s12] sm:$0xff] (%p3536_p4)  ;;  %v4142_v51 = vld [vmem:[%s5737_s13 + $0x10] sm:$0xff] (%p3536_p4)  ;;  %v4145_v17 = vld [vmem:[%s5739_s15 + $0x8] sm:$0xff] (%p3536_p4) }
 0x469   : > { %4053 = vmatmul.msk.bf16.vlgmr.msrb.gmra.mxu2 (%p3536_p4), %vm3564_vm2, %v3562_v48  ;;  %3608 = vmatpush.bf16.msrb.mxu3 (%p3536_p4), %v4133_v49  ;;  %v4138_v24 = vld [vmem:[%s5737_s13] sm:$0xff] (%p3536_p4)  ;;  %v3856_v57 = vld [vmem:[%s4358_s26 + $0x8] sm:$0xff] (%p3536_p4) }
 0x46a   : >> { %s3548_s20 = scalar_lea.vmem [#allocation4], %s3547_s30  ;;  %v4183_v58 = vld [vmem:[%s5738_s14] ss:$0 sm:$0xff] (%p3536_p4)  ;;  %v4184_v45 = vld [vmem:[%s5738_s14 + $0x1] ss:$0 sm:$0xff] (%p3536_p4) }
 0x46b   : >> { %v3549_v9 = vld [vmem:[%s3548_s20] sm:$0x1] }
 0x46c   : >> { %3552 = vst.msk [vmem:[%s3550_s19] sm:$0x1] %vm3551_vm0, %v3549_v9  ;;  %s5820_s19 = sld [smem:[#allocation26_spill]] (%p3536_p4)  ;;  %v4144_v21 = vld [vmem:[%s5739_s15] sm:$0xff] (%p3536_p4) }
 0x46d   : > { %3679 = vmatpush.bf16.msra.mxu3 %v4139_v50  ;;  %v3855_v0 = vld [vmem:[%s4358_s26] sm:$0xff] }
 0x46e   : > { %3859 = vperm.xlu0 %4181, %v3855_v0   ;;  %v4185_v38 = vld [vmem:[%s5740_s16] ss:$0 sm:$0xff] }
 0x471   : > { %3680 = vmatpush.bf16.msra.mxu3 %v4138_v24 }
 0x472   : > { %v4135_v47 = vld [vmem:[%s5820_s19] sm:$0xff] }
 0x473   : > { %v3555_v61 = vld [vmem:[#allocation5] sm:$0xff]  ;;  %v3556_v29 = vld [vmem:[#allocation5 + $0x8] sm:$0xff] }
 0x474   : > { %v3557_v33 = vpack.c.bf16 %v3556_v29, %v3555_v61 }
 0x476   : > { %4062 = vmatmul.msk.bf16.vlgmr.msrb.gmra.mxu3 %vm3332_vm15, %v3557_v33  ;;  %3864 = vperm.xlu0 %4181, %v3856_v57  }
 0x4e0   : > { %v3860_v61 = vpop.permute.xlu0 %3859 }
 0x4ec   : > { %v3581_v46 = vpop.f32.mrf.mxu2 }
 0x4f4   : > { %v3583_v19 = vpop.f32.mrf.mxu2 }
 0x4f9   : > { %v3610_v41 = vpop.f32.mrf.mxu3 }
 0x4fa   : > { %v3611_v15 = vadd.f32 %v3610_v41, %v3581_v46 }
 0x4fc   : > { %v3619_v16 = vadd.f32 %v4182_v3, %v3611_v15  ;;  %v3865_v15 = vpop.permute.xlu0 %3864 }
 0x4fe   : > { %v3621_v26 = vmax.f32 %v3619_v16, 0.0 }
 0x501   : > { %v3612_v30 = vpop.f32.mrf.mxu3 }
 0x502   : > { %v3613_v1 = vadd.f32 %v3612_v30, %v3583_v19 }
 0x504   : > { %v3620_v28 = vadd.f32 %v4182_v3, %v3613_v1 }
 0x506   : > { %v3622_v35 = vmax.f32 %v3620_v28, 0.0 }
 0x508   : > { %v3625_v18 = vpack.c.bf16 %v3622_v35, %v3621_v26 }
 0x50a   : > { %3642 = vmatpush.bf16.msra.mxu2 %v3625_v18 }
 0x50d   : > { %4067 = vmatmul.msk.bf16.vlgmr.msra.gmra.mxu2 %vm3631_vm3, %v4135_v47 }
 0x50e   : > { %3708 = vmatpush.bf16.msrb.mxu2 %v4137_v7 }
 0x512   : > { %3709 = vmatpush.bf16.msrb.mxu2 %v4136_v12 }
 0x516   : > { %3771 = vmatpush.bf16.msra.mxu2 %v4143_v42 }
 0x51a   : > { %3772 = vmatpush.bf16.msra.mxu2 %v4142_v51 }
 0x51d   : > { %4085 = vmatmul.msk.bf16.vlgmr.msrb.gmra.mxu2 %vm3332_vm15, %v3625_v18 }
 0x51e   : > { %3847 = vmatpush.bf16.msrb.mxu2 %v4145_v17 }
 0x522   : > { %3848 = vmatpush.bf16.msrb.mxu2 %v4144_v21 }
 0x590   : > { %v3644_v39 = vpop.f32.mrf.mxu2 }
 0x598   : > { %v3646_v13 = vpop.f32.mrf.mxu2 }
 0x599   : > { %v3653_v34 = vpack.c.bf16 %v3646_v13, %v3644_v39 }
 0x59b   : > { %4076 = vmatmul.msk.bf16.vlgmr.msra.gmra.mxu3 %vm3332_vm15, %v3653_v34 }
 0x5a0   : > { %v3711_v43 = vpop.f32.mrf.mxu2 }
 0x5a8   : > { %v3713_v20 = vpop.f32.mrf.mxu2 }
 0x61e   : > { %v3682_v37 = vpop.f32.mrf.mxu3 }
 0x61f   : > { %v3712_v11 = vadd.f32 %v3711_v43, %v3682_v37 }
 0x621   : > { %v3720_v60 = vadd.f32 %v4183_v58, %v3712_v11 }
 0x623   : > { %v3722_v59 = vmax.f32 %v3720_v60, 0.0 }
 0x626   : > { %v3684_v40 = vpop.f32.mrf.mxu3 }
 0x627   : > { %v3714_v36 = vadd.f32 %v3713_v20, %v3684_v40 }
 0x629   : > { %v3721_v62 = vadd.f32 %v4183_v58, %v3714_v36 }
 0x62b   : > { %v3723_v44 = vmax.f32 %v3721_v62, 0.0 }
 0x62d   : > { %v3724_v25 = vpack.c.bf16 %v3723_v44, %v3722_v59 }
 0x62f   : > { %3732 = vmatpush.bf16.msrb.mxu3 %v3724_v25 }
 0x632   : > { %4086 = vmatmul.msk.bf16.vlgmr.msrb.gmra.mxu3 %vm3631_vm3, %v4135_v47 }
 0x633   : > { %3800 = vmatpush.bf16.msra.mxu3 %v4141_v27 }
 0x637   : > { %3801 = vmatpush.bf16.msra.mxu3 %v4140_v4 }
 0x642   : > { %4112 = vmatmul.msk.bf16.vlgmr.msra.gmra.mxu3 %vm3332_vm15, %v3724_v25 }
 0x6b5   : > { %v3734_v10 = vpop.f32.mrf.mxu3 }
 0x6bd   : > { %v3736_v63 = vpop.f32.mrf.mxu3 }
 0x6be   : > { %v3744_v31 = vpack.c.bf16 %v3736_v63, %v3734_v10 }
 0x6c0   : > { %4103 = vmatmul.msk.bf16.vlgmr.msra.gmra.mxu2 %vm3332_vm15, %v3744_v31 }
 0x6c5   : > { %v3803_v14 = vpop.f32.mrf.mxu3 }
 0x6cd   : > { %v3805_v2 = vpop.f32.mrf.mxu3 }
 0x743   : > { %v3774_v8 = vpop.f32.mrf.mxu2 }
 0x744   : > { %v3804_v22 = vadd.f32 %v3803_v14, %v3774_v8 }
 0x746   : > { %v3813_v23 = vadd.f32 %v4184_v45, %v3804_v22 }
 0x748   : > { %v3815_v9 = vmax.f32 %v3813_v23, 0.0 }
 0x74b   : > { %v3776_v54 = vpop.f32.mrf.mxu2 }
 0x74c   : > { %v3806_v55 = vadd.f32 %v3805_v2, %v3776_v54 }
 0x74e   : > { %v3814_v56 = vadd.f32 %v4184_v45, %v3806_v55 }
 0x750   : > { %v3816_v6 = vmax.f32 %v3814_v56, 0.0 }
 0x752   : > { %v3817_v5 = vpack.c.bf16 %v3816_v6, %v3815_v9 }
 0x754   : > { %4122 = vmatmul.msk.bf16.vlgmr.msrb.gmra.mxu2 %vm3332_vm15, %v3817_v5 }
 0x7d7   : > { %v3850_v49 = vpop.f32.mrf.mxu2 }
 0x7d8   : > { %v3851_v48 = vadd.f32 %v4185_v38, %v3850_v49 }
 0x7da   : > { %v3867_v29 = vmul.f32 %v3860_v61, %v3851_v48 }
 0x7dc   : > { %v3869_v33 = vadd.f32 %v3867_v29, %v5649_v53 }
 0x7de   : > { %3871 = vst.msk [vmem:[%s4363_s0] sm:$0xff] %vm3564_vm2, %v3869_v33 }
 0x7df   : > { %v3852_v46 = vpop.f32.mrf.mxu2 }
 0x7e0   : > { %v3853_v41 = vadd.f32 %v4185_v38, %v3852_v46 }
 0x7e2   : > { %v3868_v3 = vmul.f32 %v3865_v15, %v3853_v41 }
 0x7e4   : > { %v3870_v19 = vadd.f32 %v3868_v3, %v5652_v32 }
 0x7e6   : > { %3872 = vst.msk [vmem:[%s4363_s0 + $0x8] sm:$0xff] %vm3564_vm2, %v3870_v19 }
 0x7e7 PF: > { %s35_s28 = sadd.s32 1, %s4210_s28  }
 0x7e8   : > { %p32_p5 = scmp.ge.s32.totalorder %s35_s28, 4  }
 0x7ea   :  { %34 = sbr.rel (!%p32_p5) target bundleno = 16 (0x10), region = 143 }

</bundles_post_ra>
